<compile_context>
chip_gen: v6e
topology: v6e:2x2x1
jax: 0.10.0
libtpu: 0.0.40
codegen_flags: <defaults>
</compile_context>

<pallas_src>
import jax
import jax.numpy as jnp
import numpy as np
from jax import lax
from jax.experimental import pallas as pl
from jax.experimental.pallas import tpu as pltpu


def _double_conv_kernel(p1_ref, w1_ref, s1_ref, b1_ref, w2_ref, s2_ref, b2_ref,
                        out_ref, mid_ref, acc_ref):
    # p1_ref : (1, H, W, K1p) bf16   lane-dense conv1 im2col (built in wrapper)
    # w1_ref : (K1p, Cp) bf16        conv1 weight slab (9 taps folded into K)
    # w2_ref : (9, Cp, Cp) bf16      conv2 weight slab per tap (tap = ky*3+kx)
    # s*/b*  : (1, Cp) f32           fused BN scale / (conv-bias + BN) bias
    # out_ref: (1, H, W, Cp) f32     lane-dense output (channels padded to Cp)
    # mid_ref: (H+2, W+2, Cp) bf16   padded intermediate (persistent scratch)
    # acc_ref: (H*W, Cp) f32         conv2 MXU accumulator (VMEM)
    H, W, Cp = out_ref.shape[1], out_ref.shape[2], out_ref.shape[3]
    K1p = p1_ref.shape[3]

    # Zero the padded intermediate once: the border stays zero for every grid
    # step, and the interior is fully overwritten below each step.
    @pl.when(pl.program_id(0) == 0)
    def _():
        mid_ref[...] = jnp.zeros_like(mid_ref)

    # ---- conv1: single MXU matmul, K = K1p (= 9*Cin padded to 128 lanes) ----
    acc1 = jnp.dot(p1_ref[0].reshape(H * W, K1p), w1_ref[...],
                   preferred_element_type=jnp.float32)           # (H*W, Cp) f32
    y = jnp.maximum(acc1 * s1_ref[...] + b1_ref[...], 0.0)        # BN + ReLU
    mid_ref[1:H + 1, 1:W + 1, :] = y.astype(mid_ref.dtype).reshape(H, W, Cp)

    # ---- conv2: 9 tap matmuls on shifted mid slices, VMEM f32 accumulation --
    acc_ref[...] = jnp.zeros_like(acc_ref)
    for ky in range(3):
        for kx in range(3):
            m = mid_ref[ky:ky + H, kx:kx + W, :].reshape(H * W, Cp)
            acc_ref[...] += jnp.dot(m, w2_ref[ky * 3 + kx],
                                    preferred_element_type=jnp.float32)
    z = jnp.maximum(acc_ref[...] * s2_ref[...] + b2_ref[...], 0.0)
    out_ref[0] = z.reshape(H, W, Cp).astype(out_ref.dtype)        # all Cp lanes


def double_conv_pallas(x_nchw, params):
    """x_nchw: (N, Cin, H, W) float32 -> (N, Cout, H, W) float32."""
    (w1, cb1, g1, bt1, rm1, rv1,
     w2, cb2, g2, bt2, rm2, rv2) = params
    eps = 1e-5

    N, Cin, H, W = x_nchw.shape
    Cout = w1.shape[0]
    rup = lambda v, m: ((v + m - 1) // m) * m
    Cp = rup(Cout, 128)                      # lane-dense output channels
    K1 = 9 * Cin
    K1p = rup(K1, 128)                       # lane-dense conv1 contraction
    assert W % 8 == 0, "W must be a multiple of 8 (relabel-only reshapes)"

    # NCHW -> NHWC bf16, zero-pad halo, build conv1 im2col in XLA so the
    # kernel's conv1 operand is lane-dense even for tiny Cin.
    x = jnp.transpose(x_nchw, (0, 2, 3, 1)).astype(jnp.bfloat16)
    xp = jnp.pad(x, ((0, 0), (1, 1), (1, 1), (0, 0)))
    taps = [xp[:, ky:ky + H, kx:kx + W, :]
            for ky in range(3) for kx in range(3)]
    p1 = jnp.concatenate(taps, axis=-1)                      # (N, H, W, 9*Cin)
    p1 = jnp.pad(p1, ((0, 0), (0, 0), (0, 0), (0, K1p - K1)))

    # conv1 weight: (Cout, Cin, 3, 3) -> (K1p, Cp) bf16 slab (tap-major rows).
    w1s = jnp.transpose(w1, (2, 3, 1, 0)).reshape(K1, Cout)
    w1s = jnp.pad(w1s, ((0, K1p - K1), (0, Cp - Cout))).astype(jnp.bfloat16)
    # conv2 weight: (Cout, Cout, 3, 3) -> (9, Cp, Cp) bf16, one slab per tap.
    w2t = jnp.transpose(w2, (2, 3, 1, 0))                    # (3, 3, Cin2, Cout)
    w2t = jnp.pad(w2t, ((0, 0), (0, 0), (0, Cp - Cout), (0, Cp - Cout)))
    w2s = w2t.reshape(9, Cp, Cp).astype(jnp.bfloat16)

    # Fuse conv bias + BatchNorm (inference) into per-channel scale / bias.
    s1 = g1 / jnp.sqrt(rv1 + eps)
    b1 = (cb1 - rm1) * s1 + bt1
    s2 = g2 / jnp.sqrt(rv2 + eps)
    b2 = (cb2 - rm2) * s2 + bt2
    pad_c = lambda v: jnp.pad(v, (0, Cp - Cout)).reshape(1, Cp).astype(jnp.float32)
    s1v, b1v, s2v, b2v = pad_c(s1), pad_c(b1), pad_c(s2), pad_c(b2)

    # VMEM budget: double-buffered blocks + persistent scratch (+ headroom),
    # capped by the device's physical VMEM.
    blk_bytes = 2 * (H * W * K1p * 2          # p1 block
                     + K1p * Cp * 2           # w1
                     + 9 * Cp * Cp * 2        # w2
                     + 4 * Cp * 4             # s1,b1,s2,b2
                     + H * W * Cp * 4)        # output block
    scratch_bytes = (H + 2) * (W + 2) * Cp * 2 + H * W * Cp * 4
    try:
        cap = pltpu.get_tpu_info().vmem_capacity_bytes
    except Exception:
        cap = 64 * 1024 * 1024
    vmem_limit = int(min(max(blk_bytes + scratch_bytes + (8 << 20), 16 << 20),
                         int(cap * 0.85)))

    out_nhwc = pl.pallas_call(
        _double_conv_kernel,
        out_shape=jax.ShapeDtypeStruct((N, H, W, Cp), jnp.float32),
        grid_spec=pltpu.PrefetchScalarGridSpec(
            num_scalar_prefetch=0,
            grid=(N,),
            in_specs=[
                pl.BlockSpec((1, H, W, K1p), lambda n: (n, 0, 0, 0)),
                pl.BlockSpec((K1p, Cp), lambda n: (0, 0)),
                pl.BlockSpec((1, Cp), lambda n: (0, 0)),
                pl.BlockSpec((1, Cp), lambda n: (0, 0)),
                pl.BlockSpec((9, Cp, Cp), lambda n: (0, 0, 0)),
                pl.BlockSpec((1, Cp), lambda n: (0, 0)),
                pl.BlockSpec((1, Cp), lambda n: (0, 0)),
            ],
            out_specs=pl.BlockSpec((1, H, W, Cp), lambda n: (n, 0, 0, 0)),
            scratch_shapes=[
                pltpu.VMEM((H + 2, W + 2, Cp), jnp.bfloat16),   # padded mid
                pltpu.VMEM((H * W, Cp), jnp.float32),           # conv2 acc
            ],
        ),
        compiler_params=pltpu.CompilerParams(
            dimension_semantics=("parallel",),
            vmem_limit_bytes=vmem_limit),
    )(p1, w1s, s1v, b1v, w2s, s2v, b2v)

    # Slice the lane padding off and return NCHW to match the PyTorch module.
    return jnp.transpose(out_nhwc[..., :Cout], (0, 3, 1, 2))


def _reference(x_nchw, params):
    """Pure-JAX reference: f32 conv math with bf16-rounded conv operands,
    matching the kernel's bf16 MXU matmuls with f32 accumulation."""
    (w1, cb1, g1, bt1, rm1, rv1,
     w2, cb2, g2, bt2, rm2, rv2) = params
    eps = 1e-5
    q = lambda a: a.astype(jnp.bfloat16).astype(jnp.float32)

    def conv_bn_relu(x, w, cb, g, bt, rm, rv):
        y = lax.conv_general_dilated(
            q(x), q(w), window_strides=(1, 1), padding=((1, 1), (1, 1)),
            dimension_numbers=("NCHW", "OIHW", "NCHW"))
        y = y + cb[None, :, None, None]
        y = (y - rm[None, :, None, None]) / jnp.sqrt(rv + eps)[None, :, None, None]
        y = y * g[None, :, None, None] + bt[None, :, None, None]
        return jnp.maximum(y, 0.0)

    y = conv_bn_relu(x_nchw, w1, cb1, g1, bt1, rm1, rv1)
    return conv_bn_relu(y, w2, cb2, g2, bt2, rm2, rv2)


def make_params(key, in_ch, out_ch):
    ks = jax.random.split(key, 8)
    w1 = jax.random.normal(ks[0], (out_ch, in_ch, 3, 3), jnp.float32) * 0.2
    cb1 = jax.random.normal(ks[1], (out_ch,), jnp.float32) * 0.1
    g1 = 1.0 + 0.1 * jax.random.normal(ks[2], (out_ch,), jnp.float32)
    bt1 = 0.1 * jax.random.normal(ks[3], (out_ch,), jnp.float32)
    rm1 = 0.05 * jax.random.normal(ks[4], (out_ch,), jnp.float32)
    rv1 = 0.5 + jnp.abs(jax.random.normal(ks[5], (out_ch,), jnp.float32)) * 0.5

    w2 = jax.random.normal(ks[6], (out_ch, out_ch, 3, 3), jnp.float32) * 0.2
    cb2 = jax.random.normal(ks[7], (out_ch,), jnp.float32) * 0.1
    g2 = jnp.linspace(0.9, 1.1, out_ch, dtype=jnp.float32)
    bt2 = jnp.linspace(-0.1, 0.1, out_ch, dtype=jnp.float32)
    rm2 = jnp.linspace(-0.05, 0.05, out_ch, dtype=jnp.float32)
    rv2 = jnp.linspace(0.5, 1.5, out_ch, dtype=jnp.float32)
    return (w1, cb1, g1, bt1, rm1, rv1, w2, cb2, g2, bt2, rm2, rv2)


if __name__ == "__main__":
    key = jax.random.PRNGKey(0)
    kx, kp = jax.random.split(key)

    N, Cin, Cout, H, W = 2, 4, 8, 16, 16
    x = jax.random.normal(kx, (N, Cin, H, W), jnp.float32)
    params = make_params(kp, Cin, Cout)

    out = jax.block_until_ready(double_conv_pallas(x, params))
    ref = jax.block_until_ready(_reference(x, params))

    # bf16 MXU operands (f32 accumulate) -> compare against a bf16-operand
    # reference with a correspondingly relaxed tolerance.
    np.testing.assert_allclose(np.asarray(out), np.asarray(ref),
                               rtol=5e-3, atol=5e-3)
    print("KERNEL_OK")
</pallas_src>

<mosaic_0001>
module attributes {stable_mosaic.version = 11 : i64} {
  func.func @_double_conv_kernel(%arg0: i32, %arg1: memref<1x16x16x128xbf16, #tpu.memory_space<vmem>>, %arg2: memref<128x128xbf16, #tpu.memory_space<vmem>>, %arg3: memref<1x128xf32, #tpu.memory_space<vmem>>, %arg4: memref<1x128xf32, #tpu.memory_space<vmem>>, %arg5: memref<9x128x128xbf16, #tpu.memory_space<vmem>>, %arg6: memref<1x128xf32, #tpu.memory_space<vmem>>, %arg7: memref<1x128xf32, #tpu.memory_space<vmem>>, %arg8: memref<1x16x16x128xf32, #tpu.memory_space<vmem>>, %arg9: memref<18x18x128xbf16, #tpu.memory_space<vmem>>, %arg10: memref<256x128xf32, #tpu.memory_space<vmem>>) attributes {dimension_semantics = [#tpu.dimension_semantics<parallel>], iteration_bounds = array<i64: 2>, scalar_prefetch = 0 : i64, scratch_operands = 2 : i64, tpu.core_type = #tpu.core_type<tc>, window_params = [{transform_indices = @transform_0, window_bounds = array<i64: 1, 16, 16, 128>}, {pipeline_mode = #tpu.pipeline_mode<synchronous>, transform_indices = @transform_1, window_bounds = array<i64: 128, 128>}, {pipeline_mode = #tpu.pipeline_mode<synchronous>, transform_indices = @transform_2, window_bounds = array<i64: 1, 128>}, {pipeline_mode = #tpu.pipeline_mode<synchronous>, transform_indices = @transform_3, window_bounds = array<i64: 1, 128>}, {pipeline_mode = #tpu.pipeline_mode<synchronous>, transform_indices = @transform_4, window_bounds = array<i64: 9, 128, 128>}, {pipeline_mode = #tpu.pipeline_mode<synchronous>, transform_indices = @transform_5, window_bounds = array<i64: 1, 128>}, {pipeline_mode = #tpu.pipeline_mode<synchronous>, transform_indices = @transform_6, window_bounds = array<i64: 1, 128>}, {transform_indices = @transform_7, window_bounds = array<i64: 1, 16, 16, 128>}]} {
    %c0_i32 = arith.constant 0 : i32
    %0 = arith.cmpi eq, %arg0, %c0_i32 : i32
    %1 = arith.extui %0 : i1 to i32
    %c0_i32_0 = arith.constant 0 : i32
    %2 = arith.cmpi ne, %1, %c0_i32_0 : i32
    scf.if %2 {
      %cst_119 = arith.constant 0.000000e+00 : bf16
      %106 = vector.broadcast %cst_119 : bf16 to vector<18x18x128xbf16>
      %c0_120 = arith.constant 0 : index
      %c0_121 = arith.constant 0 : index
      %c0_122 = arith.constant 0 : index
      %107 = vector.load %arg9[%c0_120, %c0_121, %c0_122] : memref<18x18x128xbf16, #tpu.memory_space<vmem>>, vector<18x18x128xbf16>
      tpu.vector_store %arg9[%c0_120, %c0_121, %c0_122], %106 {strides = array<i32>} : memref<18x18x128xbf16, #tpu.memory_space<vmem>>, vector<18x18x128xbf16>,
    } else {
    }
    %c0 = arith.constant 0 : index
    %c0_1 = arith.constant 0 : index
    %c0_2 = arith.constant 0 : index
    %c0_3 = arith.constant 0 : index
    %3 = vector.load %arg1[%c0, %c0_1, %c0_2, %c0_3] : memref<1x16x16x128xbf16, #tpu.memory_space<vmem>>, vector<1x16x16x128xbf16>
    %4 = vector.shape_cast %3 : vector<1x16x16x128xbf16> to vector<16x16x128xbf16>
    %5 = vector.shape_cast %4 : vector<16x16x128xbf16> to vector<256x128xbf16>
    %c0_4 = arith.constant 0 : index
    %c0_5 = arith.constant 0 : index
    %6 = vector.load %arg2[%c0_4, %c0_5] : memref<128x128xbf16, #tpu.memory_space<vmem>>, vector<128x128xbf16>
    %cst = arith.constant dense<0.000000e+00> : vector<256x128xf32>
    %7 = tpu.matmul %5, %6, %cst {dimension_numbers = #tpu.dot_dimension_numbers<[1], [0], [0], [1], [0, 0, 1, 1], [], []>} : vector<256x128xbf16>, vector<128x128xbf16>, vector<256x128xf32> -> vector<256x128xf32>
    %c0_6 = arith.constant 0 : index
    %c0_7 = arith.constant 0 : index
    %8 = vector.load %arg3[%c0_6, %c0_7] : memref<1x128xf32, #tpu.memory_space<vmem>>, vector<1x128xf32>
    %9 = vector.broadcast %8 : vector<1x128xf32> to vector<256x128xf32>
    %10 = arith.mulf %7, %9 : vector<256x128xf32>
    %c0_8 = arith.constant 0 : index
    %c0_9 = arith.constant 0 : index
    %11 = vector.load %arg4[%c0_8, %c0_9] : memref<1x128xf32, #tpu.memory_space<vmem>>, vector<1x128xf32>
    %12 = vector.broadcast %11 : vector<1x128xf32> to vector<256x128xf32>
    %13 = arith.addf %10, %12 : vector<256x128xf32>
    %cst_10 = arith.constant 0.000000e+00 : f32
    %14 = vector.broadcast %cst_10 : f32 to vector<256x128xf32>
    %15 = arith.maximumf %13, %14 : vector<256x128xf32>
    %16 = arith.truncf %15 : vector<256x128xf32> to vector<256x128xbf16>
    %17 = vector.shape_cast %16 : vector<256x128xbf16> to vector<16x16x128xbf16>
    %c1 = arith.constant 1 : index
    %c1_11 = arith.constant 1 : index
    %c0_12 = arith.constant 0 : index
    %18 = vector.load %arg9[%c1, %c1_11, %c0_12] : memref<18x18x128xbf16, #tpu.memory_space<vmem>>, vector<16x16x128xbf16>
    tpu.vector_store %arg9[%c1, %c1_11, %c0_12], %17 {strides = array<i32>} : memref<18x18x128xbf16, #tpu.memory_space<vmem>>, vector<16x16x128xbf16>,
    %cst_13 = arith.constant 0.000000e+00 : f32
    %19 = vector.broadcast %cst_13 : f32 to vector<256x128xf32>
    %c0_14 = arith.constant 0 : index
    %c0_15 = arith.constant 0 : index
    %20 = vector.load %arg10[%c0_14, %c0_15] : memref<256x128xf32, #tpu.memory_space<vmem>>, vector<256x128xf32>
    tpu.vector_store %arg10[%c0_14, %c0_15], %19 {strides = array<i32>} : memref<256x128xf32, #tpu.memory_space<vmem>>, vector<256x128xf32>,
    %c0_16 = arith.constant 0 : index
    %c0_17 = arith.constant 0 : index
    %c0_18 = arith.constant 0 : index
    %21 = vector.load %arg9[%c0_16, %c0_17, %c0_18] : memref<18x18x128xbf16, #tpu.memory_space<vmem>>, vector<16x16x128xbf16>
    %22 = vector.shape_cast %21 : vector<16x16x128xbf16> to vector<256x128xbf16>
    %c0_19 = arith.constant 0 : index
    %c0_20 = arith.constant 0 : index
    %23 = vector.load %arg10[%c0_19, %c0_20] : memref<256x128xf32, #tpu.memory_space<vmem>>, vector<256x128xf32>
    %c0_21 = arith.constant 0 : index
    %c0_22 = arith.constant 0 : index
    %c0_23 = arith.constant 0 : index
    %24 = vector.load %arg5[%c0_21, %c0_22, %c0_23] : memref<9x128x128xbf16, #tpu.memory_space<vmem>>, vector<1x128x128xbf16>
    %25 = vector.shape_cast %24 : vector<1x128x128xbf16> to vector<128x128xbf16>
    %cst_24 = arith.constant dense<0.000000e+00> : vector<256x128xf32>
    %26 = tpu.matmul %22, %25, %cst_24 {dimension_numbers = #tpu.dot_dimension_numbers<[1], [0], [0], [1], [0, 0, 1, 1], [], []>} : vector<256x128xbf16>, vector<128x128xbf16>, vector<256x128xf32> -> vector<256x128xf32>
    %27 = arith.addf %23, %26 : vector<256x128xf32>
    %c0_25 = arith.constant 0 : index
    %c0_26 = arith.constant 0 : index
    %28 = vector.load %arg10[%c0_25, %c0_26] : memref<256x128xf32, #tpu.memory_space<vmem>>, vector<256x128xf32>
    tpu.vector_store %arg10[%c0_25, %c0_26], %27 {strides = array<i32>} : memref<256x128xf32, #tpu.memory_space<vmem>>, vector<256x128xf32>,
    %c0_27 = arith.constant 0 : index
    %c1_28 = arith.constant 1 : index
    %c0_29 = arith.constant 0 : index
    %29 = vector.load %arg9[%c0_27, %c1_28, %c0_29] : memref<18x18x128xbf16, #tpu.memory_space<vmem>>, vector<16x16x128xbf16>
    %30 = vector.shape_cast %29 : vector<16x16x128xbf16> to vector<256x128xbf16>
    %c0_30 = arith.constant 0 : index
    %c0_31 = arith.constant 0 : index
    %31 = vector.load %arg10[%c0_30, %c0_31] : memref<256x128xf32, #tpu.memory_space<vmem>>, vector<256x128xf32>
    %c1_32 = arith.constant 1 : index
    %c0_33 = arith.constant 0 : index
    %c0_34 = arith.constant 0 : index
    %32 = vector.load %arg5[%c1_32, %c0_33, %c0_34] : memref<9x128x128xbf16, #tpu.memory_space<vmem>>, vector<1x128x128xbf16>
    %33 = vector.shape_cast %32 : vector<1x128x128xbf16> to vector<128x128xbf16>
    %cst_35 = arith.constant dense<0.000000e+00> : vector<256x128xf32>
    %34 = tpu.matmul %30, %33, %cst_35 {dimension_numbers = #tpu.dot_dimension_numbers<[1], [0], [0], [1], [0, 0, 1, 1], [], []>} : vector<256x128xbf16>, vector<128x128xbf16>, vector<256x128xf32> -> vector<256x128xf32>
    %35 = arith.addf %31, %34 : vector<256x128xf32>
    %c0_36 = arith.constant 0 : index
    %c0_37 = arith.constant 0 : index
    %36 = vector.load %arg10[%c0_36, %c0_37] : memref<256x128xf32, #tpu.memory_space<vmem>>, vector<256x128xf32>
    tpu.vector_store %arg10[%c0_36, %c0_37], %35 {strides = array<i32>} : memref<256x128xf32, #tpu.memory_space<vmem>>, vector<256x128xf32>,
    %c0_38 = arith.constant 0 : index
    %c2 = arith.constant 2 : index
    %c0_39 = arith.constant 0 : index
    %37 = vector.load %arg9[%c0_38, %c2, %c0_39] : memref<18x18x128xbf16, #tpu.memory_space<vmem>>, vector<16x16x128xbf16>
    %38 = vector.shape_cast %37 : vector<16x16x128xbf16> to vector<256x128xbf16>
    %c0_40 = arith.constant 0 : index
    %c0_41 = arith.constant 0 : index
    %39 = vector.load %arg10[%c0_40, %c0_41] : memref<256x128xf32, #tpu.memory_space<vmem>>, vector<256x128xf32>
    %c2_42 = arith.constant 2 : index
    %c0_43 = arith.constant 0 : index
    %c0_44 = arith.constant 0 : index
    %40 = vector.load %arg5[%c2_42, %c0_43, %c0_44] : memref<9x128x128xbf16, #tpu.memory_space<vmem>>, vector<1x128x128xbf16>
    %41 = vector.shape_cast %40 : vector<1x128x128xbf16> to vector<128x128xbf16>
    %cst_45 = arith.constant dense<0.000000e+00> : vector<256x128xf32>
    %42 = tpu.matmul %38, %41, %cst_45 {dimension_numbers = #tpu.dot_dimension_numbers<[1], [0], [0], [1], [0, 0, 1, 1], [], []>} : vector<256x128xbf16>, vector<128x128xbf16>, vector<256x128xf32> -> vector<256x128xf32>
    %43 = arith.addf %39, %42 : vector<256x128xf32>
    %c0_46 = arith.constant 0 : index
    %c0_47 = arith.constant 0 : index
    %44 = vector.load %arg10[%c0_46, %c0_47] : memref<256x128xf32, #tpu.memory_space<vmem>>, vector<256x128xf32>
    tpu.vector_store %arg10[%c0_46, %c0_47], %43 {strides = array<i32>} : memref<256x128xf32, #tpu.memory_space<vmem>>, vector<256x128xf32>,
    %c1_48 = arith.constant 1 : index
    %c0_49 = arith.constant 0 : index
    %c0_50 = arith.constant 0 : index
    %45 = vector.load %arg9[%c1_48, %c0_49, %c0_50] : memref<18x18x128xbf16, #tpu.memory_space<vmem>>, vector<16x16x128xbf16>
    %46 = vector.shape_cast %45 : vector<16x16x128xbf16> to vector<256x128xbf16>
    %c0_51 = arith.constant 0 : index
    %c0_52 = arith.constant 0 : index
    %47 = vector.load %arg10[%c0_51, %c0_52] : memref<256x128xf32, #tpu.memory_space<vmem>>, vector<256x128xf32>
    %c3 = arith.constant 3 : index
    %c0_53 = arith.constant 0 : index
    %c0_54 = arith.constant 0 : index
    %48 = vector.load %arg5[%c3, %c0_53, %c0_54] : memref<9x128x128xbf16, #tpu.memory_space<vmem>>, vector<1x128x128xbf16>
    %49 = vector.shape_cast %48 : vector<1x128x128xbf16> to vector<128x128xbf16>
    %cst_55 = arith.constant dense<0.000000e+00> : vector<256x128xf32>
    %50 = tpu.matmul %46, %49, %cst_55 {dimension_numbers = #tpu.dot_dimension_numbers<[1], [0], [0], [1], [0, 0, 1, 1], [], []>} : vector<256x128xbf16>, vector<128x128xbf16>, vector<256x128xf32> -> vector<256x128xf32>
    %51 = arith.addf %47, %50 : vector<256x128xf32>
    %c0_56 = arith.constant 0 : index
    %c0_57 = arith.constant 0 : index
    %52 = vector.load %arg10[%c0_56, %c0_57] : memref<256x128xf32, #tpu.memory_space<vmem>>, vector<256x128xf32>
    tpu.vector_store %arg10[%c0_56, %c0_57], %51 {strides = array<i32>} : memref<256x128xf32, #tpu.memory_space<vmem>>, vector<256x128xf32>,
    %c1_58 = arith.constant 1 : index
    %c1_59 = arith.constant 1 : index
    %c0_60 = arith.constant 0 : index
    %53 = vector.load %arg9[%c1_58, %c1_59, %c0_60] : memref<18x18x128xbf16, #tpu.memory_space<vmem>>, vector<16x16x128xbf16>
    %54 = vector.shape_cast %53 : vector<16x16x128xbf16> to vector<256x128xbf16>
    %c0_61 = arith.constant 0 : index
    %c0_62 = arith.constant 0 : index
    %55 = vector.load %arg10[%c0_61, %c0_62] : memref<256x128xf32, #tpu.memory_space<vmem>>, vector<256x128xf32>
    %c4 = arith.constant 4 : index
    %c0_63 = arith.constant 0 : index
    %c0_64 = arith.constant 0 : index
    %56 = vector.load %arg5[%c4, %c0_63, %c0_64] : memref<9x128x128xbf16, #tpu.memory_space<vmem>>, vector<1x128x128xbf16>
    %57 = vector.shape_cast %56 : vector<1x128x128xbf16> to vector<128x128xbf16>
    %cst_65 = arith.constant dense<0.000000e+00> : vector<256x128xf32>
    %58 = tpu.matmul %54, %57, %cst_65 {dimension_numbers = #tpu.dot_dimension_numbers<[1], [0], [0], [1], [0, 0, 1, 1], [], []>} : vector<256x128xbf16>, vector<128x128xbf16>, vector<256x128xf32> -> vector<256x128xf32>
    %59 = arith.addf %55, %58 : vector<256x128xf32>
    %c0_66 = arith.constant 0 : index
    %c0_67 = arith.constant 0 : index
    %60 = vector.load %arg10[%c0_66, %c0_67] : memref<256x128xf32, #tpu.memory_space<vmem>>, vector<256x128xf32>
    tpu.vector_store %arg10[%c0_66, %c0_67], %59 {strides = array<i32>} : memref<256x128xf32, #tpu.memory_space<vmem>>, vector<256x128xf32>,
    %c1_68 = arith.constant 1 : index
    %c2_69 = arith.constant 2 : index
    %c0_70 = arith.constant 0 : index
    %61 = vector.load %arg9[%c1_68, %c2_69, %c0_70] : memref<18x18x128xbf16, #tpu.memory_space<vmem>>, vector<16x16x128xbf16>
    %62 = vector.shape_cast %61 : vector<16x16x128xbf16> to vector<256x128xbf16>
    %c0_71 = arith.constant 0 : index
    %c0_72 = arith.constant 0 : index
    %63 = vector.load %arg10[%c0_71, %c0_72] : memref<256x128xf32, #tpu.memory_space<vmem>>, vector<256x128xf32>
    %c5 = arith.constant 5 : index
    %c0_73 = arith.constant 0 : index
    %c0_74 = arith.constant 0 : index
    %64 = vector.load %arg5[%c5, %c0_73, %c0_74] : memref<9x128x128xbf16, #tpu.memory_space<vmem>>, vector<1x128x128xbf16>
    %65 = vector.shape_cast %64 : vector<1x128x128xbf16> to vector<128x128xbf16>
    %cst_75 = arith.constant dense<0.000000e+00> : vector<256x128xf32>
    %66 = tpu.matmul %62, %65, %cst_75 {dimension_numbers = #tpu.dot_dimension_numbers<[1], [0], [0], [1], [0, 0, 1, 1], [], []>} : vector<256x128xbf16>, vector<128x128xbf16>, vector<256x128xf32> -> vector<256x128xf32>
    %67 = arith.addf %63, %66 : vector<256x128xf32>
    %c0_76 = arith.constant 0 : index
    %c0_77 = arith.constant 0 : index
    %68 = vector.load %arg10[%c0_76, %c0_77] : memref<256x128xf32, #tpu.memory_space<vmem>>, vector<256x128xf32>
    tpu.vector_store %arg10[%c0_76, %c0_77], %67 {strides = array<i32>} : memref<256x128xf32, #tpu.memory_space<vmem>>, vector<256x128xf32>,
    %c2_78 = arith.constant 2 : index
    %c0_79 = arith.constant 0 : index
    %c0_80 = arith.constant 0 : index
    %69 = vector.load %arg9[%c2_78, %c0_79, %c0_80] : memref<18x18x128xbf16, #tpu.memory_space<vmem>>, vector<16x16x128xbf16>
    %70 = vector.shape_cast %69 : vector<16x16x128xbf16> to vector<256x128xbf16>
    %c0_81 = arith.constant 0 : index
    %c0_82 = arith.constant 0 : index
    %71 = vector.load %arg10[%c0_81, %c0_82] : memref<256x128xf32, #tpu.memory_space<vmem>>, vector<256x128xf32>
    %c6 = arith.constant 6 : index
    %c0_83 = arith.constant 0 : index
    %c0_84 = arith.constant 0 : index
    %72 = vector.load %arg5[%c6, %c0_83, %c0_84] : memref<9x128x128xbf16, #tpu.memory_space<vmem>>, vector<1x128x128xbf16>
    %73 = vector.shape_cast %72 : vector<1x128x128xbf16> to vector<128x128xbf16>
    %cst_85 = arith.constant dense<0.000000e+00> : vector<256x128xf32>
    %74 = tpu.matmul %70, %73, %cst_85 {dimension_numbers = #tpu.dot_dimension_numbers<[1], [0], [0], [1], [0, 0, 1, 1], [], []>} : vector<256x128xbf16>, vector<128x128xbf16>, vector<256x128xf32> -> vector<256x128xf32>
    %75 = arith.addf %71, %74 : vector<256x128xf32>
    %c0_86 = arith.constant 0 : index
    %c0_87 = arith.constant 0 : index
    %76 = vector.load %arg10[%c0_86, %c0_87] : memref<256x128xf32, #tpu.memory_space<vmem>>, vector<256x128xf32>
    tpu.vector_store %arg10[%c0_86, %c0_87], %75 {strides = array<i32>} : memref<256x128xf32, #tpu.memory_space<vmem>>, vector<256x128xf32>,
    %c2_88 = arith.constant 2 : index
    %c1_89 = arith.constant 1 : index
    %c0_90 = arith.constant 0 : index
    %77 = vector.load %arg9[%c2_88, %c1_89, %c0_90] : memref<18x18x128xbf16, #tpu.memory_space<vmem>>, vector<16x16x128xbf16>
    %78 = vector.shape_cast %77 : vector<16x16x128xbf16> to vector<256x128xbf16>
    %c0_91 = arith.constant 0 : index
    %c0_92 = arith.constant 0 : index
    %79 = vector.load %arg10[%c0_91, %c0_92] : memref<256x128xf32, #tpu.memory_space<vmem>>, vector<256x128xf32>
    %c7 = arith.constant 7 : index
    %c0_93 = arith.constant 0 : index
    %c0_94 = arith.constant 0 : index
    %80 = vector.load %arg5[%c7, %c0_93, %c0_94] : memref<9x128x128xbf16, #tpu.memory_space<vmem>>, vector<1x128x128xbf16>
    %81 = vector.shape_cast %80 : vector<1x128x128xbf16> to vector<128x128xbf16>
    %cst_95 = arith.constant dense<0.000000e+00> : vector<256x128xf32>
    %82 = tpu.matmul %78, %81, %cst_95 {dimension_numbers = #tpu.dot_dimension_numbers<[1], [0], [0], [1], [0, 0, 1, 1], [], []>} : vector<256x128xbf16>, vector<128x128xbf16>, vector<256x128xf32> -> vector<256x128xf32>
    %83 = arith.addf %79, %82 : vector<256x128xf32>
    %c0_96 = arith.constant 0 : index
    %c0_97 = arith.constant 0 : index
    %84 = vector.load %arg10[%c0_96, %c0_97] : memref<256x128xf32, #tpu.memory_space<vmem>>, vector<256x128xf32>
    tpu.vector_store %arg10[%c0_96, %c0_97], %83 {strides = array<i32>} : memref<256x128xf32, #tpu.memory_space<vmem>>, vector<256x128xf32>,
    %c2_98 = arith.constant 2 : index
    %c2_99 = arith.constant 2 : index
    %c0_100 = arith.constant 0 : index
    %85 = vector.load %arg9[%c2_98, %c2_99, %c0_100] : memref<18x18x128xbf16, #tpu.memory_space<vmem>>, vector<16x16x128xbf16>
    %86 = vector.shape_cast %85 : vector<16x16x128xbf16> to vector<256x128xbf16>
    %c0_101 = arith.constant 0 : index
    %c0_102 = arith.constant 0 : index
    %87 = vector.load %arg10[%c0_101, %c0_102] : memref<256x128xf32, #tpu.memory_space<vmem>>, vector<256x128xf32>
    %c8 = arith.constant 8 : index
    %c0_103 = arith.constant 0 : index
    %c0_104 = arith.constant 0 : index
    %88 = vector.load %arg5[%c8, %c0_103, %c0_104] : memref<9x128x128xbf16, #tpu.memory_space<vmem>>, vector<1x128x128xbf16>
    %89 = vector.shape_cast %88 : vector<1x128x128xbf16> to vector<128x128xbf16>
    %cst_105 = arith.constant dense<0.000000e+00> : vector<256x128xf32>
    %90 = tpu.matmul %86, %89, %cst_105 {dimension_numbers = #tpu.dot_dimension_numbers<[1], [0], [0], [1], [0, 0, 1, 1], [], []>} : vector<256x128xbf16>, vector<128x128xbf16>, vector<256x128xf32> -> vector<256x128xf32>
    %91 = arith.addf %87, %90 : vector<256x128xf32>
    %c0_106 = arith.constant 0 : index
    %c0_107 = arith.constant 0 : index
    %92 = vector.load %arg10[%c0_106, %c0_107] : memref<256x128xf32, #tpu.memory_space<vmem>>, vector<256x128xf32>
    tpu.vector_store %arg10[%c0_106, %c0_107], %91 {strides = array<i32>} : memref<256x128xf32, #tpu.memory_space<vmem>>, vector<256x128xf32>,
    %c0_108 = arith.constant 0 : index
    %c0_109 = arith.constant 0 : index
    %93 = vector.load %arg10[%c0_108, %c0_109] : memref<256x128xf32, #tpu.memory_space<vmem>>, vector<256x128xf32>
    %c0_110 = arith.constant 0 : index
    %c0_111 = arith.constant 0 : index
    %94 = vector.load %arg6[%c0_110, %c0_111] : memref<1x128xf32, #tpu.memory_space<vmem>>, vector<1x128xf32>
    %95 = vector.broadcast %94 : vector<1x128xf32> to vector<256x128xf32>
    %96 = arith.mulf %93, %95 : vector<256x128xf32>
    %c0_112 = arith.constant 0 : index
    %c0_113 = arith.constant 0 : index
    %97 = vector.load %arg7[%c0_112, %c0_113] : memref<1x128xf32, #tpu.memory_space<vmem>>, vector<1x128xf32>
    %98 = vector.broadcast %97 : vector<1x128xf32> to vector<256x128xf32>
    %99 = arith.addf %96, %98 : vector<256x128xf32>
    %cst_114 = arith.constant 0.000000e+00 : f32
    %100 = vector.broadcast %cst_114 : f32 to vector<256x128xf32>
    %101 = arith.maximumf %99, %100 : vector<256x128xf32>
    %102 = vector.shape_cast %101 : vector<256x128xf32> to vector<16x16x128xf32>
    %c0_115 = arith.constant 0 : index
    %c0_116 = arith.constant 0 : index
    %c0_117 = arith.constant 0 : index
    %c0_118 = arith.constant 0 : index
    %103 = vector.load %arg8[%c0_115, %c0_116, %c0_117, %c0_118] : memref<1x16x16x128xf32, #tpu.memory_space<vmem>>, vector<1x16x16x128xf32>
    %104 = vector.shape_cast %103 : vector<1x16x16x128xf32> to vector<16x16x128xf32>
    %105 = vector.shape_cast %102 : vector<16x16x128xf32> to vector<1x16x16x128xf32>
    tpu.vector_store %arg8[%c0_115, %c0_116, %c0_117, %c0_118], %105 {strides = array<i32>} : memref<1x16x16x128xf32, #tpu.memory_space<vmem>>, vector<1x16x16x128xf32>,
    return
  }
  func.func @transform_0(%arg0: i32) -> (i32, i32, i32, i32) {
    %c0_i32 = arith.constant 0 : i32
    %c0_i32_0 = arith.constant 0 : i32
    %c0_i32_1 = arith.constant 0 : i32
    %c0_i32_2 = arith.constant 0 : i32
    return %arg0, %c0_i32, %c0_i32_0, %c0_i32_1 : i32, i32, i32, i32
  }
  func.func @transform_1(%arg0: i32) -> (i32, i32) {
    %c0_i32 = arith.constant 0 : i32
    %c0_i32_0 = arith.constant 0 : i32
    %c0_i32_1 = arith.constant 0 : i32
    return %c0_i32, %c0_i32_0 : i32, i32
  }
  func.func @transform_2(%arg0: i32) -> (i32, i32) {
    %c0_i32 = arith.constant 0 : i32
    %c0_i32_0 = arith.constant 0 : i32
    %c0_i32_1 = arith.constant 0 : i32
    return %c0_i32, %c0_i32_0 : i32, i32
  }
  func.func @transform_3(%arg0: i32) -> (i32, i32) {
    %c0_i32 = arith.constant 0 : i32
    %c0_i32_0 = arith.constant 0 : i32
    %c0_i32_1 = arith.constant 0 : i32
    return %c0_i32, %c0_i32_0 : i32, i32
  }
  func.func @transform_4(%arg0: i32) -> (i32, i32, i32) {
    %c0_i32 = arith.constant 0 : i32
    %c0_i32_0 = arith.constant 0 : i32
    %c0_i32_1 = arith.constant 0 : i32
    %c0_i32_2 = arith.constant 0 : i32
    return %c0_i32, %c0_i32_0, %c0_i32_1 : i32, i32, i32
  }
  func.func @transform_5(%arg0: i32) -> (i32, i32) {
    %c0_i32 = arith.constant 0 : i32
    %c0_i32_0 = arith.constant 0 : i32
    %c0_i32_1 = arith.constant 0 : i32
    return %c0_i32, %c0_i32_0 : i32, i32
  }
  func.func @transform_6(%arg0: i32) -> (i32, i32) {
    %c0_i32 = arith.constant 0 : i32
    %c0_i32_0 = arith.constant 0 : i32
    %c0_i32_1 = arith.constant 0 : i32
    return %c0_i32, %c0_i32_0 : i32, i32
  }
  func.func @transform_7(%arg0: i32) -> (i32, i32, i32, i32) {
    %c0_i32 = arith.constant 0 : i32
    %c0_i32_0 = arith.constant 0 : i32
    %c0_i32_1 = arith.constant 0 : i32
    %c0_i32_2 = arith.constant 0 : i32
    return %arg0, %c0_i32, %c0_i32_0, %c0_i32_1 : i32, i32, i32, i32
  }
}

</mosaic_0001>

<bundles_post_ra>
// kernel: tpu_custom_call.1
= control target key start
LH: loop header
LB: loop body
LE: loop exit
PB: predicated region body
PF: predicated region fallthrough
CT: control target
= control target key end

     0   :  { %s10782_s0 = inlined_call_operand.hbm [shape: bf16[2,16,16,128], index: 0, kind: input, shape index: {}]   ;;  %s10783_s1 = inlined_call_operand.hbm [shape: bf16[128,128], index: 1, kind: input, shape index: {}]   ;;  %s10784_s2 = inlined_call_operand.vmem [shape: f32[1,128], index: 2, kind: input, shape index: {}]   ;;  %s10785_s3 = inlined_call_operand.vmem [shape: f32[1,128], index: 3, kind: input, shape index: {}]   ;;  %s10786_s4 = inlined_call_operand.hbm [shape: bf16[9,128,128], index: 4, kind: input, shape index: {}]   ;;  %s10787_s5 = inlined_call_operand.vmem [shape: f32[1,128], index: 5, kind: input, shape index: {}]   ;;  %s10788_s6 = inlined_call_operand.vmem [shape: f32[1,128], index: 6, kind: input, shape index: {}]   ;;  %s10789_s7 = inlined_call_operand.hbm [shape: f32[2,16,16,128], index: 7, kind: output, shape index: {}]  }
   0x1   :  { %10796 = sst [smem:[#allocation72_spill]] %s10783_s1 }
   0x2   :  { %12 = vsyncpa [#allocation5], 0 }
   0x3   :  { %14 = vsyncpa [#allocation5 + $0x1], 0 }
   0x4   :  { %15 = vsyncpa [#allocation8], 0 }
   0x5   :  { %16 = vsyncpa [#allocation6], 0 }
   0x6   :  { %18 = vsyncpa [#allocation6 + $0x1], 0  ;;  %s8804_s24 = smov 0   ;;  %s8806_s25 = smov 0  }
   0x7   :  { %s8808_s26 = smov 0   ;;  %s8810_s27 = smov 0  }
   0x8 LB: > { %s8825_s28 = sadd.s32 4294967295, %s8753_s27   ;;  %s7289_s29 = sadd.s32 4294967294, %s8753_s27   ;;  %s8753_s27 = sphi %s8810_s27, %s10949_s27   ;;  %s8749_s26 = sphi %s8808_s26, %s10948_s26   ;;  %s8745_s25 = sphi %s8806_s25, %s10947_s25   ;;  %s8741_s24 = sphi %s8804_s24, %s10946_s24  }
   0x9   : > { %p44_p0 = scmp.ne.s32.totalorder %s8745_s25, %s8741_s24  ;;  %p10791_p1 = scmp.eq.s32.totalorder %s8825_s28, 0 }
   0xa   : > { %p194_p2 = scmp.eq.s32.totalorder %s8825_s28, 1  ;;  %p200_p3 = scmp.eq.s32.totalorder %s7289_s29, 1 }
   0xb   : > { %p8834_p4 = por %p10791_p1, %p44_p0  ;;  %p7290_p5 = scmp.ge.s32.totalorder %s8753_s27, 1 }
   0xc   : > { %p8839_p6 = por %p200_p3, %p44_p0  ;;  %p207_p7 = scmp.lt.s32.totalorder %s8753_s27, 3 }
   0xd   : > { %s10797_s30 = scalar_select %p8834_p4, 1, 0 }
   0xe   : > { %s10798_s8 = scalar_select %p8839_p6, 1, 0 }
   0xf   : > { %p8845_p9 = pnand %p7290_p5, %p207_p7  ;;  %s8755_s10 = smov [#allocation7]  }
  0x10   : > { %s219_s11 = sshll.u32 %s8755_s10, 4  ;;  %s8756_s13 = smov [#allocation9]   ;;  %s220_s11 = int_to_ptr.vmem [resolvable:$true] %s219_s11 }
  0x11   : > { %s10799_s9 = scalar_select %p8845_p9, 1, 0 }
  0x12   : > { %p8398_p10 = pneg %p8845_p9  ;;  %s238_s14 = sshll.u32 %s8756_s13, 4  ;;  %s239_s14 = int_to_ptr.vmem [resolvable:$true] %s238_s14 }
  0x13   : > { %s8616_s15 = scalar_lea.vmem %s220_s11, 1024  ;;  %p8624_p7 = scmp.lt.s32.totalorder %s220_s11, %s220_s11 }
  0x14   : > { %p8854_p12 = pnand %p8398_p10, %p10791_p1  ;;  %p8617_p0 = scmp.ne.s32.totalorder %s220_s11, %s8616_s15 }
  0x15   : > { %p8625_p11 = scmp.lt.s32.totalorder %s8616_s15, %s8616_s15 }
  0x16   : > { %p8607_p13 = pneg %p8854_p12 }
  0x17   : > { %p8626_p8 = por %p8625_p11, %p8624_p7 }
  0x18   : > { %p8619_p3 = pnand %p8617_p0, %p8607_p13 }
  0x1a   : > { %p8620_p5 = pneg %p8619_p3 }
  0x1c   : > { %p8627_p10 = pnand %p8626_p8, %p8620_p5 }
  0x1e   : > { %8630 = shalt.err (!%p8627_p10)
}
  0x1f   : > { %s10790_s16 = smov 64   ;;  %s10792_s17 = smov 4  }
  0x20   : > { %s10801_s1 = sld [smem:[#allocation72_spill]]  ;;  %s8642_s20 = scalar_lea.vmem %s239_s14, 9216 }
  0x21   : > { %p8643_p0 = scmp.ne.s32.totalorder %s239_s14, %s8642_s20  ;;  %p8650_p8 = scmp.lt.s32.totalorder %s239_s14, %s239_s14 }
  0x22   : > { %p8651_p5 = scmp.lt.s32.totalorder %s8642_s20, %s8642_s20 }
  0x23   : > { %p8645_p3 = pnand %p8643_p0, %p8607_p13 }
  0x24   : > { %p8652_p7 = por %p8651_p5, %p8650_p8 }
  0x25   : > { %p8646_p11 = pneg %p8645_p3 }
  0x26   : > { %8401 = dma.hbm_to_vmem [thread:$0]  (!%p8854_p12), %s10801_s1, 1024, %s220_s11, [#allocation8], %s10790_s16, %s10790_s16, %s10792_s17  }
  0x27   : > { %p8653_p10 = pnand %p8652_p7, %p8646_p11 }
  0x29   : > { %8656 = shalt.err (!%p8653_p10)
}
  0x2a   : > { %8404 = dma.hbm_to_vmem [thread:$0]  (!%p8854_p12), %s10786_s4, 9216, %s239_s14, [#allocation8], %s10790_s16, %s10790_s16, %s10792_s17  }
  0x2b   : > { %s8883_s23 = sadd.s32 1, %s8753_s27   ;;  %s31_s29 = sadd.s32 1, %s8749_s26 }
  0x2c   : > { %s28_s10 = ssub.s32 %s8753_s27, %s8883_s23  ;;  %p38_p13 = scmp.ne.s32.totalorder %s8749_s26, %s8745_s25 }
  0x2d   : > { %p29_p0 = scmp.eq.s32.totalorder %s28_s10, 0  ;;  %p39_p3 = scmp.eq.s32.totalorder %s8753_s27, 0 }
  0x2e   : > { %p8893_p11 = por %p194_p2, %p38_p13  ;;  %p8415_p8 = scmp.lt.s32.totalorder %s8753_s27, 2 }
  0x2f   : > { %s8899_s12 = scalar_select %p29_p0, %s8749_s26, %s31_s29  }
  0x30   : > { %s10802_s11 = scalar_select %p8893_p11, 1, 0 }
  0x31   : > { %p40_p5 = por %p39_p3, %p38_p13  ;;  %s258_s13 = sand.u32 1, %s8749_s26  }
  0x32   : > { %s7294_s15 = sshll.u32 %s258_s13, 7  ;;  %s7632_s14 = sshll.u32 %s8753_s27, 11 }
  0x33   : > { %s8906_s20 = scalar_lea.hbm %s10782_s0, %s7632_s14  ;;  %s262_s21 = scalar_lea.vmem [#allocation4], %s7294_s15 }
  0x34   : > { %s269_s22 = sshll.u32 %s262_s21, 4  ;;  %p8910_p2 = pnand %p8415_p8, %p40_p5  ;;  %s8908_s22 = int_to_ptr.vmem [resolvable:$true] %s269_s22 }
  0x35   : > { %s8914_s29 = scalar_lea.sflag [#allocation5], %s258_s13  ;;  %s8657_s16 = scalar_lea.hbm %s8906_s20, 2048 }
  0x36   : > { %p8658_p12 = scmp.ne.s32.totalorder %s8906_s20, %s8657_s16  ;;  %p8659_p7 = pneg %p8910_p2 }
  0x37   : > { %s8662_s15 = scalar_lea.hbm %s10782_s0, 4096  ;;  %p8663_p0 = scmp.lt.s32.totalorder %s8906_s20, %s10782_s0 }
  0x38   : > { %p8660_p10 = pnand %p8659_p7, %p8658_p12  ;;  %p8664_p3 = scmp.lt.s32.totalorder %s8662_s15, %s8657_s16 }
  0x3a   : > { %p8661_p13 = pneg %p8660_p10  ;;  %p8665_p8 = por %p8664_p3, %p8663_p0 }
  0x3c   : > { %p8666_p5 = pnand %p8665_p8, %p8661_p13 }
  0x3e   : > { %8669 = shalt.err (!%p8666_p5)
}
  0x3f   : > { %s8670_s13 = scalar_lea.vmem %s8908_s22, 2048  ;;  %s8759_s17 = smov [#allocation4]  }
  0x40   : > { %p8671_p1 = scmp.ne.s32.totalorder %s8908_s22, %s8670_s13  ;;  %s8675_s1 = sshll.u32 %s8759_s17, 4  ;;  %s8676_s1 = int_to_ptr.vmem [resolvable:$false] %s8675_s1 }
  0x41   : > { %s8677_s14 = scalar_lea.vmem %s8676_s1, 4096  ;;  %p8678_p10 = scmp.lt.s32.totalorder %s8908_s22, %s8676_s1 }
  0x42   : > { %p8673_p6 = pnand %p8671_p1, %p8659_p7  ;;  %p8679_p11 = scmp.lt.s32.totalorder %s8677_s14, %s8670_s13 }
  0x44   : > { %p8674_p12 = pneg %p8673_p6  ;;  %p8680_p4 = por %p8679_p11, %p8678_p10 }
  0x46   : > { %p8681_p9 = pnand %p8680_p4, %p8674_p12 }
  0x48   : > { %8684 = shalt.err (!%p8681_p9)
}
  0x49   : > { %s10804_s16 = smov 4   ;;  %s10805_s18 = smov 64  }
  0x4a   : > { %8408 = dma.hbm_to_vmem [thread:$0]  (!%p8910_p2), %s8906_s20, 2048, %s8908_s22, %s8914_s29, %s10805_s18, %s10805_s18, %s10804_s16  }
  0x4b   : > { %p10806_p1 = scmp.ne.s32.totalorder %s10799_s9, 0 }
  0x4d   : > { %281 = sbr.rel (%p10806_p1) target bundleno = 984 (0x3d8), region = 48 }
  0x52   : > { %s8941_s17 = sand.u32 1, %s8745_s25   ;;  %p10807_p4 = scmp.ne.s32.totalorder %s10797_s30, 0 }
  0x53   : > { %s7298_s1 = sshll.u32 %s8941_s17, 7  ;;  %s284_s15 = scalar_lea.sflag [#allocation5], %s8941_s17 }
  0x54   : > { %s8945_s19 = scalar_lea.vmem [#allocation4], %s7298_s1 }
  0x55   : > { %8728 = dma.done.wait (%p10807_p4), %s284_s15, 2048  }
  0x56   : > { %8730 = vsyncadd (%p10807_p4), %s284_s15, 4294965248  ;;  %p10808_p6 = scmp.eq.s32.totalorder %s8825_s28, 0 }
  0x58   : > { %8732 = dma.done.wait (%p10808_p6), [#allocation8], 10240   ;;  %p10809_p9 = pmov %p10808_p6 }
  0x59   : > { %s7301_s9 = sshll.u32 %s8941_s17, 8  ;;  %p10810_p11 = scmp.ne.s32.totalorder %s8825_s28, 0 }
  0x5a   : > { %8734 = vsyncadd (%p10809_p9), [#allocation8], 4294957056  ;;  %s8956_s20 = scalar_lea.vmem [#allocation10], %s7301_s9 }
  0x5b   : > { %330 = sbr.rel (%p10810_p11) target bundleno = 124 (0x7c), region = 64 }
  0x60   : > { %v8760_v0 = vmov 0  }
  0x61   : > { %331 = vst [vmem:[#allocation2] sm:$0xf] %v8760_v0  ;;  %332 = vst [vmem:[#allocation2 + $0x4] sm:$0xf] %v8760_v0 }
  0x62   : > { %333 = vst [vmem:[#allocation2 + $0x8] sm:$0x1] %v8760_v0  ;;  %334 = vst [vmem:[#allocation2 + $0xc] sm:$0xf] %v8760_v0 }
  0x63   : > { %335 = vst [vmem:[#allocation2 + $0x10] sm:$0xf] %v8760_v0  ;;  %336 = vst [vmem:[#allocation2 + $0x14] sm:$0x1] %v8760_v0 }
  0x64   : > { %337 = vst [vmem:[#allocation2 + $0x18] sm:$0xf] %v8760_v0  ;;  %338 = vst [vmem:[#allocation2 + $0x1c] sm:$0xf] %v8760_v0 }
  0x65   : > { %339 = vst [vmem:[#allocation2 + $0x20] sm:$0x1] %v8760_v0  ;;  %340 = vst [vmem:[#allocation2 + $0x24] sm:$0xf] %v8760_v0 }
  0x66   : > { %341 = vst [vmem:[#allocation2 + $0x28] sm:$0xf] %v8760_v0  ;;  %342 = vst [vmem:[#allocation2 + $0x2c] sm:$0x1] %v8760_v0 }
  0x67   : > { %343 = vst [vmem:[#allocation2 + $0x30] sm:$0xf] %v8760_v0  ;;  %344 = vst [vmem:[#allocation2 + $0x34] sm:$0xf] %v8760_v0 }
  0x68   : > { %345 = vst [vmem:[#allocation2 + $0x38] sm:$0x1] %v8760_v0  ;;  %346 = vst [vmem:[#allocation2 + $0x3c] sm:$0xf] %v8760_v0 }
  0x69   : > { %347 = vst [vmem:[#allocation2 + $0x40] sm:$0xf] %v8760_v0  ;;  %348 = vst [vmem:[#allocation2 + $0x44] sm:$0x1] %v8760_v0 }
  0x6a   : > { %349 = vst [vmem:[#allocation2 + $0x48] sm:$0xf] %v8760_v0  ;;  %350 = vst [vmem:[#allocation2 + $0x4c] sm:$0xf] %v8760_v0 }
  0x6b   : > { %351 = vst [vmem:[#allocation2 + $0x50] sm:$0x1] %v8760_v0  ;;  %352 = vst [vmem:[#allocation2 + $0x54] sm:$0xf] %v8760_v0 }
  0x6c   : > { %353 = vst [vmem:[#allocation2 + $0x58] sm:$0xf] %v8760_v0  ;;  %354 = vst [vmem:[#allocation2 + $0x5c] sm:$0x1] %v8760_v0 }
  0x6d   : > { %355 = vst [vmem:[#allocation2 + $0x60] sm:$0xf] %v8760_v0  ;;  %356 = vst [vmem:[#allocation2 + $0x64] sm:$0xf] %v8760_v0 }
  0x6e   : > { %357 = vst [vmem:[#allocation2 + $0x68] sm:$0x1] %v8760_v0  ;;  %358 = vst [vmem:[#allocation2 + $0x6c] sm:$0xf] %v8760_v0 }
  0x6f   : > { %359 = vst [vmem:[#allocation2 + $0x70] sm:$0xf] %v8760_v0  ;;  %360 = vst [vmem:[#allocation2 + $0x74] sm:$0x1] %v8760_v0 }
  0x70   : > { %361 = vst [vmem:[#allocation2 + $0x78] sm:$0xf] %v8760_v0  ;;  %362 = vst [vmem:[#allocation2 + $0x7c] sm:$0xf] %v8760_v0 }
  0x71   : > { %363 = vst [vmem:[#allocation2 + $0x80] sm:$0x1] %v8760_v0  ;;  %364 = vst [vmem:[#allocation2 + $0x84] sm:$0xf] %v8760_v0 }
  0x72   : > { %365 = vst [vmem:[#allocation2 + $0x88] sm:$0xf] %v8760_v0  ;;  %366 = vst [vmem:[#allocation2 + $0x8c] sm:$0x1] %v8760_v0 }
  0x73   : > { %367 = vst [vmem:[#allocation2 + $0x90] sm:$0xf] %v8760_v0  ;;  %368 = vst [vmem:[#allocation2 + $0x94] sm:$0xf] %v8760_v0 }
  0x74   : > { %369 = vst [vmem:[#allocation2 + $0x98] sm:$0x1] %v8760_v0  ;;  %370 = vst [vmem:[#allocation2 + $0x9c] sm:$0xf] %v8760_v0 }
  0x75   : > { %371 = vst [vmem:[#allocation2 + $0xa0] sm:$0xf] %v8760_v0  ;;  %372 = vst [vmem:[#allocation2 + $0xa4] sm:$0x1] %v8760_v0 }
  0x76   : > { %373 = vst [vmem:[#allocation2 + $0xa8] sm:$0xf] %v8760_v0  ;;  %374 = vst [vmem:[#allocation2 + $0xac] sm:$0xf] %v8760_v0 }
  0x77   : > { %375 = vst [vmem:[#allocation2 + $0xb0] sm:$0x1] %v8760_v0  ;;  %376 = vst [vmem:[#allocation2 + $0xb4] sm:$0xf] %v8760_v0 }
  0x78   : > { %377 = vst [vmem:[#allocation2 + $0xb8] sm:$0xf] %v8760_v0  ;;  %378 = vst [vmem:[#allocation2 + $0xbc] sm:$0x1] %v8760_v0 }
  0x79   : > { %379 = vst [vmem:[#allocation2 + $0xc0] sm:$0xf] %v8760_v0  ;;  %380 = vst [vmem:[#allocation2 + $0xc4] sm:$0xf] %v8760_v0 }
  0x7a   : > { %381 = vst [vmem:[#allocation2 + $0xc8] sm:$0x1] %v8760_v0  ;;  %382 = vst [vmem:[#allocation2 + $0xcc] sm:$0xf] %v8760_v0 }
  0x7b   : > { %383 = vst [vmem:[#allocation2 + $0xd0] sm:$0xf] %v8760_v0  ;;  %384 = vst [vmem:[#allocation2 + $0xd4] sm:$0x1] %v8760_v0 }
  0x7c PF: > { %v8458_v1 = vld [vmem:[#allocation7 + $0x38] sm:$0xff]   ;;  %v8459_v2 = vld [vmem:[#allocation7 + $0x30] sm:$0xff]   ;;  %v8460_v3 = vld [vmem:[#allocation7 + $0x28] sm:$0xff]   ;;  %vm1914_vm0 = vsmask.f32 3328  ;;  %vm1268_vm3 = vcmask 1043456  }
  0x7d   : > { %7906 = vmatprep.subr.bf16.mxu0 %v8458_v1  ;;  %v8461_v4 = vld [vmem:[#allocation7 + $0x20] sm:$0xff]   ;;  %v8462_v6 = vld [vmem:[#allocation7 + $0x18] sm:$0xff]   ;;  %v8463_v7 = vld [vmem:[#allocation7 + $0x10] sm:$0xff]   ;;  %vm1915_vm1 = vsmask.f32 7440  ;;  %vm1275_vm7 = vcmask 1040384  }
  0x7e   : > { %7907 = vmatpush3.bf16.msra.mxu0 %v8458_v1  ;;  %v8466_v5 = vld [vmem:[%s8945_s19] sm:$0xff]   ;;  %v8464_v8 = vld [vmem:[#allocation7 + $0x8] sm:$0xff]   ;;  %v8482_v10 = vld [vmem:[#allocation9 + $0x38] sm:$0xff]   ;;  %vm1269_vm4 = vsmask.f32 7938  ;;  %vm2783_vm11 = vcmask 1042432  }
  0x7f   : > { %7908 = vmatprep.subr.bf16.mxu0 %v8459_v2  ;;  %7922 = vmatprep.mubr.bf16.mxu0 %v8466_v5  ;;  %v8465_v9 = vld [vmem:[#allocation7] sm:$0xff]   ;;  %v8467_v11 = vld [vmem:[%s8945_s19 + $0x8] sm:$0xff]   ;;  %v8468_v12 = vld [vmem:[%s8945_s19 + $0x10] sm:$0xff]   ;;  %vm944_vm5 = vsmask.f32 256  ;;  %vm2784_vm12 = vcmask 1046532  }
  0x80   : > { %7954 = vmatprep.subr.bf16.mxu1 %v8482_v10  ;;  %v8469_v13 = vld [vmem:[%s8945_s19 + $0x18] sm:$0xff]   ;;  %v8470_v14 = vld [vmem:[%s8945_s19 + $0x20] sm:$0xff]   ;;  %v8471_v15 = vld [vmem:[%s8945_s19 + $0x28] sm:$0xff]   ;;  %vm945_vm6 = vsmask.f32 4368  ;;  %s7665_s9 = sshll.u32 %s8825_s28, 12 }
  0x81   : > { %7955 = vmatpush3.bf16.msra.mxu1 %v8482_v10  ;;  %v8472_v16 = vld [vmem:[%s8945_s19 + $0x30] sm:$0xff]   ;;  %v8473_v17 = vld [vmem:[%s8945_s19 + $0x38] sm:$0xff]   ;;  %v8474_v18 = vld [vmem:[%s8945_s19 + $0x40] sm:$0xff]   ;;  %s7197_s30 = sshll.u32 %s8956_s20, 4  ;;  %s10735_s29 = scalar_lea.hbm %s10789_s7, %s7665_s9  ;;  %s10737_s30 = int_to_ptr.vmem [resolvable:$true] %s7197_s30 }
  0x82   : > { %7909 = vmatpush3.bf16.msra.mxu0 %v8459_v2  ;;  %v8475_v19 = vld [vmem:[%s8945_s19 + $0x48] sm:$0xff]   ;;  %v8476_v20 = vld [vmem:[%s8945_s19 + $0x50] sm:$0xff]   ;;  %v8477_v21 = vld [vmem:[%s8945_s19 + $0x58] sm:$0xff]   ;;  %s7184_s21 = scalar_lea.sflag [#allocation6], %s8941_s17  ;;  %s8685_s28 = scalar_lea.vmem %s10737_s30, 4096 }
  0x83   : > { %7910 = vmatprep.subr.bf16.mxu0 %v8460_v3  ;;  %v8478_v22 = vld [vmem:[%s8945_s19 + $0x60] sm:$0xff]   ;;  %v8479_v23 = vld [vmem:[%s8945_s19 + $0x68] sm:$0xff]   ;;  %v8480_v24 = vld [vmem:[%s8945_s19 + $0x70] sm:$0xff]   ;;  %p8686_p2 = scmp.ne.s32.totalorder %s10737_s30, %s8685_s28  ;;  %p10943_p7 = scmp.ne.s32.totalorder %s10802_s11, 0 }
  0x84   : > { %v8481_v25 = vld [vmem:[%s8945_s19 + $0x78] sm:$0xff]   ;;  %v8483_v26 = vld [vmem:[#allocation9 + $0x30] sm:$0xff]   ;;  %v8484_v27 = vld [vmem:[#allocation9 + $0x28] sm:$0xff]   ;;  %s8761_s13 = smov [#allocation10]  }
  0x85   : > { %7956 = vmatprep.subr.bf16.mxu1 %v8483_v26  ;;  %v8485_v28 = vld [vmem:[#allocation9 + $0x78] sm:$0xff]   ;;  %v8486_v29 = vld [vmem:[#allocation9 + $0x20] sm:$0xff]   ;;  %v8487_v30 = vld [vmem:[#allocation9 + $0x70] sm:$0xff]   ;;  %p8687_p13 = pnand %p8686_p2, %p10943_p7  ;;  %s8689_s14 = sshll.u32 %s8761_s13, 4  ;;  %s8690_s14 = int_to_ptr.vmem [resolvable:$false] %s8689_s14 }
  0x86   : > { %7911 = vmatpush3.bf16.msra.mxu0 %v8460_v3  ;;  %7957 = vmatpush3.bf16.msra.mxu1 %v8483_v26  ;;  %v8488_v31 = vld [vmem:[#allocation9 + $0x18] sm:$0xff]   ;;  %v8489_v32 = vld [vmem:[#allocation9 + $0x68] sm:$0xff]   ;;  %v8490_v33 = vld [vmem:[#allocation9 + $0x10] sm:$0xff]   ;;  %s8691_s16 = scalar_lea.vmem %s8690_s14, 8192  ;;  %p8692_p3 = scmp.lt.s32.totalorder %s10737_s30, %s8690_s14 }
  0x87   : > { %7912 = vmatprep.subr.bf16.mxu0 %v8461_v4  ;;  %7958 = vmatprep.subr.bf16.mxu1 %v8484_v27  ;;  %v8491_v34 = vld [vmem:[#allocation9 + $0x60] sm:$0xff]   ;;  %v8492_v35 = vld [vmem:[#allocation9 + $0x8] sm:$0xff]   ;;  %v8493_v36 = vld [vmem:[#allocation9 + $0x58] sm:$0xff]   ;;  %p8688_p0 = pneg %p8687_p13  ;;  %p8693_p8 = scmp.lt.s32.totalorder %s8691_s16, %s8685_s28 }
  0x88   : > { %v8494_v37 = vld [vmem:[#allocation9] sm:$0xff]   ;;  %v8495_v38 = vld [vmem:[#allocation9 + $0x50] sm:$0xff]   ;;  %v8496_v39 = vld [vmem:[#allocation2] sm:$0xff]  }
  0x89   : > { %7970 = vmatprep.mubr.bf16.mxu1 %v8496_v39  ;;  %v8500_v40 = vld [vmem:[#allocation9 + $0x48] sm:$0xff]   ;;  %v8501_v47 = vld [vmem:[#allocation9 + $0x40] sm:$0xff]   ;;  %v1868_v52 = vld [vmem:[#allocation2 + $0x8] sm:$0x1]  ;;  %p8694_p5 = por %p8693_p8, %p8692_p3 }
  0x8a   : > { %7913 = vmatpush3.bf16.msra.mxu0 %v8461_v4  ;;  %7959 = vmatpush3.bf16.msra.mxu1 %v8484_v27  ;;  %v1866_v41 = vld [vmem:[#allocation2] sm:$0xf]  ;;  %v1867_v42 = vld [vmem:[#allocation2 + $0x4] sm:$0xf]  ;;  %v1937_v55 = vshll.u32 %v1868_v52, 16  ;;  %vm8976_vm2 = vmor %vm1914_vm0, %vm1915_vm1 }
  0x8b   : > { %7914 = vmatprep.subr.bf16.mxu0 %v8462_v6  ;;  %7960 = vmatprep.subr.bf16.mxu1 %v8486_v29  ;;  %v1918_v43 = vshrl.u32 %v1866_v41, 16  ;;  %v1921_v44 = vshll.u32 %v1866_v41, 16  ;;  %v1927_v45 = vshll.u32 %v1867_v42, 16  ;;  %v1931_v46 = vshrl.u32 %v1867_v42, 16  ;;  %v8984_v63 = vld [vmem:[#allocation9 + $0xb8] sm:$0xff]   ;;  %vm9011_vm8 = vmand %vm1268_vm3, %vm1269_vm4  ;;  %p8695_p12 = pnand %p8694_p5, %p8688_p0 }
  0x8c   : > { %v1939_v58 = vrot.slane %v1937_v55, 5  ;;  %v8990_v0 = vld [vmem:[%s10784_s2] ss:$0 sm:$0xff]  ;;  %v1271_v39 = vld [vmem:[#allocation2 + $0xc] sm:$0xf]  ;;  %vm9022_vm9 = vmor %vm944_vm5, %vm945_vm6 }
  0x8d   : > { %v1920_v48 = vrot.slane %v1918_v43, 4  ;;  %v1923_v49 = vrot.slane %v1921_v44, 5  ;;  %v1929_v50 = vrot.slane %v1927_v45, 5  ;;  %v1933_v51 = vrot.slane %v1931_v46, 4  ;;  %v8995_v2 = vld [vmem:[%s10785_s3] ss:$0 sm:$0xff]  ;;  %vm9028_vm10 = vmand %vm1275_vm7, %vm944_vm5 }
  0x8e   : > { %7915 = vmatpush3.bf16.msra.mxu0 %v8462_v6  ;;  %7961 = vmatpush3.bf16.msra.mxu1 %v8486_v29  ;;  %v1280_v29 = vld [vmem:[#allocation2 + $0x18] sm:$0xf]  ;;  %vm9301_vm13 = vmor %vm2783_vm11, %vm2784_vm12 }
  0x8f   : > { %7916 = vmatprep.subr.bf16.mxu0 %v8463_v7  ;;  %7962 = vmatprep.subr.bf16.mxu1 %v8488_v31  ;;  %v1924_v53 = vor.u32 %v1923_v49, %v1920_v48  ;;  %v1934_v54 = vor.u32 %v1933_v51, %v1929_v50  ;;  %v1284_v51 = vld [vmem:[#allocation2 + $0x20] sm:$0x1] }
  0x91   : > { %v1925_v56 = vrot.slane %v1924_v53, 4  ;;  %v1935_v57 = vrot.slane %v1934_v54, 4 }
  0x92   : > { %7917 = vmatpush3.bf16.msra.mxu0 %v8463_v7  ;;  %7963 = vmatpush3.bf16.msra.mxu1 %v8488_v31 }
  0x93   : > { %7918 = vmatprep.subr.bf16.mxu0 %v8464_v8  ;;  %7964 = vmatprep.subr.bf16.mxu1 %v8490_v33  ;;  %v1930_v60 = vsel %vm8976_vm2, %v1925_v56, %v1929_v50  ;;  %v1940_v61 = vsel %vm8976_vm2, %v1935_v57, %v1939_v58 }
  0x94   : > { %v7385_v62 = vcombine.low %v1930_v60, %v1940_v61 }
  0x96   : > { %7919 = vmatpush3.bf16.msra.mxu0 %v8464_v8  ;;  %7965 = vmatpush3.bf16.msra.mxu1 %v8490_v33 }
  0x97   : > { %7920 = vmatprep.subr.bf16.mxu0 %v8465_v9  ;;  %7966 = vmatprep.subr.bf16.mxu1 %v8492_v35 }
  0x9a   : > { %7921 = vmatpush3.bf16.msra.mxu0 %v8465_v9  ;;  %7967 = vmatpush3.bf16.msra.mxu1 %v8492_v35 }
  0x9b   : > { %8002 = vmatprep.subr.bf16.mxu0 %v8485_v28  ;;  %7968 = vmatprep.subr.bf16.mxu1 %v8494_v37 }
  0x9d   : > { %7923 = vmatmul.mubr.bf16.vlgmr.msra.gmra.mxu0 %v8467_v11 }
  0x9e   : > { %7926 = vmatprep.mubr.bf16.mxu0 %v8468_v12  ;;  %8003 = vmatpush3.bf16.msra.mxu0 %v8485_v28 }
  0x9f   : > { %8004 = vmatprep.subr.bf16.mxu0 %v8487_v30  ;;  %7969 = vmatpush3.bf16.msra.mxu1 %v8494_v37 }
  0xa0   : > { %8050 = vmatprep.subr.bf16.mxu1 %v8984_v63 }
  0xa2   : > { %8005 = vmatpush3.bf16.msra.mxu0 %v8487_v30 }
  0xa3   : > { %8006 = vmatprep.subr.bf16.mxu0 %v8489_v32 }
  0xa5   : > { %7927 = vmatmul.mubr.bf16.gmra.mxu0 %v8469_v13 }
  0xa6   : > { %7930 = vmatprep.mubr.bf16.mxu0 %v8470_v14  ;;  %8007 = vmatpush3.bf16.msra.mxu0 %v8489_v32 }
  0xa7   : > { %8008 = vmatprep.subr.bf16.mxu0 %v8491_v34 }
  0xaa   : > { %8009 = vmatpush3.bf16.msra.mxu0 %v8491_v34 }
  0xab   : > { %8010 = vmatprep.subr.bf16.mxu0 %v8493_v36 }
  0xad   : > { %7931 = vmatmul.mubr.bf16.gmra.mxu0 %v8471_v15 }
  0xae   : > { %7934 = vmatprep.mubr.bf16.mxu0 %v8472_v16  ;;  %8011 = vmatpush3.bf16.msra.mxu0 %v8493_v36 }
  0xaf   : > { %8012 = vmatprep.subr.bf16.mxu0 %v8495_v38 }
  0xb2   : > { %8013 = vmatpush3.bf16.msra.mxu0 %v8495_v38 }
  0xb3   : > { %8014 = vmatprep.subr.bf16.mxu0 %v8500_v40 }
  0xb5   : > { %7935 = vmatmul.mubr.bf16.gmra.mxu0 %v8473_v17  ;;  %v9004_v17 = vld [vmem:[#allocation9 + $0xf8] sm:$0xff]  }
  0xb6   : > { %7938 = vmatprep.mubr.bf16.mxu0 %v8474_v18  ;;  %8015 = vmatpush3.bf16.msra.mxu0 %v8500_v40 }
  0xb7   : > { %8016 = vmatprep.subr.bf16.mxu0 %v8501_v47 }
  0xba   : > { %8017 = vmatpush3.bf16.msra.mxu0 %v8501_v47 }
  0xbb   : > { %8098 = vmatprep.subr.bf16.mxu0 %v9004_v17 }
  0xbd   : > { %7939 = vmatmul.mubr.bf16.gmra.mxu0 %v8475_v19 }
  0xbe   : > { %7942 = vmatprep.mubr.bf16.mxu0 %v8476_v20 }
  0xc5   : > { %7943 = vmatmul.mubr.bf16.gmra.mxu0 %v8477_v21 }
  0xc6   : > { %7946 = vmatprep.mubr.bf16.mxu0 %v8478_v22 }
  0xcd   : > { %7947 = vmatmul.mubr.bf16.gmra.mxu0 %v8479_v23 }
  0xce   : > { %7950 = vmatprep.mubr.bf16.mxu0 %v8480_v24 }
  0xd5   : > { %7951 = vmatmul.mubr.bf16.gmra.mxu0 %v8481_v25 }
  0xd6   : > { %8018 = vmatprep.mubr.bf16.mxu0 %v7385_v62 }
 0x15d   : > { %v7924_v1 = vpop.f32.mrf.mxu0 }
 0x15e   : > { %v747_v3 = vmul.f32 %v7924_v1, %v8990_v0 }
 0x15f   : > { %v611_v4 = vpop.f32.mrf.mxu0 }
 0x160   : > { %v786_v5 = vadd.f32 %v8995_v2, %v747_v3  ;;  %v745_v6 = vmul.f32 %v8990_v0, %v611_v4 }
 0x161   : > { %v7925_v7 = vpop.f32.mrf.mxu0 }
 0x162   : > { %v818_v8 = vmax.f32 %v786_v5, 0.0  ;;  %v784_v9 = vadd.f32 %v8995_v2, %v745_v6  ;;  %v748_v10 = vmul.f32 %v7925_v7, %v8990_v0 }
 0x163   : > { %v614_v11 = vpop.f32.mrf.mxu0 }
 0x164   : > { %v7635_v12 = vpack.c.bf16 %v818_v8, %v818_v8  ;;  %v816_v13 = vmax.f32 %v784_v9, 0.0  ;;  %v787_v14 = vadd.f32 %v8995_v2, %v748_v10  ;;  %v746_v15 = vmul.f32 %v8990_v0, %v614_v11  ;;  %v1277_v8 = vld [vmem:[#allocation2 + $0x14] sm:$0x1] }
 0x165   : > { %v7928_v16 = vpop.f32.mrf.mxu0 }
 0x166   : > { %v965_v18 = vshrl.u32 %v7635_v12, 16  ;;  %v7633_v19 = vpack.c.bf16 %v816_v13, %v816_v13  ;;  %v819_v20 = vmax.f32 %v787_v14, 0.0  ;;  %v785_v21 = vadd.f32 %v8995_v2, %v746_v15 }
 0x167   : > { %v751_v22 = vmul.f32 %v7928_v16, %v8990_v0  ;;  %v627_v23 = vpop.f32.mrf.mxu0  ;;  %v968_v25 = vshll.u32 %v7635_v12, 16  ;;  %v1294_v16 = vld [vmem:[#allocation2 + $0x30] sm:$0xf] }
 0x168   : > { %v967_v24 = vrot.slane %v965_v18, 7  ;;  %v948_v26 = vshrl.u32 %v7633_v19, 16  ;;  %v7636_v27 = vpack.c.bf16 %v819_v20, %v819_v20  ;;  %v951_v30 = vshll.u32 %v7633_v19, 16 }
 0x169   : > { %v817_v31 = vmax.f32 %v785_v21, 0.0  ;;  %v790_v32 = vadd.f32 %v8995_v2, %v751_v22  ;;  %v749_v33 = vmul.f32 %v8990_v0, %v627_v23  ;;  %v7929_v34 = vpop.f32.mrf.mxu0 }
 0x16a   : > { %v970_v35 = vor.u32 %v968_v25, %v967_v24  ;;  %v971_v36 = vrot.slane %v967_v24, 4  ;;  %v950_v37 = vrot.slane %v948_v26, 7  ;;  %v973_v38 = vshrl.u32 %v7636_v27, 16 }
 0x16b   : > { %v976_v40 = vshll.u32 %v7636_v27, 16  ;;  %v7634_v41 = vpack.c.bf16 %v817_v31, %v817_v31  ;;  %v822_v42 = vmax.f32 %v790_v32, 0.0  ;;  %v788_v43 = vadd.f32 %v8995_v2, %v749_v33  ;;  %v630_v44 = vpop.f32.mrf.mxu0  ;;  %v1287_v33 = vld [vmem:[#allocation2 + $0x24] sm:$0xf] }
 0x16c   : > { %v1281_v45 = vsel %vm9011_vm8, %v970_v35, %v1280_v29  ;;  %v953_v46 = vor.u32 %v951_v30, %v950_v37  ;;  %v954_v47 = vrot.slane %v950_v37, 4  ;;  %v975_v49 = vrot.slane %v973_v38, 7 }
 0x16d   : > { %1282 = vst [vmem:[#allocation2 + $0x18] sm:$0xf] %v1281_v45  ;;  %v956_v52 = vshrl.u32 %v7634_v41, 16  ;;  %v959_v53 = vshll.u32 %v7634_v41, 16  ;;  %v7639_v54 = vpack.c.bf16 %v822_v42, %v822_v42  ;;  %v820_v55 = vmax.f32 %v788_v43, 0.0  ;;  %v7932_v56 = vpop.f32.mrf.mxu0 }
 0x16e   : > { %v1272_v57 = vsel %vm9011_vm8, %v953_v46, %v1271_v39  ;;  %v978_v58 = vor.u32 %v976_v40, %v975_v49  ;;  %v980_v60 = vrot.slane %v975_v49, 4  ;;  %v752_v61 = vmul.f32 %v7929_v34, %v8990_v0 }
 0x16f   : > { %1273 = vst [vmem:[#allocation2 + $0xc] sm:$0xf] %v1272_v57  ;;  %v958_v62 = vrot.slane %v956_v52, 7  ;;  %v999_v1 = vshrl.u32 %v7639_v54, 16  ;;  %v1002_v3 = vshll.u32 %v7639_v54, 16  ;;  %v7637_v4 = vpack.c.bf16 %v820_v55, %v820_v55  ;;  %v643_v5 = vpop.f32.mrf.mxu0 }
 0x170   : > { %v979_v6 = vsel %vm9022_vm9, %v971_v36, %v978_v58  ;;  %v1285_v7 = vsel %vm9028_vm10, %v980_v60, %v1284_v51  ;;  %v791_v9 = vadd.f32 %v8995_v2, %v752_v61  ;;  %v750_v10 = vmul.f32 %v8990_v0, %v630_v44 }
 0x171   : > { %1283 = vst [vmem:[#allocation2 + $0x1c] sm:$0xf] %v979_v6  ;;  %1286 = vst [vmem:[#allocation2 + $0x20] sm:$0x1] %v1285_v7  ;;  %v961_v11 = vor.u32 %v959_v53, %v958_v62  ;;  %v963_v12 = vrot.slane %v958_v62, 4  ;;  %v1001_v13 = vrot.slane %v999_v1, 7  ;;  %v7933_v15 = vpop.f32.mrf.mxu0  ;;  %v755_v21 = vmul.f32 %v7932_v56, %v8990_v0 }
 0x172   : > { %v982_v14 = vshrl.u32 %v7637_v4, 16  ;;  %v985_v18 = vshll.u32 %v7637_v4, 16  ;;  %v823_v19 = vmax.f32 %v791_v9, 0.0  ;;  %v789_v20 = vadd.f32 %v8995_v2, %v750_v10  ;;  %v1298_v53 = vld [vmem:[#allocation2 + $0x38] sm:$0x1] }
 0x173   : > { %v962_v22 = vsel %vm9022_vm9, %v954_v47, %v961_v11  ;;  %v1278_v23 = vsel %vm9028_vm10, %v963_v12, %v1277_v8  ;;  %v1004_v24 = vor.u32 %v1002_v3, %v1001_v13  ;;  %v1005_v25 = vrot.slane %v1001_v13, 4  ;;  %v646_v26 = vpop.f32.mrf.mxu0  ;;  %v8502_v3 = vld [vmem:[#allocation9 + $0xb0] sm:$0xff]  }
 0x174   : > { %1274 = vst [vmem:[#allocation2 + $0x10] sm:$0xf] %v962_v22  ;;  %1279 = vst [vmem:[#allocation2 + $0x14] sm:$0x1] %v1278_v23  ;;  %v9047_v27 = vrot.slane %v982_v14, 7  ;;  %v7640_v29 = vpack.c.bf16 %v823_v19, %v823_v19  ;;  %v821_v30 = vmax.f32 %v789_v20, 0.0  ;;  %v794_v31 = vadd.f32 %v8995_v2, %v755_v21 }
 0x175   : > { %v1295_v32 = vsel %vm9011_vm8, %v1004_v24, %v1294_v16  ;;  %v753_v34 = vmul.f32 %v8990_v0, %v643_v5  ;;  %v756_v35 = vmul.f32 %v7933_v15, %v8990_v0  ;;  %v754_v36 = vmul.f32 %v8990_v0, %v646_v26  ;;  %v7936_v37 = vpop.f32.mrf.mxu0  ;;  %v1291_v12 = vld [vmem:[#allocation2 + $0x2c] sm:$0x1]  ;;  %v1308_v22 = vld [vmem:[#allocation2 + $0x48] sm:$0xf] }
 0x176   : > { %1296 = vst [vmem:[#allocation2 + $0x30] sm:$0xf] %v1295_v32  ;;  %v987_v38 = vor.u32 %v985_v18, %v9047_v27  ;;  %v988_v39 = vrot.slane %v9047_v27, 4  ;;  %v1007_v40 = vshrl.u32 %v7640_v29, 16  ;;  %v1010_v41 = vshll.u32 %v7640_v29, 16  ;;  %v8505_v32 = vld [vmem:[#allocation9 + $0xa8] sm:$0xff]  }
 0x177   : > { %v7638_v42 = vpack.c.bf16 %v821_v30, %v821_v30  ;;  %v826_v43 = vmax.f32 %v794_v31, 0.0  ;;  %v792_v44 = vadd.f32 %v8995_v2, %v753_v34  ;;  %v795_v45 = vadd.f32 %v8995_v2, %v756_v35  ;;  %v659_v46 = vpop.f32.mrf.mxu0 }
 0x178   : > { %v1288_v47 = vsel %vm9011_vm8, %v987_v38, %v1287_v33  ;;  %v1009_v49 = vrot.slane %v1007_v40, 7  ;;  %v793_v51 = vadd.f32 %v8995_v2, %v754_v36  ;;  %v759_v52 = vmul.f32 %v7936_v37, %v8990_v0  ;;  %v8499_v15 = vld [vmem:[#allocation2 + $0x18] sm:$0xff]   ;;  %v1312_v40 = vld [vmem:[#allocation2 + $0x50] sm:$0x1] }
 0x179   : > { %1289 = vst [vmem:[#allocation2 + $0x24] sm:$0xf] %v1288_v47  ;;  %v990_v54 = vshrl.u32 %v7638_v42, 16  ;;  %v993_v55 = vshll.u32 %v7638_v42, 16  ;;  %v7643_v56 = vpack.c.bf16 %v826_v43, %v826_v43  ;;  %v824_v57 = vmax.f32 %v792_v44, 0.0  ;;  %v7937_v58 = vpop.f32.mrf.mxu0 }
 0x17a   : > { %v1012_v60 = vor.u32 %v1010_v41, %v1009_v49  ;;  %v1014_v61 = vrot.slane %v1009_v49, 4  ;;  %v827_v62 = vmax.f32 %v795_v45, 0.0  ;;  %v825_v1 = vmax.f32 %v793_v51, 0.0  ;;  %v1301_v38 = vld [vmem:[#allocation2 + $0x3c] sm:$0xf] }
 0x17b   : > { %v992_v4 = vrot.slane %v990_v54, 7  ;;  %v1033_v5 = vshrl.u32 %v7643_v56, 16  ;;  %v1036_v6 = vshll.u32 %v7643_v56, 16  ;;  %v7641_v7 = vpack.c.bf16 %v824_v57, %v824_v57  ;;  %v9063_v8 = vpop.f32.mrf.mxu0  ;;  %v8498_v9 = vld [vmem:[#allocation2 + $0xc] sm:$0xff]   ;;  %v1305_v49 = vld [vmem:[#allocation2 + $0x44] sm:$0x1] }
 0x17c   : > { %v1013_v10 = vsel %vm9022_vm9, %v1005_v25, %v1012_v60  ;;  %v1299_v11 = vsel %vm9028_vm10, %v1014_v61, %v1298_v53  ;;  %v7644_v13 = vpack.c.bf16 %v827_v62, %v827_v62  ;;  %v7642_v14 = vpack.c.bf16 %v825_v1, %v825_v1  ;;  %7971 = vmatmul.mubr.bf16.vlgmr.msra.gmra.mxu1 %v8498_v9  ;;  %v8508_v56 = vld [vmem:[#allocation9 + $0xa0] sm:$0xff]  }
 0x17d   : > { %1297 = vst [vmem:[#allocation2 + $0x34] sm:$0xf] %v1013_v10  ;;  %1300 = vst [vmem:[#allocation2 + $0x38] sm:$0x1] %v1299_v11  ;;  %v995_v16 = vor.u32 %v993_v55, %v992_v4  ;;  %v997_v18 = vrot.slane %v992_v4, 4  ;;  %v1035_v19 = vrot.slane %v1033_v5, 7  ;;  %v7940_v21 = vpop.f32.mrf.mxu0  ;;  %8051 = vmatpush3.bf16.msra.mxu1 %v8984_v63  ;;  %7974 = vmatprep.mubr.bf16.mxu1 %v8499_v15 }
 0x17e   : > { %v1016_v20 = vshrl.u32 %v7641_v7, 16  ;;  %v1019_v23 = vshll.u32 %v7641_v7, 16  ;;  %v1041_v24 = vshrl.u32 %v7644_v13, 16  ;;  %v1044_v26 = vshll.u32 %v7644_v13, 16  ;;  %8052 = vmatprep.subr.bf16.mxu1 %v8502_v3 }
 0x17f   : > { %v1024_v25 = vshrl.u32 %v7642_v14, 16  ;;  %v996_v27 = vsel %vm9022_vm9, %v988_v39, %v995_v16  ;;  %v1292_v29 = vsel %vm9028_vm10, %v997_v18, %v1291_v12  ;;  %v1038_v30 = vor.u32 %v1036_v6, %v1035_v19  ;;  %v675_v37 = vpop.f32.mrf.mxu0 }
 0x180   : > { %v1039_v31 = vrot.slane %v1035_v19, 4  ;;  %1290 = vst [vmem:[#allocation2 + $0x28] sm:$0xf] %v996_v27  ;;  %1293 = vst [vmem:[#allocation2 + $0x2c] sm:$0x1] %v1292_v29  ;;  %v1018_v33 = vrot.slane %v1016_v20, 7  ;;  %v798_v39 = vadd.f32 %v8995_v2, %v759_v52  ;;  %v757_v41 = vmul.f32 %v8990_v0, %v659_v46 }
 0x181   : > { %v1043_v34 = vrot.slane %v1041_v24, 7  ;;  %v1026_v35 = vrot.slane %v1024_v25, 7  ;;  %v1027_v36 = vshll.u32 %v7642_v14, 16  ;;  %v1309_v63 = vsel %vm9011_vm8, %v1038_v30, %v1308_v22  ;;  %8053 = vmatpush3.bf16.msra.mxu1 %v8502_v3  ;;  %v7941_v60 = vpop.f32.mrf.mxu0  ;;  %v8511_v14 = vld [vmem:[#allocation9 + $0x98] sm:$0xff]   ;;  %v1322_v24 = vld [vmem:[#allocation2 + $0x60] sm:$0xf] }
 0x182   : > { %v760_v42 = vmul.f32 %v7937_v58, %v8990_v0  ;;  %1310 = vst [vmem:[#allocation2 + $0x48] sm:$0xf] %v1309_v63  ;;  %v1021_v43 = vor.u32 %v1019_v23, %v1018_v33  ;;  %v1022_v44 = vrot.slane %v1018_v33, 4  ;;  %v830_v54 = vmax.f32 %v798_v39, 0.0  ;;  %8054 = vmatprep.subr.bf16.mxu1 %v8505_v32  ;;  %v1315_v33 = vld [vmem:[#allocation2 + $0x54] sm:$0xf] }
 0x183   : > { %v1046_v45 = vor.u32 %v1044_v26, %v1043_v34  ;;  %v1048_v47 = vrot.slane %v1043_v34, 4  ;;  %v1029_v51 = vor.u32 %v1027_v36, %v1026_v35  ;;  %v1031_v53 = vrot.slane %v1026_v35, 4  ;;  %v678_v35 = vpop.f32.mrf.mxu0  ;;  %v8514_v36 = vld [vmem:[#allocation9 + $0x90] sm:$0xff]  }
 0x184   : > { %v796_v55 = vadd.f32 %v8995_v2, %v757_v41  ;;  %v1302_v52 = vsel %vm9011_vm8, %v1021_v43, %v1301_v38  ;;  %v799_v58 = vadd.f32 %v8995_v2, %v760_v42  ;;  %v7647_v1 = vpack.c.bf16 %v830_v54, %v830_v54  ;;  %v8504_v19 = vld [vmem:[#allocation2 + $0x30] sm:$0xff]   ;;  %v1326_v43 = vld [vmem:[#allocation2 + $0x68] sm:$0x1] }
 0x185   : > { %v1047_v46 = vsel %vm9022_vm9, %v1039_v31, %v1046_v45  ;;  %v1313_v57 = vsel %vm9028_vm10, %v1048_v47, %v1312_v40  ;;  %1303 = vst [vmem:[#allocation2 + $0x3c] sm:$0xf] %v1302_v52  ;;  %v1030_v61 = vsel %vm9022_vm9, %v1022_v44, %v1029_v51  ;;  %v1306_v62 = vsel %vm9028_vm10, %v1031_v53, %v1305_v49 }
 0x186   : > { %1311 = vst [vmem:[#allocation2 + $0x4c] sm:$0xf] %v1047_v46  ;;  %1314 = vst [vmem:[#allocation2 + $0x50] sm:$0x1] %v1313_v57  ;;  %v828_v3 = vmax.f32 %v796_v55, 0.0  ;;  %v831_v4 = vmax.f32 %v799_v58, 0.0  ;;  %v758_v5 = vmul.f32 %v8990_v0, %v9063_v8  ;;  %v763_v6 = vmul.f32 %v7940_v21, %v8990_v0  ;;  %8055 = vmatpush3.bf16.msra.mxu1 %v8505_v32  ;;  %v7944_v57 = vpop.f32.mrf.mxu0 }
 0x187   : > { %1304 = vst [vmem:[#allocation2 + $0x40] sm:$0xf] %v1030_v61  ;;  %1307 = vst [vmem:[#allocation2 + $0x44] sm:$0x1] %v1306_v62  ;;  %v761_v7 = vmul.f32 %v8990_v0, %v675_v37  ;;  %v1067_v9 = vshrl.u32 %v7647_v1, 16  ;;  %v1070_v10 = vshll.u32 %v7647_v1, 16  ;;  %v764_v12 = vmul.f32 %v7941_v60, %v8990_v0  ;;  %8056 = vmatprep.subr.bf16.mxu1 %v8508_v56 }
 0x188   : > { %v7645_v11 = vpack.c.bf16 %v828_v3, %v828_v3  ;;  %v8503_v13 = vld [vmem:[#allocation2 + $0x24] sm:$0xff]   ;;  %v7648_v15 = vpack.c.bf16 %v831_v4, %v831_v4  ;;  %v797_v16 = vadd.f32 %v8995_v2, %v758_v5  ;;  %v802_v18 = vadd.f32 %v8995_v2, %v763_v6  ;;  %v1319_v55 = vld [vmem:[#allocation2 + $0x5c] sm:$0x1]  ;;  %v1869_v58 = vld [vmem:[#allocation2 + $0xc] sm:$0xf] }
 0x189   : > { %v800_v8 = vadd.f32 %v8995_v2, %v761_v7  ;;  %v1069_v20 = vrot.slane %v1067_v9, 7  ;;  %v803_v23 = vadd.f32 %v8995_v2, %v764_v12  ;;  %7975 = vmatmul.mubr.bf16.gmra.mxu1 %v8503_v13  ;;  %v8519_v60 = vld [vmem:[#allocation9 + $0x88] sm:$0xff]   ;;  %v1336_v3 = vld [vmem:[#allocation2 + $0x78] sm:$0xf]  ;;  %v1329_v9 = vld [vmem:[#allocation2 + $0x6c] sm:$0xf] }
 0x18a   : > { %v1050_v21 = vshrl.u32 %v7645_v11, 16  ;;  %v1053_v22 = vshll.u32 %v7645_v11, 16  ;;  %v1075_v26 = vshrl.u32 %v7648_v15, 16  ;;  %v1078_v25 = vshll.u32 %v7648_v15, 16  ;;  %7978 = vmatprep.mubr.bf16.mxu1 %v8504_v19  ;;  %8057 = vmatpush3.bf16.msra.mxu1 %v8508_v56  ;;  %v8524_v12 = vld [vmem:[#allocation9 + $0x80] sm:$0xff]  }
 0x18b   : > { %v829_v27 = vmax.f32 %v797_v16, 0.0  ;;  %v834_v29 = vmax.f32 %v802_v18, 0.0  ;;  %v1072_v30 = vor.u32 %v1070_v10, %v1069_v20  ;;  %v1073_v31 = vrot.slane %v1069_v20, 4  ;;  %8058 = vmatprep.subr.bf16.mxu1 %v8511_v14  ;;  %v1870_v16 = vld [vmem:[#allocation2 + $0x10] sm:$0xf] }
 0x18c   : > { %v1052_v32 = vrot.slane %v1050_v21, 7  ;;  %v832_v34 = vmax.f32 %v800_v8, 0.0  ;;  %v1077_v37 = vrot.slane %v1075_v26, 7  ;;  %v835_v40 = vmax.f32 %v803_v23, 0.0 }
 0x18d   : > { %v7646_v63 = vpack.c.bf16 %v829_v27, %v829_v27  ;;  %v7651_v38 = vpack.c.bf16 %v834_v29, %v834_v29  ;;  %v1323_v39 = vsel %vm9011_vm8, %v1072_v30, %v1322_v24  ;;  %v8507_v5 = vld [vmem:[#allocation2 + $0x48] sm:$0xff]   ;;  %v762_v11 = vmul.f32 %v8990_v0, %v678_v35  ;;  %v691_v27 = vpop.f32.mrf.mxu0 }
 0x18e   : > { %v1055_v41 = vor.u32 %v1053_v22, %v1052_v32  ;;  %v1056_v42 = vrot.slane %v1052_v32, 4  ;;  %v7649_v44 = vpack.c.bf16 %v832_v34, %v832_v34  ;;  %v8506_v45 = vld [vmem:[#allocation2 + $0x3c] sm:$0xff]   ;;  %1324 = vst [vmem:[#allocation2 + $0x60] sm:$0xf] %v1323_v39  ;;  %v1080_v47 = vor.u32 %v1078_v25, %v1077_v37  ;;  %8059 = vmatpush3.bf16.msra.mxu1 %v8511_v14  ;;  %v1871_v25 = vld [vmem:[#allocation2 + $0x14] sm:$0x1] }
 0x18f   : > { %v1082_v49 = vrot.slane %v1077_v37, 4  ;;  %v1058_v51 = vshrl.u32 %v7646_v63, 16  ;;  %v1061_v53 = vshll.u32 %v7646_v63, 16  ;;  %v1101_v56 = vshrl.u32 %v7651_v38, 16  ;;  %8060 = vmatprep.subr.bf16.mxu1 %v8514_v36  ;;  %v8528_v63 = vld [vmem:[#allocation9 + $0x138] sm:$0xff]  }
 0x190   : > { %v1316_v54 = vsel %vm9011_vm8, %v1055_v41, %v1315_v33  ;;  %v1104_v52 = vshll.u32 %v7651_v38, 16  ;;  %v1084_v46 = vshrl.u32 %v7649_v44, 16  ;;  %v1081_v61 = vsel %vm9022_vm9, %v1073_v31, %v1080_v47  ;;  %v1340_v31 = vld [vmem:[#allocation2 + $0x80] sm:$0x1]  ;;  %v9124_v47 = vpop.f32.mrf.mxu0 }
 0x191   : > { %1317 = vst [vmem:[#allocation2 + $0x54] sm:$0xf] %v1316_v54  ;;  %v1327_v62 = vsel %vm9028_vm10, %v1082_v49, %v1326_v43  ;;  %v1060_v1 = vrot.slane %v1058_v51, 7  ;;  %v1087_v4 = vshll.u32 %v7649_v44, 16  ;;  %1325 = vst [vmem:[#allocation2 + $0x64] sm:$0xf] %v1081_v61  ;;  %v7652_v10 = vpack.c.bf16 %v835_v40, %v835_v40  ;;  %7979 = vmatmul.mubr.bf16.gmra.mxu1 %v8506_v45 }
 0x192   : > { %1328 = vst [vmem:[#allocation2 + $0x68] sm:$0x1] %v1327_v62  ;;  %v1103_v6 = vrot.slane %v1101_v56, 7  ;;  %v9108_v7 = vrot.slane %v1084_v46, 7  ;;  %v767_v15 = vmul.f32 %v7944_v57, %v8990_v0  ;;  %v1942_v18 = vshrl.u32 %v1869_v58, 16  ;;  %7982 = vmatprep.mubr.bf16.mxu1 %v8507_v5  ;;  %8061 = vmatpush3.bf16.msra.mxu1 %v8514_v36 }
 0x193   : > { %v1063_v13 = vor.u32 %v1061_v53, %v1060_v1  ;;  %v1065_v14 = vrot.slane %v1060_v1, 4  ;;  %8062 = vmatprep.subr.bf16.mxu1 %v8519_v60  ;;  %v1109_v24 = vshrl.u32 %v7652_v10, 16  ;;  %v1112_v26 = vshll.u32 %v7652_v10, 16 }
 0x194   : > { %v1106_v8 = vor.u32 %v1104_v52, %v1103_v6  ;;  %v1107_v19 = vrot.slane %v1103_v6, 4  ;;  %v1089_v20 = vor.u32 %v1087_v4, %v9108_v7  ;;  %v1090_v21 = vrot.slane %v9108_v7, 4  ;;  %v1350_v4 = vld [vmem:[#allocation2 + $0x90] sm:$0xf] }
 0x195   : > { %v1064_v22 = vsel %vm9022_vm9, %v1056_v42, %v1063_v13  ;;  %v1320_v23 = vsel %vm9028_vm10, %v1065_v14, %v1319_v55  ;;  %v801_v32 = vadd.f32 %v8995_v2, %v762_v11  ;;  %v806_v33 = vadd.f32 %v8995_v2, %v767_v15  ;;  %v1872_v55 = vld [vmem:[#allocation2 + $0x18] sm:$0xf]  ;;  %v694_v11 = vpop.f32.mrf.mxu0 }
 0x196   : > { %1318 = vst [vmem:[#allocation2 + $0x58] sm:$0xf] %v1064_v22  ;;  %1321 = vst [vmem:[#allocation2 + $0x5c] sm:$0x1] %v1320_v23  ;;  %v1337_v29 = vsel %vm9011_vm8, %v1106_v8, %v1336_v3  ;;  %v1330_v30 = vsel %vm9011_vm8, %v1089_v20, %v1329_v9  ;;  %v1111_v34 = vrot.slane %v1109_v24, 7  ;;  %v1944_v35 = vrot.slane %v1942_v18, 4  ;;  %8063 = vmatpush3.bf16.msra.mxu1 %v8519_v60 }
 0x197   : > { %1338 = vst [vmem:[#allocation2 + $0x78] sm:$0xf] %v1337_v29  ;;  %1331 = vst [vmem:[#allocation2 + $0x6c] sm:$0xf] %v1330_v30  ;;  %v1945_v36 = vshll.u32 %v1869_v58, 16  ;;  %v1951_v37 = vshll.u32 %v1870_v16, 16  ;;  %8064 = vmatprep.subr.bf16.mxu1 %v8524_v12  ;;  %v765_v57 = vmul.f32 %v8990_v0, %v691_v27  ;;  %v768_v7 = vmul.f32 %v9124_v47, %v8990_v0 }
 0x198   : > { %v833_v38 = vmax.f32 %v801_v32, 0.0  ;;  %v838_v40 = vmax.f32 %v806_v33, 0.0  ;;  %v1955_v39 = vshrl.u32 %v1870_v16, 16  ;;  %v1961_v41 = vshll.u32 %v1871_v25, 16  ;;  %v1873_v58 = vld [vmem:[#allocation2 + $0x1c] sm:$0xf] }
 0x199   : > { %v1114_v42 = vor.u32 %v1112_v26, %v1111_v34  ;;  %v1116_v43 = vrot.slane %v1111_v34, 4  ;;  %v1947_v44 = vrot.slane %v1945_v36, 5  ;;  %v1953_v45 = vrot.slane %v1951_v37, 5  ;;  %v1333_v3 = vld [vmem:[#allocation2 + $0x74] sm:$0x1]  ;;  %v8510_v14 = vld [vmem:[#allocation2 + $0x60] sm:$0xff]   ;;  %v7948_v34 = vpop.f32.mrf.mxu0 }
 0x19a   : > { %v7650_v49 = vpack.c.bf16 %v833_v38, %v833_v38  ;;  %v7655_v51 = vpack.c.bf16 %v838_v40, %v838_v40  ;;  %v1957_v53 = vrot.slane %v1955_v39, 4  ;;  %v1963_v54 = vrot.slane %v1961_v41, 5  ;;  %8065 = vmatpush3.bf16.msra.mxu1 %v8524_v12  ;;  %v8518_v27 = vld [vmem:[#allocation9 + $0xf0] sm:$0xff]  }
 0x19b   : > { %v1115_v56 = vsel %vm9022_vm9, %v1107_v19, %v1114_v42  ;;  %v1341_v52 = vsel %vm9028_vm10, %v1116_v43, %v1340_v31  ;;  %v1948_v46 = vor.u32 %v1947_v44, %v1944_v35  ;;  %8146 = vmatprep.subr.bf16.mxu1 %v8528_v63  ;;  %v804_v9 = vadd.f32 %v8995_v2, %v765_v57  ;;  %v1874_v31 = vld [vmem:[#allocation2 + $0x20] sm:$0x1]  ;;  %v1875_v35 = vld [vmem:[#allocation2 + $0x24] sm:$0xf]  ;;  %v1876_v47 = vld [vmem:[#allocation2 + $0x28] sm:$0xf] }
 0x19c   : > { %1339 = vst [vmem:[#allocation2 + $0x7c] sm:$0xf] %v1115_v56  ;;  %1342 = vst [vmem:[#allocation2 + $0x80] sm:$0x1] %v1341_v52  ;;  %v1092_v60 = vshrl.u32 %v7650_v49, 16  ;;  %v1095_v61 = vshll.u32 %v7650_v49, 16  ;;  %v1958_v6 = vor.u32 %v1957_v53, %v1953_v45  ;;  %v771_v44 = vmul.f32 %v7948_v34, %v8990_v0 }
 0x19d   : > { %v1135_v62 = vshrl.u32 %v7655_v51, 16  ;;  %v1138_v1 = vshll.u32 %v7655_v51, 16  ;;  %v1949_v5 = vrot.slane %v1948_v46, 4  ;;  %v1966_v10 = vshrl.u32 %v1872_v55, 16  ;;  %v8509_v13 = vld [vmem:[#allocation2 + $0x54] sm:$0xff]   ;;  %v8522_v57 = vld [vmem:[#allocation9 + $0xe8] sm:$0xff]  }
 0x19e   : > { %v1094_v15 = vrot.slane %v1092_v60, 7  ;;  %v1969_v12 = vshll.u32 %v1872_v55, 16  ;;  %v1975_v18 = vshll.u32 %v1873_v58, 16  ;;  %v1959_v19 = vrot.slane %v1958_v6, 4  ;;  %7983 = vmatmul.mubr.bf16.gmra.mxu1 %v8509_v13  ;;  %v8523_v13 = vld [vmem:[#allocation9 + $0xe0] sm:$0xff]  }
 0x19f   : > { %v9132_v16 = vrot.slane %v1135_v62, 7  ;;  %v1954_v8 = vsel %vm8976_vm2, %v1949_v5, %v1953_v45  ;;  %v836_v20 = vmax.f32 %v804_v9, 0.0  ;;  %v1968_v22 = vrot.slane %v1966_v10, 4  ;;  %7986 = vmatprep.mubr.bf16.mxu1 %v8510_v14  ;;  %v1347_v34 = vld [vmem:[#allocation2 + $0x8c] sm:$0x1] }
 0x1a0   : > { %v1097_v23 = vor.u32 %v1095_v61, %v1094_v15  ;;  %v1099_v24 = vrot.slane %v1094_v15, 4  ;;  %v1964_v29 = vsel %vm8976_vm2, %v1959_v19, %v1963_v54  ;;  %v1971_v32 = vrot.slane %v1969_v12, 5  ;;  %v1343_v54 = vld [vmem:[#allocation2 + $0x84] sm:$0xf] }
 0x1a1   : > { %v1140_v26 = vor.u32 %v1138_v1, %v9132_v16  ;;  %v1141_v25 = vrot.slane %v9132_v16, 4  ;;  %v7653_v30 = vpack.c.bf16 %v836_v20, %v836_v20  ;;  %v1977_v33 = vrot.slane %v1975_v18, 5 }
 0x1a2   : > { %v1098_v36 = vsel %vm9022_vm9, %v1090_v21, %v1097_v23  ;;  %v1334_v37 = vsel %vm9028_vm10, %v1099_v24, %v1333_v3  ;;  %v7386_v38 = vcombine.low %v1954_v8, %v1964_v29  ;;  %v1972_v41 = vor.u32 %v1971_v32, %v1968_v22  ;;  %v1354_v32 = vld [vmem:[#allocation2 + $0x98] sm:$0x1] }
 0x1a3   : > { %v1351_v63 = vsel %vm9011_vm8, %v1140_v26, %v1350_v4  ;;  %1332 = vst [vmem:[#allocation2 + $0x70] sm:$0xf] %v1098_v36  ;;  %1335 = vst [vmem:[#allocation2 + $0x74] sm:$0x1] %v1334_v37  ;;  %v1118_v40 = vshrl.u32 %v7653_v30, 16  ;;  %v1121_v39 = vshll.u32 %v7653_v30, 16  ;;  %v766_v21 = vmul.f32 %v8990_v0, %v694_v11  ;;  %v707_v11 = vpop.f32.mrf.mxu0 }
 0x1a4   : > { %1352 = vst [vmem:[#allocation2 + $0x90] sm:$0xf] %v1351_v63  ;;  %v1979_v42 = vshrl.u32 %v1873_v58, 16  ;;  %8019 = vmatmul.mubr.bf16.vlgmr.msra.gmra.mxu0 %v7386_v38  ;;  %v1985_v43 = vshll.u32 %v1874_v31, 16  ;;  %v1973_v49 = vrot.slane %v1972_v41, 4  ;;  %v1990_v53 = vshrl.u32 %v1875_v35, 16 }
 0x1a5   : > { %v9152_v45 = vrot.slane %v1118_v40, 7  ;;  %8099 = vmatpush3.bf16.msra.mxu0 %v9004_v17  ;;  %v807_v56 = vadd.f32 %v8995_v2, %v768_v7  ;;  %v805_v52 = vadd.f32 %v8995_v2, %v766_v21  ;;  %v810_v46 = vadd.f32 %v8995_v2, %v771_v44  ;;  %v1877_v4 = vld [vmem:[#allocation2 + $0x2c] sm:$0x1]  ;;  %v8513_v24 = vld [vmem:[#allocation2 + $0x78] sm:$0xff]   ;;  %v9168_v31 = vld [vmem:[#allocation2 + $0x30] sm:$0xf]  ;;  %v7949_v63 = vpop.f32.mrf.mxu0 }
 0x1a6   : > { %v1981_v51 = vrot.slane %v1979_v42, 4  ;;  %v1987_v55 = vrot.slane %v1985_v43, 5  ;;  %8100 = vmatprep.subr.bf16.mxu0 %v8518_v27  ;;  %v1978_v61 = vsel %vm8976_vm2, %v1973_v49, %v1977_v33  ;;  %v1992_v5 = vrot.slane %v1990_v53, 4  ;;  %v8526_v38 = vld [vmem:[#allocation9 + $0xd8] sm:$0xff]   ;;  %v1364_v41 = vld [vmem:[#allocation2 + $0xa8] sm:$0xf] }
 0x1a7   : > { %v1123_v58 = vor.u32 %v1121_v39, %v9152_v45  ;;  %v1124_v60 = vrot.slane %v9152_v45, 4  ;;  %v839_v17 = vmax.f32 %v807_v56, 0.0  ;;  %v837_v1 = vmax.f32 %v805_v52, 0.0  ;;  %v1879_v56 = vld [vmem:[#allocation2 + $0x34] sm:$0xf] }
 0x1a8   : > { %v1982_v62 = vor.u32 %v1981_v51, %v1977_v33  ;;  %v842_v3 = vmax.f32 %v810_v46, 0.0  ;;  %v1993_v9 = vshll.u32 %v1875_v35, 16  ;;  %v1999_v10 = vshll.u32 %v1876_v47, 16  ;;  %v9197_v45 = vld [vmem:[%s10785_s3] ss:$0 sm:$0xff] }
 0x1a9   : > { %v1344_v6 = vsel %vm9011_vm8, %v1123_v58, %v1343_v54  ;;  %8101 = vmatpush3.bf16.msra.mxu0 %v8518_v27  ;;  %v7656_v14 = vpack.c.bf16 %v839_v17, %v839_v17  ;;  %v7654_v15 = vpack.c.bf16 %v837_v1, %v837_v1  ;;  %v2003_v18 = vshrl.u32 %v1876_v47, 16  ;;  %v1880_v58 = vld [vmem:[#allocation2 + $0x38] sm:$0x1] }
 0x1aa   : > { %v1983_v2 = vrot.slane %v1982_v62, 4  ;;  %1345 = vst [vmem:[#allocation2 + $0x84] sm:$0xf] %v1344_v6  ;;  %v7659_v12 = vpack.c.bf16 %v842_v3, %v842_v3  ;;  %v8512_v8 = vld [vmem:[#allocation2 + $0x6c] sm:$0xff]   ;;  %8102 = vmatprep.subr.bf16.mxu0 %v8522_v57  ;;  %v1995_v20 = vrot.slane %v1993_v9, 5  ;;  %v9166_v22 = vrot.slane %v1999_v10, 5 }
 0x1ab   : > { %v2009_v23 = vshll.u32 %v1877_v4, 16  ;;  %v1143_v29 = vshrl.u32 %v7656_v14, 16  ;;  %v1146_v30 = vshll.u32 %v7656_v14, 16  ;;  %v1126_v27 = vshrl.u32 %v7654_v15, 16  ;;  %7987 = vmatmul.mubr.bf16.gmra.mxu1 %v8512_v8  ;;  %v8527_v3 = vld [vmem:[#allocation9 + $0xd0] sm:$0xff]  }
 0x1ac   : > { %v1988_v19 = vsel %vm8976_vm2, %v1983_v2, %v1987_v55  ;;  %v1129_v33 = vshll.u32 %v7654_v15, 16  ;;  %v1169_v35 = vshrl.u32 %v7659_v12, 16  ;;  %v1172_v36 = vshll.u32 %v7659_v12, 16  ;;  %7990 = vmatprep.mubr.bf16.mxu1 %v8513_v24  ;;  %v9208_v14 = vld [vmem:[%s10784_s2] ss:$0 sm:$0xff] }
 0x1ad   : > { %v7387_v26 = vcombine.low %v1978_v61, %v1988_v19  ;;  %v1996_v37 = vor.u32 %v1995_v20, %v1992_v5  ;;  %8103 = vmatpush3.bf16.msra.mxu0 %v8522_v57  ;;  %v1145_v40 = vrot.slane %v1143_v29, 7  ;;  %v1128_v39 = vrot.slane %v1126_v27, 7  ;;  %v710_v61 = vpop.f32.mrf.mxu0  ;;  %v9200_v5 = vld [vmem:[#allocation2 + $0x3c] sm:$0xf]  ;;  %v9214_v27 = vld [vmem:[#allocation2 + $0x40] sm:$0xf] }
 0x1ae   : > { %v2005_v42 = vrot.slane %v2003_v18, 4  ;;  %v2011_v43 = vrot.slane %v2009_v23, 5  ;;  %8104 = vmatprep.subr.bf16.mxu0 %v8523_v13  ;;  %v9170_v7 = vrot.slane %v1169_v35, 7  ;;  %v769_v44 = vmul.f32 %v8990_v0, %v707_v11  ;;  %v8529_v23 = vld [vmem:[#allocation9 + $0xc8] sm:$0xff]   ;;  %v8531_v35 = vld [vmem:[#allocation9 + $0xc0] sm:$0xff]  }
 0x1af   : > { %8022 = vmatprep.mubr.bf16.mxu0 %v7387_v26  ;;  %v1997_v21 = vrot.slane %v1996_v37, 4  ;;  %v2014_v49 = vshrl.u32 %v9168_v31, 16  ;;  %v1148_v51 = vor.u32 %v1146_v30, %v1145_v40  ;;  %v1150_v53 = vrot.slane %v1145_v40, 4  ;;  %v7952_v18 = vpop.f32.mrf.mxu0 }
 0x1b0   : > { %v1131_v54 = vor.u32 %v1129_v33, %v1128_v39  ;;  %v1133_v55 = vrot.slane %v1128_v39, 4  ;;  %v1174_v52 = vor.u32 %v1172_v36, %v9170_v7  ;;  %v1175_v46 = vrot.slane %v9170_v7, 4 }
 0x1b1   : > { %v2002_v47 = vsel %vm8976_vm2, %v1997_v21, %v9166_v22  ;;  %v2006_v57 = vor.u32 %v2005_v42, %v9166_v22  ;;  %8105 = vmatpush3.bf16.msra.mxu0 %v8523_v13  ;;  %v1149_v0 = vsel %vm9022_vm9, %v1141_v25, %v1148_v51  ;;  %v1355_v62 = vsel %vm9028_vm10, %v1150_v53, %v1354_v32 }
 0x1b2   : > { %v1132_v17 = vsel %vm9022_vm9, %v1124_v60, %v1131_v54  ;;  %v1348_v1 = vsel %vm9028_vm10, %v1133_v55, %v1347_v34  ;;  %8106 = vmatprep.subr.bf16.mxu0 %v8526_v38  ;;  %1353 = vst [vmem:[#allocation2 + $0x94] sm:$0xf] %v1149_v0  ;;  %1356 = vst [vmem:[#allocation2 + $0x98] sm:$0x1] %v1355_v62  ;;  %v1365_v16 = vsel %vm9011_vm8, %v1174_v52, %v1364_v41  ;;  %v1357_v54 = vld [vmem:[#allocation2 + $0x9c] sm:$0xf] }
 0x1b3   : > { %1346 = vst [vmem:[#allocation2 + $0x88] sm:$0xf] %v1132_v17  ;;  %1349 = vst [vmem:[#allocation2 + $0x8c] sm:$0x1] %v1348_v1  ;;  %v2007_v25 = vrot.slane %v2006_v57, 4  ;;  %v808_v60 = vadd.f32 %v9197_v45, %v769_v44  ;;  %v2016_v4 = vrot.slane %v2014_v49, 4  ;;  %v772_v15 = vmul.f32 %v9208_v14, %v7949_v63 }
 0x1b4   : > { %1366 = vst [vmem:[#allocation2 + $0xa8] sm:$0xf] %v1365_v16  ;;  %v2017_v6 = vshll.u32 %v9168_v31, 16  ;;  %v2023_v2 = vshll.u32 %v1879_v56, 16  ;;  %v2027_v9 = vshrl.u32 %v1879_v56, 16  ;;  %v2033_v10 = vshll.u32 %v1880_v58, 16 }
 0x1b5   : > { %v2012_v11 = vsel %vm8976_vm2, %v2007_v25, %v2011_v43  ;;  %v840_v13 = vmax.f32 %v808_v60, 0.0  ;;  %v770_v12 = vmul.f32 %v9208_v14, %v710_v61  ;;  %8107 = vmatpush3.bf16.msra.mxu0 %v8526_v38  ;;  %v811_v29 = vadd.f32 %v9197_v45, %v772_v15  ;;  %v1883_v16 = vld [vmem:[#allocation2 + $0x44] sm:$0x1]  ;;  %v723_v25 = vpop.f32.mrf.mxu0  ;;  %v9225_v60 = vld [vmem:[#allocation9 + $0x178] sm:$0xff]  }
 0x1b6   : > { %v7388_v8 = vcombine.low %v2002_v47, %v2012_v11  ;;  %v2019_v19 = vrot.slane %v2017_v6, 5  ;;  %v2025_v20 = vrot.slane %v2023_v2, 5  ;;  %v2029_v22 = vrot.slane %v2027_v9, 4  ;;  %8108 = vmatprep.subr.bf16.mxu0 %v8527_v3  ;;  %v1368_v6 = vld [vmem:[#allocation2 + $0xb0] sm:$0x1] }
 0x1b7   : > { %v7657_v24 = vpack.c.bf16 %v840_v13, %v840_v13  ;;  %v2035_v26 = vrot.slane %v2033_v10, 5  ;;  %v809_v30 = vadd.f32 %v9197_v45, %v770_v12  ;;  %v775_v33 = vmul.f32 %v9208_v14, %v7952_v18  ;;  %v1361_v11 = vld [vmem:[#allocation2 + $0xa4] sm:$0x1] }
 0x1b8   : > { %8023 = vmatmul.mubr.bf16.gmra.mxu0 %v7388_v8  ;;  %v2020_v31 = vor.u32 %v2019_v19, %v2016_v4  ;;  %v2030_v32 = vor.u32 %v2029_v22, %v2025_v20  ;;  %v2038_v34 = vshrl.u32 %v9200_v5, 16  ;;  %v843_v63 = vmax.f32 %v811_v29, 0.0  ;;  %v1378_v19 = vld [vmem:[#allocation2 + $0xc0] sm:$0xf] }
 0x1b9   : > { %v1152_v36 = vshrl.u32 %v7657_v24, 16  ;;  %v1155_v37 = vshll.u32 %v7657_v24, 16  ;;  %v841_v38 = vmax.f32 %v809_v30, 0.0  ;;  %8109 = vmatpush3.bf16.msra.mxu0 %v8527_v3  ;;  %v814_v41 = vadd.f32 %v9197_v45, %v775_v33  ;;  %v8516_v53 = vld [vmem:[#allocation2 + $0x90] sm:$0xff]  }
 0x1ba   : > { %v2021_v40 = vrot.slane %v2020_v31, 4  ;;  %v2031_v39 = vrot.slane %v2030_v32, 4  ;;  %v2040_v42 = vrot.slane %v2038_v34, 4  ;;  %v8515_v43 = vld [vmem:[#allocation2 + $0x84] sm:$0xff]   ;;  %8110 = vmatprep.subr.bf16.mxu0 %v8529_v23  ;;  %v7660_v44 = vpack.c.bf16 %v843_v63, %v843_v63  ;;  %v1885_v31 = vld [vmem:[#allocation2 + $0x4c] sm:$0xf]  ;;  %v7953_v32 = vpop.f32.mrf.mxu0 }
 0x1bb   : > { %v1154_v21 = vrot.slane %v1152_v36, 7  ;;  %v7658_v49 = vpack.c.bf16 %v841_v38, %v841_v38  ;;  %v2041_v51 = vshll.u32 %v9200_v5, 16  ;;  %v846_v52 = vmax.f32 %v814_v41, 0.0  ;;  %7991 = vmatmul.mubr.bf16.gmra.mxu1 %v8515_v43 }
 0x1bc   : > { %v2026_v55 = vsel %vm8976_vm2, %v2021_v40, %v2025_v20  ;;  %v2036_v56 = vsel %vm8976_vm2, %v2031_v39, %v2035_v26  ;;  %v2047_v47 = vshll.u32 %v9214_v27, 16  ;;  %v1177_v0 = vshrl.u32 %v7660_v44, 16  ;;  %7994 = vmatprep.mubr.bf16.mxu1 %v8516_v53 }
 0x1bd   : > { %v1157_v57 = vor.u32 %v1155_v37, %v1154_v21  ;;  %v1158_v58 = vrot.slane %v1154_v21, 4  ;;  %v7389_v61 = vcombine.low %v2026_v55, %v2036_v56  ;;  %8111 = vmatpush3.bf16.msra.mxu0 %v8529_v23  ;;  %v1180_v62 = vshll.u32 %v7660_v44, 16  ;;  %v1884_v23 = vld [vmem:[#allocation2 + $0x48] sm:$0xf] }
 0x1be   : > { %v1160_v17 = vshrl.u32 %v7658_v49, 16  ;;  %v1163_v1 = vshll.u32 %v7658_v49, 16  ;;  %v7663_v3 = vpack.c.bf16 %v846_v52, %v846_v52  ;;  %8112 = vmatprep.subr.bf16.mxu0 %v8531_v35  ;;  %v1179_v5 = vrot.slane %v1177_v0, 7  ;;  %v726_v49 = vpop.f32.mrf.mxu0 }
 0x1bf   : > { %v1358_v4 = vsel %vm9011_vm8, %v1157_v57, %v1357_v54  ;;  %8026 = vmatprep.mubr.bf16.mxu0 %v7389_v61  ;;  %v2043_v2 = vrot.slane %v2041_v51, 5  ;;  %v2049_v9 = vrot.slane %v2047_v47, 5  ;;  %v2051_v12 = vshrl.u32 %v9214_v27, 16 }
 0x1c0   : > { %1359 = vst [vmem:[#allocation2 + $0x9c] sm:$0xf] %v1358_v4  ;;  %v1162_v10 = vrot.slane %v1160_v17, 7  ;;  %v1203_v13 = vshrl.u32 %v7663_v3, 16  ;;  %v1206_v15 = vshll.u32 %v7663_v3, 16  ;;  %v1182_v18 = vor.u32 %v1180_v62, %v1179_v5 }
 0x1c1   : > { %v1184_v8 = vrot.slane %v1179_v5, 4  ;;  %v2044_v20 = vor.u32 %v2043_v2, %v2040_v42  ;;  %v2057_v22 = vshll.u32 %v1883_v16, 16  ;;  %8113 = vmatpush3.bf16.msra.mxu0 %v8531_v35  ;;  %v2053_v30 = vrot.slane %v2051_v12, 4  ;;  %v1886_v35 = vld [vmem:[#allocation2 + $0x50] sm:$0x1] }
 0x1c2   : > { %v1165_v24 = vor.u32 %v1163_v1, %v1162_v10  ;;  %v1167_v26 = vrot.slane %v1162_v10, 4  ;;  %v9230_v29 = vrot.slane %v1203_v13, 7  ;;  %8194 = vmatprep.subr.bf16.mxu0 %v9225_v60  ;;  %v1183_v27 = vsel %vm9022_vm9, %v1175_v46, %v1182_v18  ;;  %v1888_v1 = vld [vmem:[#allocation2 + $0x58] sm:$0xf] }
 0x1c3   : > { %v1369_v33 = vsel %vm9028_vm10, %v1184_v8, %v1368_v6  ;;  %v2045_v34 = vrot.slane %v2044_v20, 4  ;;  %v2059_v36 = vrot.slane %v2057_v22, 5  ;;  %1367 = vst [vmem:[#allocation2 + $0xac] sm:$0xf] %v1183_v27  ;;  %v2054_v40 = vor.u32 %v2053_v30, %v2049_v9  ;;  %v1371_v30 = vld [vmem:[#allocation2 + $0xb4] sm:$0xf] }
 0x1c4   : > { %1370 = vst [vmem:[#allocation2 + $0xb0] sm:$0x1] %v1369_v33  ;;  %v1166_v37 = vsel %vm9022_vm9, %v1158_v58, %v1165_v24  ;;  %v1362_v63 = vsel %vm9028_vm10, %v1167_v26, %v1361_v11  ;;  %v1208_v38 = vor.u32 %v1206_v15, %v9230_v29  ;;  %v1209_v7 = vrot.slane %v9230_v29, 4  ;;  %v1887_v58 = vld [vmem:[#allocation2 + $0x54] sm:$0xf] }
 0x1c5   : > { %1360 = vst [vmem:[#allocation2 + $0xa0] sm:$0xf] %v1166_v37  ;;  %1363 = vst [vmem:[#allocation2 + $0xa4] sm:$0x1] %v1362_v63  ;;  %v2050_v46 = vsel %vm8976_vm2, %v2045_v34, %v2049_v9  ;;  %v773_v39 = vmul.f32 %v9208_v14, %v723_v25  ;;  %v2062_v41 = vshrl.u32 %v1884_v23, 16  ;;  %v2065_v43 = vshll.u32 %v1884_v23, 16 }
 0x1c6   : > { %v1379_v42 = vsel %vm9011_vm8, %v1208_v38, %v1378_v19  ;;  %v2071_v21 = vshll.u32 %v1885_v31, 16  ;;  %v2075_v44 = vshrl.u32 %v1885_v31, 16  ;;  %v2055_v51 = vrot.slane %v2054_v40, 4  ;;  %v1889_v27 = vld [vmem:[#allocation2 + $0x5c] sm:$0x1] }
 0x1c7   : > { %1380 = vst [vmem:[#allocation2 + $0xc0] sm:$0xf] %v1379_v42  ;;  %v812_v53 = vadd.f32 %v9197_v45, %v773_v39  ;;  %v2064_v54 = vrot.slane %v2062_v41, 4  ;;  %v2081_v55 = vshll.u32 %v1886_v35, 16  ;;  %v2067_v56 = vrot.slane %v2065_v43, 5 }
 0x1c8   : > { %v2073_v52 = vrot.slane %v2071_v21, 5  ;;  %v2077_v47 = vrot.slane %v2075_v44, 4  ;;  %v776_v57 = vmul.f32 %v9208_v14, %v7953_v32  ;;  %v2060_v61 = vsel %vm8976_vm2, %v2055_v51, %v2059_v36  ;;  %v1890_v63 = vld [vmem:[#allocation2 + $0x60] sm:$0xf]  ;;  %v1382_v40 = vld [vmem:[#allocation2 + $0xc8] sm:$0x1] }
 0x1c9   : > { %v844_v0 = vmax.f32 %v812_v53, 0.0  ;;  %v2083_v62 = vrot.slane %v2081_v55, 5  ;;  %v774_v17 = vmul.f32 %v9208_v14, %v726_v49  ;;  %v7390_v3 = vcombine.low %v2050_v46, %v2060_v61  ;;  %v1375_v43 = vld [vmem:[#allocation2 + $0xbc] sm:$0x1]  ;;  %v1891_v51 = vld [vmem:[#allocation2 + $0x64] sm:$0xf] }
 0x1ca   : > { %v2068_v16 = vor.u32 %v2067_v56, %v2064_v54  ;;  %v2078_v25 = vor.u32 %v2077_v47, %v2073_v52  ;;  %v815_v4 = vadd.f32 %v9197_v45, %v776_v57  ;;  %v2086_v2 = vshrl.u32 %v1887_v58, 16  ;;  %v8521_v24 = vld [vmem:[#allocation2 + $0xa8] sm:$0xff]  }
 0x1cb   : > { %v7661_v5 = vpack.c.bf16 %v844_v0, %v844_v0  ;;  %v813_v6 = vadd.f32 %v9197_v45, %v774_v17  ;;  %v2089_v9 = vshll.u32 %v1887_v58, 16  ;;  %8027 = vmatmul.mubr.bf16.gmra.mxu0 %v7390_v3  ;;  %v2095_v15 = vshll.u32 %v1888_v1, 16  ;;  %v1892_v55 = vld [vmem:[#allocation2 + $0x68] sm:$0x1]  ;;  %v1893_v3 = vld [vmem:[#allocation2 + $0x6c] sm:$0xf] }
 0x1cc   : > { %v2069_v10 = vrot.slane %v2068_v16, 4  ;;  %v2079_v11 = vrot.slane %v2078_v25, 4  ;;  %v847_v13 = vmax.f32 %v815_v4, 0.0  ;;  %v2088_v14 = vrot.slane %v2086_v2, 4  ;;  %v8520_v19 = vld [vmem:[#allocation2 + $0x9c] sm:$0xff]  }
 0x1cd   : > { %v1186_v12 = vshrl.u32 %v7661_v5, 16  ;;  %v1189_v18 = vshll.u32 %v7661_v5, 16  ;;  %v845_v8 = vmax.f32 %v813_v6, 0.0  ;;  %v2091_v45 = vrot.slane %v2089_v9, 5  ;;  %7995 = vmatmul.mubr.bf16.gmra.mxu1 %v8520_v19  ;;  %v1897_v19 = vld [vmem:[#allocation2 + $0x7c] sm:$0xf] }
 0x1ce   : > { %v2074_v20 = vsel %vm8976_vm2, %v2069_v10, %v2073_v52  ;;  %v2084_v22 = vsel %vm8976_vm2, %v2079_v11, %v2083_v62  ;;  %v7664_v23 = vpack.c.bf16 %v847_v13, %v847_v13  ;;  %v2097_v33 = vrot.slane %v2095_v15, 5  ;;  %7998 = vmatprep.mubr.bf16.mxu1 %v8521_v24  ;;  %v1894_v10 = vld [vmem:[#allocation2 + $0x70] sm:$0xf]  ;;  %v1895_v13 = vld [vmem:[#allocation2 + $0x74] sm:$0x1] }
 0x1cf   : > { %v1188_v26 = vrot.slane %v1186_v12, 7  ;;  %v7391_v31 = vcombine.low %v2074_v20, %v2084_v22  ;;  %v7662_v32 = vpack.c.bf16 %v845_v8, %v845_v8  ;;  %v2092_v35 = vor.u32 %v2091_v45, %v2088_v14  ;;  %v1896_v12 = vld [vmem:[#allocation2 + $0x78] sm:$0xf]  ;;  %v1898_v45 = vld [vmem:[#allocation2 + $0x80] sm:$0x1] }
 0x1d0   : > { %v1211_v34 = vshrl.u32 %v7664_v23, 16  ;;  %v1214_v36 = vshll.u32 %v7664_v23, 16  ;;  %v2099_v37 = vshrl.u32 %v1888_v1, 16  ;;  %v2105_v49 = vshll.u32 %v1889_v27, 16 }
 0x1d1   : > { %v1191_v38 = vor.u32 %v1189_v18, %v1188_v26  ;;  %v1192_v46 = vrot.slane %v1188_v26, 4  ;;  %8030 = vmatprep.mubr.bf16.mxu0 %v7391_v31  ;;  %v1194_v39 = vshrl.u32 %v7662_v32, 16  ;;  %v1197_v41 = vshll.u32 %v7662_v32, 16 }
 0x1d2   : > { %v1213_v42 = vrot.slane %v1211_v34, 7  ;;  %v2093_v21 = vrot.slane %v2092_v35, 4  ;;  %v2101_v44 = vrot.slane %v2099_v37, 4  ;;  %v2110_v56 = vshrl.u32 %v1890_v63, 16 }
 0x1d3   : > { %v1372_v53 = vsel %vm9011_vm8, %v1191_v38, %v1371_v30  ;;  %v1196_v54 = vrot.slane %v1194_v39, 7  ;;  %v2113_v52 = vshll.u32 %v1890_v63, 16  ;;  %v2107_v17 = vrot.slane %v2105_v49, 5 }
 0x1d4   : > { %1373 = vst [vmem:[#allocation2 + $0xb4] sm:$0xf] %v1372_v53  ;;  %v1216_v47 = vor.u32 %v1214_v36, %v1213_v42  ;;  %v1218_v57 = vrot.slane %v1213_v42, 4  ;;  %v2098_v58 = vsel %vm8976_vm2, %v2093_v21, %v2097_v33  ;;  %v2102_v61 = vor.u32 %v2101_v44, %v2097_v33  ;;  %v1899_v36 = vld [vmem:[#allocation2 + $0x84] sm:$0xf] }
 0x1d5   : > { %v1199_v0 = vor.u32 %v1197_v41, %v1196_v54  ;;  %v1201_v62 = vrot.slane %v1196_v54, 4  ;;  %v2112_v1 = vrot.slane %v2110_v56, 4  ;;  %v2115_v4 = vrot.slane %v2113_v52, 5  ;;  %v1901_v52 = vld [vmem:[#allocation2 + $0x8c] sm:$0x1] }
 0x1d6   : > { %v1217_v28 = vsel %vm9022_vm9, %v1209_v7, %v1216_v47  ;;  %v1383_v16 = vsel %vm9028_vm10, %v1218_v57, %v1382_v40  ;;  %v2103_v25 = vrot.slane %v2102_v61, 4  ;;  %v2119_v2 = vshll.u32 %v1891_v51, 16 }
 0x1d7   : > { %1381 = vst [vmem:[#allocation2 + $0xc4] sm:$0xf] %v1217_v28  ;;  %1384 = vst [vmem:[#allocation2 + $0xc8] sm:$0x1] %v1383_v16  ;;  %v1200_v5 = vsel %vm9022_vm9, %v1192_v46, %v1199_v0  ;;  %v1376_v6 = vsel %vm9028_vm10, %v1201_v62, %v1375_v43  ;;  %v2123_v9 = vshrl.u32 %v1891_v51, 16  ;;  %v2116_v7 = vor.u32 %v2115_v4, %v2112_v1 }
 0x1d8   : > { %1374 = vst [vmem:[#allocation2 + $0xb8] sm:$0xf] %v1200_v5  ;;  %1377 = vst [vmem:[#allocation2 + $0xbc] sm:$0x1] %v1376_v6  ;;  %v2108_v29 = vsel %vm8976_vm2, %v2103_v25, %v2107_v17  ;;  %v2129_v11 = vshll.u32 %v1892_v55, 16  ;;  %v2134_v15 = vshrl.u32 %v1893_v3, 16 }
 0x1d9   : > { %v7392_v18 = vcombine.low %v2098_v58, %v2108_v29  ;;  %v2121_v8 = vrot.slane %v2119_v2, 5  ;;  %v2125_v48 = vrot.slane %v2123_v9, 4  ;;  %v2137_v14 = vshll.u32 %v1893_v3, 16  ;;  %v1900_v46 = vld [vmem:[#allocation2 + $0x88] sm:$0xf] }
 0x1da   : > { %v2117_v50 = vrot.slane %v2116_v7, 4  ;;  %v2131_v20 = vrot.slane %v2129_v11, 5  ;;  %v2136_v22 = vrot.slane %v2134_v15, 4  ;;  %v2143_v23 = vshll.u32 %v1894_v10, 16  ;;  %v1902_v0 = vld [vmem:[#allocation2 + $0x90] sm:$0xf] }
 0x1db   : > { %8031 = vmatmul.mubr.bf16.gmra.mxu0 %v7392_v18  ;;  %v2126_v24 = vor.u32 %v2125_v48, %v2121_v8  ;;  %v2139_v26 = vrot.slane %v2137_v14, 5  ;;  %v2147_v30 = vshrl.u32 %v1894_v10, 16  ;;  %v2153_v31 = vshll.u32 %v1895_v13, 16  ;;  %v1903_v28 = vld [vmem:[#allocation2 + $0x94] sm:$0xf] }
 0x1dc   : > { %v2122_v32 = vsel %vm8976_vm2, %v2117_v50, %v2121_v8  ;;  %v2145_v27 = vrot.slane %v2143_v23, 5  ;;  %v2158_v33 = vshrl.u32 %v1896_v12, 16  ;;  %v2161_v34 = vshll.u32 %v1896_v12, 16  ;;  %v1904_v13 = vld [vmem:[#allocation2 + $0x98] sm:$0x1] }
 0x1dd   : > { %v2127_v35 = vrot.slane %v2126_v24, 4  ;;  %v2140_v37 = vor.u32 %v2139_v26, %v2136_v22  ;;  %v2149_v63 = vrot.slane %v2147_v30, 4  ;;  %v2155_v38 = vrot.slane %v2153_v31, 5  ;;  %v1905_v14 = vld [vmem:[#allocation2 + $0x9c] sm:$0xf] }
 0x1de   : > { %v2160_v40 = vrot.slane %v2158_v33, 4  ;;  %v2163_v39 = vrot.slane %v2161_v34, 5  ;;  %v2167_v41 = vshll.u32 %v1897_v19, 16  ;;  %v2171_v42 = vshrl.u32 %v1897_v19, 16  ;;  %v1906_v23 = vld [vmem:[#allocation2 + $0xa0] sm:$0xf] }
 0x1df   : > { %v2132_v43 = vsel %vm8976_vm2, %v2127_v35, %v2131_v20  ;;  %v2141_v21 = vrot.slane %v2140_v37, 4  ;;  %v2150_v44 = vor.u32 %v2149_v63, %v2145_v27  ;;  %v2177_v49 = vshll.u32 %v1898_v45, 16  ;;  %v8525_v51 = vld [vmem:[#allocation2 + $0xb4] sm:$0xff]   ;;  %v1907_v37 = vld [vmem:[#allocation2 + $0xa4] sm:$0x1] }
 0x1e0   : > { %v7393_v53 = vcombine.low %v2122_v32, %v2132_v43  ;;  %v2164_v54 = vor.u32 %v2163_v39, %v2160_v40  ;;  %v2169_v55 = vrot.slane %v2167_v41, 5  ;;  %v2173_v56 = vrot.slane %v2171_v42, 4  ;;  %7999 = vmatmul.mubr.bf16.gmra.mxu1 %v8525_v51  ;;  %v1909_v42 = vld [vmem:[#allocation2 + $0xac] sm:$0xf]  ;;  %v2687_v51 = vld [vmem:[#allocation2] sm:$0xe] }
 0x1e1   : > { %v2146_v47 = vsel %vm8976_vm2, %v2141_v21, %v2145_v27  ;;  %v2151_v57 = vrot.slane %v2150_v44, 4  ;;  %v2179_v58 = vrot.slane %v2177_v49, 5  ;;  %v2182_v61 = vshrl.u32 %v1899_v36, 16 }
 0x1e2   : > { %8034 = vmatprep.mubr.bf16.mxu0 %v7393_v53  ;;  %v2165_v62 = vrot.slane %v2164_v54, 4  ;;  %v2174_v17 = vor.u32 %v2173_v56, %v2169_v55  ;;  %v2185_v1 = vshll.u32 %v1899_v36, 16  ;;  %v2191_v3 = vshll.u32 %v1900_v46, 16 }
 0x1e3   : > { %v2156_v16 = vsel %vm8976_vm2, %v2151_v57, %v2155_v38  ;;  %v2184_v25 = vrot.slane %v2182_v61, 4  ;;  %v2195_v4 = vshrl.u32 %v1900_v46, 16  ;;  %v2201_v5 = vshll.u32 %v1901_v52, 16  ;;  %v1908_v38 = vld [vmem:[#allocation2 + $0xa8] sm:$0xf] }
 0x1e4   : > { %v7394_v6 = vcombine.low %v2146_v47, %v2156_v16  ;;  %v2170_v2 = vsel %vm8976_vm2, %v2165_v62, %v2169_v55  ;;  %v2175_v9 = vrot.slane %v2174_v17, 4  ;;  %v2187_v10 = vrot.slane %v2185_v1, 5  ;;  %v2688_v52 = vld [vmem:[#allocation2 + $0x4] sm:$0xf] }
 0x1e5   : > { %v2193_v29 = vrot.slane %v2191_v3, 5  ;;  %v2197_v7 = vrot.slane %v2195_v4, 4  ;;  %v2203_v11 = vrot.slane %v2201_v5, 5  ;;  %v2206_v15 = vshrl.u32 %v1902_v0, 16 }
 0x1e6   : > { %8035 = vmatmul.mubr.bf16.gmra.mxu0 %v7394_v6  ;;  %v2180_v12 = vsel %vm8976_vm2, %v2175_v9, %v2179_v58  ;;  %v2188_v18 = vor.u32 %v2187_v10, %v2184_v25  ;;  %v2209_v8 = vshll.u32 %v1902_v0, 16  ;;  %v2215_v48 = vshll.u32 %v1903_v28, 16  ;;  %v1910_v58 = vld [vmem:[#allocation2 + $0xb0] sm:$0x1]  ;;  %v2690_v6 = vld [vmem:[#allocation2 + $0xc] sm:$0xe] }
 0x1e7   : > { %v7395_v19 = vcombine.low %v2170_v2, %v2180_v12  ;;  %v2198_v50 = vor.u32 %v2197_v7, %v2193_v29  ;;  %v2208_v20 = vrot.slane %v2206_v15, 4  ;;  %v2219_v22 = vshrl.u32 %v1903_v28, 16  ;;  %v2689_v28 = vld [vmem:[#allocation2 + $0x8] sm:$0x1]  ;;  %v2691_v2 = vld [vmem:[#allocation2 + $0x10] sm:$0xf] }
 0x1e8   : > { %v2189_v45 = vrot.slane %v2188_v18, 4  ;;  %v2211_v24 = vrot.slane %v2209_v8, 5  ;;  %v2217_v26 = vrot.slane %v2215_v48, 5  ;;  %v2225_v30 = vshll.u32 %v1904_v13, 16  ;;  %v2692_v18 = vld [vmem:[#allocation2 + $0x14] sm:$0x1] }
 0x1e9   : > { %8038 = vmatprep.mubr.bf16.mxu0 %v7395_v19  ;;  %v2199_v31 = vrot.slane %v2198_v50, 4  ;;  %v2221_v32 = vrot.slane %v2219_v22, 4  ;;  %v2230_v27 = vshrl.u32 %v1905_v14, 16  ;;  %v2233_v33 = vshll.u32 %v1905_v14, 16 }
 0x1ea   : > { %v2194_v34 = vsel %vm8976_vm2, %v2189_v45, %v2193_v29  ;;  %v2212_v36 = vor.u32 %v2211_v24, %v2208_v20  ;;  %v2227_v35 = vrot.slane %v2225_v30, 5  ;;  %v2239_v63 = vshll.u32 %v1906_v23, 16  ;;  %v1911_v20 = vld [vmem:[#allocation2 + $0xb4] sm:$0xf] }
 0x1eb   : > { %v2204_v46 = vsel %vm8976_vm2, %v2199_v31, %v2203_v11  ;;  %v2222_v40 = vor.u32 %v2221_v32, %v2217_v26  ;;  %v2232_v39 = vrot.slane %v2230_v27, 4  ;;  %v2235_v41 = vrot.slane %v2233_v33, 5  ;;  %v1913_v33 = vld [vmem:[#allocation2 + $0xbc] sm:$0x1] }
 0x1ec   : > { %v7396_v43 = vcombine.low %v2194_v34, %v2204_v46  ;;  %v2213_v21 = vrot.slane %v2212_v36, 4  ;;  %v2241_v44 = vrot.slane %v2239_v63, 5  ;;  %v2243_v49 = vshrl.u32 %v1906_v23, 16  ;;  %v2693_v63 = vld [vmem:[#allocation2 + $0x18] sm:$0xe] }
 0x1ed   : > { %v2223_v53 = vrot.slane %v2222_v40, 4  ;;  %v2236_v54 = vor.u32 %v2235_v41, %v2232_v39  ;;  %v2249_v55 = vshll.u32 %v1907_v37, 16  ;;  %v2254_v56 = vshrl.u32 %v1908_v38, 16 }
 0x1ee   : > { %8039 = vmatmul.mubr.bf16.gmra.mxu0 %v7396_v43  ;;  %v2218_v47 = vsel %vm8976_vm2, %v2213_v21, %v2217_v26  ;;  %v2245_v57 = vrot.slane %v2243_v49, 4  ;;  %v2257_v61 = vshll.u32 %v1908_v38, 16  ;;  %v2263_v0 = vshll.u32 %v1909_v42, 16  ;;  %v1912_v26 = vld [vmem:[#allocation2 + $0xb8] sm:$0xf] }
 0x1ef   : > { %v2228_v62 = vsel %vm8976_vm2, %v2223_v53, %v2227_v35  ;;  %v2237_v17 = vrot.slane %v2236_v54, 4  ;;  %v2251_v1 = vrot.slane %v2249_v55, 5  ;;  %v2256_v3 = vrot.slane %v2254_v56, 4  ;;  %v2694_v38 = vld [vmem:[#allocation2 + $0x1c] sm:$0xf] }
 0x1f0   : > { %v7397_v16 = vcombine.low %v2218_v47, %v2228_v62  ;;  %v2246_v25 = vor.u32 %v2245_v57, %v2241_v44  ;;  %v2259_v4 = vrot.slane %v2257_v61, 5  ;;  %v2265_v5 = vrot.slane %v2263_v0, 5  ;;  %v2696_v53 = vld [vmem:[#allocation2 + $0x24] sm:$0xe]  ;;  %v2697_v47 = vld [vmem:[#allocation2 + $0x28] sm:$0xf] }
 0x1f1   : > { %v2242_v9 = vsel %vm8976_vm2, %v2237_v17, %v2241_v44  ;;  %v2267_v10 = vshrl.u32 %v1909_v42, 16  ;;  %v2273_v29 = vshll.u32 %v1910_v58, 16  ;;  %v7409_v7 = vrot.slane %v2687_v51, 9  ;;  %v2695_v42 = vld [vmem:[#allocation2 + $0x20] sm:$0x1]  ;;  %v8532_v51 = vld [vmem:[#allocation9 + $0x130] sm:$0xff]  }
 0x1f2   : > { %8042 = vmatprep.mubr.bf16.mxu0 %v7397_v16  ;;  %v2247_v11 = vrot.slane %v2246_v25, 4  ;;  %v2260_v13 = vor.u32 %v2259_v4, %v2256_v3  ;;  %v2788_v15 = vrot.slane %v2688_v52, 5  ;;  %v2791_v12 = vrot.slane %v2689_v28, 5  ;;  %v2698_v57 = vld [vmem:[#allocation2 + $0x2c] sm:$0x1]  ;;  %v8604_v25 = vld [vmem:[#allocation9 + $0x138] sm:$0xff]  }
 0x1f3   : > { %v2269_v8 = vrot.slane %v2267_v10, 4  ;;  %v2275_v48 = vrot.slane %v2273_v29, 5  ;;  %v7410_v19 = vrot.slane %v2690_v6, 9  ;;  %v2795_v50 = vrot.slane %v2691_v2, 5  ;;  %v2699_v62 = vld [vmem:[#allocation2 + $0x30] sm:$0xe] }
 0x1f4   : > { %v2252_v22 = vsel %vm8976_vm2, %v2247_v11, %v2251_v1  ;;  %v2261_v23 = vrot.slane %v2260_v13, 4  ;;  %v2789_v45 = vsel %vm9301_vm13, %v7409_v7, %v2788_v15  ;;  %v2790_v24 = vrot.slane %v2788_v15, 4  ;;  %v2700_v17 = vld [vmem:[#allocation2 + $0x34] sm:$0xf]  ;;  %v8535_v13 = vld [vmem:[#allocation9 + $0x128] sm:$0xff]  }
 0x1f5   : > { %v7398_v30 = vcombine.low %v2242_v9, %v2252_v22  ;;  %v2270_v31 = vor.u32 %v2269_v8, %v2265_v5  ;;  %v2796_v32 = vsel %vm9301_vm13, %v7410_v19, %v2795_v50  ;;  %v2797_v27 = vrot.slane %v2795_v50, 4  ;;  %v2701_v9 = vld [vmem:[#allocation2 + $0x38] sm:$0x1]  ;;  %v2703_v19 = vld [vmem:[#allocation2 + $0x40] sm:$0xf] }
 0x1f6   : > { %v2266_v34 = vsel %vm8976_vm2, %v2261_v23, %v2265_v5  ;;  %v2792_v36 = vsel %vm9301_vm13, %v2790_v24, %v2791_v12  ;;  %v2798_v35 = vrot.slane %v2692_v18, 5  ;;  %v2278_v37 = vshrl.u32 %v1911_v20, 16  ;;  %v2706_v24 = vld [vmem:[#allocation2 + $0x4c] sm:$0xf] }
 0x1f7   : > { %8043 = vmatmul.mubr.bf16.gmra.mxu0 %v7398_v30  ;;  %v2271_v46 = vrot.slane %v2270_v31, 4  ;;  %v7425_v40 = vcombine.low %v2789_v45, %v2792_v36  ;;  %v2281_v39 = vshll.u32 %v1911_v20, 16  ;;  %v2287_v41 = vshll.u32 %v1912_v26, 16  ;;  %v2704_v45 = vld [vmem:[#allocation2 + $0x44] sm:$0x1]  ;;  %v8530_v31 = vld [vmem:[#allocation2 + $0xc] sm:$0xff]  }
 0x1f8   : > { %v2799_v43 = vsel %vm9301_vm13, %v2797_v27, %v2798_v35  ;;  %v2280_v21 = vrot.slane %v2278_v37, 4  ;;  %v2291_v44 = vshrl.u32 %v1912_v26, 16  ;;  %v2297_v49 = vshll.u32 %v1913_v33, 16  ;;  %v2705_v33 = vld [vmem:[#allocation2 + $0x48] sm:$0xe] }
 0x1f9   : > { %v2276_v54 = vsel %vm8976_vm2, %v2271_v46, %v2275_v48  ;;  %8066 = vmatprep.mubr.bf16.mxu1 %v7425_v40  ;;  %v7426_v55 = vcombine.low %v2796_v32, %v2799_v43  ;;  %v2283_v56 = vrot.slane %v2281_v39, 5  ;;  %v2289_v52 = vrot.slane %v2287_v41, 5  ;;  %v2702_v48 = vld [vmem:[#allocation2 + $0x3c] sm:$0xe]  ;;  %v2708_v36 = vld [vmem:[#allocation2 + $0x54] sm:$0xe] }
 0x1fa   : > { %v7399_v58 = vcombine.low %v2266_v34, %v2276_v54  ;;  %v2293_v61 = vrot.slane %v2291_v44, 4  ;;  %v2299_v0 = vrot.slane %v2297_v49, 5  ;;  %v7411_v3 = vrot.slane %v2693_v63, 9  ;;  %v2707_v34 = vld [vmem:[#allocation2 + $0x50] sm:$0x1]  ;;  %v8538_v46 = vld [vmem:[#allocation9 + $0x120] sm:$0xff]  }
 0x1fb   : > { %8067 = vmatmul.mubr.bf16.vlgmr.msra.gmra.mxu1 %v7426_v55  ;;  %v2284_v1 = vor.u32 %v2283_v56, %v2280_v21  ;;  %v2802_v28 = vrot.slane %v2694_v38, 5  ;;  %v2805_v16 = vrot.slane %v2695_v42, 5  ;;  %v7412_v5 = vrot.slane %v2696_v53, 9  ;;  %v2709_v40 = vld [vmem:[#allocation2 + $0x58] sm:$0xf] }
 0x1fc   : > { %8046 = vmatprep.mubr.bf16.mxu0 %v7399_v58  ;;  %8147 = vmatpush3.bf16.msra.mxu1 %v8604_v25  ;;  %v2294_v4 = vor.u32 %v2293_v61, %v2289_v52  ;;  %v2809_v6 = vrot.slane %v2697_v47, 5  ;;  %v2812_v2 = vrot.slane %v2698_v57, 5  ;;  %v7413_v7 = vrot.slane %v2699_v62, 9  ;;  %v2710_v39 = vld [vmem:[#allocation2 + $0x5c] sm:$0x1] }
 0x1fd   : > { %v2285_v10 = vrot.slane %v2284_v1, 4  ;;  %v2804_v29 = vrot.slane %v2802_v28, 4  ;;  %8148 = vmatprep.subr.bf16.mxu1 %v8532_v51  ;;  %v2816_v11 = vrot.slane %v2700_v17, 5  ;;  %v2803_v12 = vsel %vm9301_vm13, %v7411_v3, %v2802_v28  ;;  %v2711_v21 = vld [vmem:[#allocation2 + $0x60] sm:$0xe] }
 0x1fe   : > { %v2295_v15 = vrot.slane %v2294_v4, 4  ;;  %v2810_v18 = vsel %vm9301_vm13, %v7412_v5, %v2809_v6  ;;  %v2811_v8 = vrot.slane %v2809_v6, 4  ;;  %v2819_v23 = vrot.slane %v2701_v9, 5  ;;  %v2712_v44 = vld [vmem:[#allocation2 + $0x64] sm:$0xf]  ;;  %v8541_v5 = vld [vmem:[#allocation9 + $0x118] sm:$0xff]  }
 0x1ff   : > { %v2290_v50 = vsel %vm8976_vm2, %v2285_v10, %v2289_v52  ;;  %v2806_v20 = vsel %vm9301_vm13, %v2804_v29, %v2805_v16  ;;  %v2818_v22 = vrot.slane %v2816_v11, 4  ;;  %v2817_v27 = vsel %vm9301_vm13, %v7413_v7, %v2816_v11  ;;  %v2713_v54 = vld [vmem:[#allocation2 + $0x68] sm:$0x1]  ;;  %v2714_v57 = vld [vmem:[#allocation2 + $0x6c] sm:$0xe] }
 0x200   : > { %v2300_v26 = vsel %vm8976_vm2, %v2295_v15, %v2299_v0  ;;  %v7427_v30 = vcombine.low %v2803_v12, %v2806_v20  ;;  %v2813_v32 = vsel %vm9301_vm13, %v2811_v8, %v2812_v2  ;;  %8149 = vmatpush3.bf16.msra.mxu1 %v8532_v51  ;;  %v2823_v38 = vrot.slane %v2703_v19, 5  ;;  %v2715_v58 = vld [vmem:[#allocation2 + $0x70] sm:$0xf]  ;;  %v2716_v1 = vld [vmem:[#allocation2 + $0x74] sm:$0x1]  ;;  %v8533_v2 = vld [vmem:[#allocation2 + $0x18] sm:$0xff]  }
 0x201   : > { %v7400_v35 = vcombine.low %v2290_v50, %v2300_v26  ;;  %v7428_v37 = vcombine.low %v2810_v18, %v2813_v32  ;;  %v2820_v63 = vsel %vm9301_vm13, %v2818_v22, %v2819_v23  ;;  %8150 = vmatprep.subr.bf16.mxu1 %v8535_v13  ;;  %v7414_v42 = vrot.slane %v2702_v48, 9  ;;  %v2717_v3 = vld [vmem:[#allocation2 + $0x78] sm:$0xe]  ;;  %v2718_v6 = vld [vmem:[#allocation2 + $0x7c] sm:$0xf]  ;;  %v8534_v15 = vld [vmem:[#allocation2 + $0x24] sm:$0xff]  }
 0x202   : > { %8070 = vmatprep.mubr.bf16.mxu1 %v7427_v30  ;;  %v7429_v41 = vcombine.low %v2817_v27, %v2820_v63  ;;  %v2830_v43 = vrot.slane %v2706_v24, 5  ;;  %v2825_v49 = vrot.slane %v2823_v38, 4  ;;  %v2826_v51 = vrot.slane %v2704_v45, 5  ;;  %v2719_v11 = vld [vmem:[#allocation2 + $0x80] sm:$0x1]  ;;  %v8544_v24 = vld [vmem:[#allocation9 + $0x110] sm:$0xff]  }
 0x203   : > { %8047 = vmatmul.mubr.bf16.gmra.mxu0 %v7400_v35  ;;  %8071 = vmatmul.mubr.bf16.gmra.mxu1 %v7428_v37  ;;  %v7415_v53 = vrot.slane %v2705_v33, 9  ;;  %v2824_v55 = vsel %vm9301_vm13, %v7414_v42, %v2823_v38  ;;  %v2833_v52 = vrot.slane %v2707_v34, 5  ;;  %v2837_v47 = vrot.slane %v2709_v40, 5  ;;  %v2721_v19 = vld [vmem:[#allocation2 + $0x88] sm:$0xf] }
 0x204   : > { %8114 = vmatprep.mubr.bf16.mxu0 %v8530_v31  ;;  %8074 = vmatprep.mubr.bf16.mxu1 %v7429_v41  ;;  %v2832_v56 = vrot.slane %v2830_v43, 4  ;;  %v2827_v61 = vsel %vm9301_vm13, %v2825_v49, %v2826_v51  ;;  %v7416_v62 = vrot.slane %v2708_v36, 9  ;;  %v2844_v17 = vrot.slane %v2712_v44, 5  ;;  %v2723_v50 = vld [vmem:[#allocation2 + $0x90] sm:$0xe]  ;;  %v8548_v34 = vld [vmem:[#allocation9 + $0x170] sm:$0xff]  }
 0x205   : > { %8151 = vmatpush3.bf16.msra.mxu1 %v8535_v13  ;;  %v2831_v0 = vsel %vm9301_vm13, %v7415_v53, %v2830_v43  ;;  %v2839_v16 = vrot.slane %v2837_v47, 4  ;;  %v2840_v25 = vrot.slane %v2710_v39, 5  ;;  %v7417_v4 = vrot.slane %v2711_v21, 9  ;;  %v2720_v13 = vld [vmem:[#allocation2 + $0x84] sm:$0xe] }
 0x206   : > { %v2834_v28 = vsel %vm9301_vm13, %v2832_v56, %v2833_v52  ;;  %8152 = vmatprep.subr.bf16.mxu1 %v8538_v46  ;;  %v7430_v9 = vcombine.low %v2824_v55, %v2827_v61  ;;  %v9345_v10 = vsel %vm9301_vm13, %v7416_v62, %v2837_v47  ;;  %v2846_v29 = vrot.slane %v2844_v17, 4  ;;  %v2724_v26 = vld [vmem:[#allocation2 + $0x94] sm:$0xf]  ;;  %v2722_v33 = vld [vmem:[#allocation2 + $0x8c] sm:$0x1]  ;;  %v8549_v43 = vld [vmem:[#allocation9 + $0x108] sm:$0xff]  }
 0x207   : > { %v2847_v7 = vrot.slane %v2713_v54, 5  ;;  %v7431_v12 = vcombine.low %v2831_v0, %v2834_v28  ;;  %v9349_v18 = vsel %vm9301_vm13, %v2839_v16, %v2840_v25  ;;  %v9353_v8 = vsel %vm9301_vm13, %v7417_v4, %v2844_v17  ;;  %v2725_v38 = vld [vmem:[#allocation2 + $0x98] sm:$0x1]  ;;  %v2727_v21 = vld [vmem:[#allocation2 + $0xa0] sm:$0xf]  ;;  %v8536_v25 = vld [vmem:[#allocation2 + $0x30] sm:$0xff]  }
 0x208   : > { %v2851_v48 = vrot.slane %v2715_v58, 5  ;;  %v7418_v22 = vrot.slane %v2714_v57, 9  ;;  %v2854_v23 = vrot.slane %v2716_v1, 5  ;;  %v2858_v45 = vrot.slane %v2718_v6, 5  ;;  %v2728_v44 = vld [vmem:[#allocation2 + $0xa4] sm:$0x1] }
 0x209   : > { %8153 = vmatpush3.bf16.msra.mxu1 %v8538_v46  ;;  %v9357_v20 = vsel %vm9301_vm13, %v2846_v29, %v2847_v7  ;;  %v7432_v30 = vcombine.low %v9345_v10, %v9349_v18  ;;  %v7419_v32 = vrot.slane %v2717_v3, 9  ;;  %v2861_v27 = vrot.slane %v2719_v11, 5  ;;  %v2726_v46 = vld [vmem:[#allocation2 + $0x9c] sm:$0xe]  ;;  %v2729_v49 = vld [vmem:[#allocation2 + $0xa8] sm:$0xe] }
 0x20a   : > { %8154 = vmatprep.subr.bf16.mxu1 %v8541_v5  ;;  %v2853_v31 = vrot.slane %v2851_v48, 4  ;;  %v7433_v36 = vcombine.low %v9353_v8, %v9357_v20  ;;  %v9365_v35 = vsel %vm9301_vm13, %v7418_v22, %v2851_v48  ;;  %v2860_v37 = vrot.slane %v2858_v45, 4  ;;  %v2730_v56 = vld [vmem:[#allocation2 + $0xac] sm:$0xf]  ;;  %v8551_v52 = vld [vmem:[#allocation9 + $0x168] sm:$0xff]   ;;  %v8553_v22 = vld [vmem:[#allocation9 + $0x160] sm:$0xff]  }
 0x20b   : > { %8115 = vmatmul.mubr.bf16.vlgmr.msra.gmra.mxu0 %v8533_v2  ;;  %8075 = vmatmul.mubr.bf16.gmra.mxu1 %v7430_v9  ;;  %v2865_v63 = vrot.slane %v2721_v19, 5  ;;  %v9373_v39 = vsel %vm9301_vm13, %v7419_v32, %v2858_v45  ;;  %v7420_v41 = vrot.slane %v2720_v13, 9  ;;  %v2872_v42 = vrot.slane %v2724_v26, 5  ;;  %v2731_v0 = vld [vmem:[#allocation2 + $0xb0] sm:$0x1]  ;;  %v8537_v29 = vld [vmem:[#allocation2 + $0x3c] sm:$0xff]  }
 0x20c   : > { %8118 = vmatprep.mubr.bf16.mxu0 %v8534_v15  ;;  %8078 = vmatprep.mubr.bf16.mxu1 %v7431_v12  ;;  %v9369_v40 = vsel %vm9301_vm13, %v2853_v31, %v2854_v23  ;;  %v9377_v51 = vsel %vm9301_vm13, %v2860_v37, %v2861_v27  ;;  %v2868_v54 = vrot.slane %v2722_v33, 5  ;;  %v7421_v55 = vrot.slane %v2723_v50, 9  ;;  %v3734_v62 = vld [vmem:[#allocation2 + $0xc] sm:$0xf]  ;;  %v2733_v28 = vld [vmem:[#allocation2 + $0xb8] sm:$0xf] }
 0x20d   : > { %8155 = vmatpush3.bf16.msra.mxu1 %v8541_v5  ;;  %v2867_v53 = vrot.slane %v2865_v63, 4  ;;  %8195 = vmatpush3.bf16.msra.mxu0 %v9225_v60  ;;  %v7434_v47 = vcombine.low %v9365_v35, %v9369_v40  ;;  %v9384_v57 = vsel %vm9301_vm13, %v7420_v41, %v2865_v63  ;;  %v2874_v58 = vrot.slane %v2872_v42, 4  ;;  %v3735_v16 = vld [vmem:[#allocation2 + $0x10] sm:$0xf]  ;;  %v2732_v9 = vld [vmem:[#allocation2 + $0xb4] sm:$0xe] }
 0x20e   : > { %8156 = vmatprep.subr.bf16.mxu1 %v8544_v24  ;;  %v2875_v61 = vrot.slane %v2725_v38, 5  ;;  %8196 = vmatprep.subr.bf16.mxu0 %v8548_v34  ;;  %v7435_v17 = vcombine.low %v9373_v39, %v9377_v51  ;;  %v9394_v1 = vsel %vm9301_vm13, %v7421_v55, %v2872_v42  ;;  %v2879_v3 = vrot.slane %v2727_v21, 5  ;;  %v2734_v12 = vld [vmem:[#allocation2 + $0xbc] sm:$0x1]  ;;  %v3736_v26 = vld [vmem:[#allocation2 + $0x14] sm:$0x1] }
 0x20f   : > { %v9390_v60 = vsel %vm9301_vm13, %v2867_v53, %v2868_v54  ;;  %v7422_v5 = vrot.slane %v2726_v46, 9  ;;  %v2882_v6 = vrot.slane %v2728_v44, 5  ;;  %v2886_v2 = vrot.slane %v2730_v56, 5  ;;  %v8554_v23 = vld [vmem:[#allocation9 + $0x100] sm:$0xff]   ;;  %v8556_v42 = vld [vmem:[#allocation9 + $0x158] sm:$0xff]  }
 0x210   : > { %v9398_v4 = vsel %vm9301_vm13, %v2874_v58, %v2875_v61  ;;  %v7436_v7 = vcombine.low %v9384_v57, %v9390_v60  ;;  %v2881_v11 = vrot.slane %v2879_v3, 4  ;;  %v7423_v13 = vrot.slane %v2729_v49, 9  ;;  %v3737_v33 = vld [vmem:[#allocation2 + $0x18] sm:$0xf]  ;;  %v3738_v37 = vld [vmem:[#allocation2 + $0x1c] sm:$0xf] }
 0x211   : > { %8157 = vmatpush3.bf16.msra.mxu1 %v8544_v24  ;;  %8197 = vmatpush3.bf16.msra.mxu0 %v8548_v34  ;;  %v2889_v15 = vrot.slane %v2731_v0, 5  ;;  %v7437_v48 = vcombine.low %v9394_v1, %v9398_v4  ;;  %v9406_v19 = vsel %vm9301_vm13, %v7422_v5, %v2879_v3  ;;  %v2888_v50 = vrot.slane %v2886_v2, 4  ;;  %v9430_v21 = vld [vmem:[#allocation9 + $0x1b8] sm:$0xff]   ;;  %v3739_v53 = vld [vmem:[#allocation2 + $0x20] sm:$0x1] }
 0x212   : > { %8158 = vmatprep.subr.bf16.mxu1 %v8549_v43  ;;  %8198 = vmatprep.subr.bf16.mxu0 %v8551_v52  ;;  %v2893_v45 = vrot.slane %v2733_v28, 5  ;;  %v9413_v24 = vsel %vm9301_vm13, %v2881_v11, %v2882_v6  ;;  %v3783_v31 = vshrl.u32 %v3734_v62, 16  ;;  %v3786_v32 = vshll.u32 %v3734_v62, 16  ;;  %v3740_v56 = vld [vmem:[#allocation2 + $0x24] sm:$0xf]  ;;  %v8540_v28 = vld [vmem:[#allocation2 + $0x54] sm:$0xff]  }
 0x213   : > { %8119 = vmatmul.mubr.bf16.gmra.mxu0 %v8536_v25  ;;  %8079 = vmatmul.mubr.bf16.gmra.mxu1 %v7432_v30  ;;  %v3792_v27 = vshll.u32 %v3735_v16, 16  ;;  %v7438_v34 = vcombine.low %v9406_v19, %v9413_v24  ;;  %v9422_v10 = vsel %vm9301_vm13, %v7423_v13, %v2886_v2  ;;  %v7424_v18 = vrot.slane %v2732_v9, 9  ;;  %v3741_v3 = vld [vmem:[#allocation2 + $0x28] sm:$0xf]  ;;  %v3742_v2 = vld [vmem:[#allocation2 + $0x2c] sm:$0x1] }
 0x214   : > { %8122 = vmatprep.mubr.bf16.mxu0 %v8537_v29  ;;  %8082 = vmatprep.mubr.bf16.mxu1 %v7433_v36  ;;  %v2896_v30 = vrot.slane %v2734_v12, 5  ;;  %v9426_v63 = vsel %vm9301_vm13, %v2888_v50, %v2889_v15  ;;  %v2895_v38 = vrot.slane %v2893_v45, 4  ;;  %v3785_v46 = vrot.slane %v3783_v31, 4  ;;  %v8558_v29 = vld [vmem:[#allocation9 + $0x150] sm:$0xff]   ;;  %v4556_v57 = vld [vmem:[#allocation2 + $0x1c] sm:$0xf] }
 0x215   : > { %8159 = vmatpush3.bf16.msra.mxu1 %v8549_v43  ;;  %8199 = vmatpush3.bf16.msra.mxu0 %v8551_v52  ;;  %v3788_v8 = vrot.slane %v3786_v32, 5  ;;  %v9428_v20 = vrot.slane %v3792_v27, 5  ;;  %v3796_v36 = vshrl.u32 %v3735_v16, 16  ;;  %v3802_v41 = vshll.u32 %v3736_v26, 16  ;;  %v8539_v52 = vld [vmem:[#allocation2 + $0x48] sm:$0xff]  }
 0x216   : > { %8200 = vmatprep.subr.bf16.mxu0 %v8553_v22  ;;  %8160 = vmatprep.subr.bf16.mxu1 %v8554_v23  ;;  %v3807_v44 = vshrl.u32 %v3737_v33, 16  ;;  %v9434_v43 = vsel %vm9301_vm13, %v7424_v18, %v2893_v45  ;;  %v3810_v54 = vshll.u32 %v3737_v33, 16  ;;  %v3816_v55 = vshll.u32 %v3738_v37, 16  ;;  %v9446_v12 = vld [vmem:[#allocation2 + $0xc] sm:$0xe] }
 0x217   : > { %v3789_v49 = vor.u32 %v3788_v8, %v3785_v46  ;;  %v7439_v58 = vcombine.low %v9422_v10, %v9426_v63  ;;  %v3798_v61 = vrot.slane %v3796_v36, 4  ;;  %v3820_v62 = vshrl.u32 %v3738_v37, 16  ;;  %v4553_v33 = vld [vmem:[#allocation2 + $0x10] sm:$0xf]  ;;  %v4554_v37 = vld [vmem:[#allocation2 + $0x14] sm:$0x1] }
 0x218   : > { %v3809_v0 = vrot.slane %v3807_v44, 4  ;;  %v9440_v16 = vsel %vm9301_vm13, %v2895_v38, %v2896_v30  ;;  %v3804_v25 = vrot.slane %v3802_v41, 5  ;;  %v3812_v5 = vrot.slane %v3810_v54, 5  ;;  %v8561_v30 = vld [vmem:[#allocation9 + $0x148] sm:$0xff]   ;;  %v3743_v38 = vld [vmem:[#allocation2 + $0x30] sm:$0xf] }
 0x219   : > { %8201 = vmatpush3.bf16.msra.mxu0 %v8553_v22  ;;  %8161 = vmatpush3.bf16.msra.mxu1 %v8554_v23  ;;  %v9442_v6 = vrot.slane %v3816_v55, 5  ;;  %v3799_v9 = vor.u32 %v3798_v61, %v9428_v20  ;;  %v3822_v11 = vrot.slane %v3820_v62, 4  ;;  %v3831_v13 = vshrl.u32 %v3740_v56, 16  ;;  %v8542_v8 = vld [vmem:[#allocation2 + $0x60] sm:$0xff]   ;;  %v8562_v61 = vld [vmem:[#allocation9 + $0x140] sm:$0xff]  }
 0x21a   : > { %8202 = vmatprep.subr.bf16.mxu0 %v8556_v42  ;;  %8242 = vmatprep.subr.bf16.mxu1 %v9430_v21  ;;  %v3834_v15 = vshll.u32 %v3740_v56, 16  ;;  %v3790_v50 = vrot.slane %v3789_v49, 4  ;;  %v3813_v22 = vor.u32 %v3812_v5, %v3809_v0  ;;  %v3826_v23 = vshll.u32 %v3739_v53, 16  ;;  %v3744_v49 = vld [vmem:[#allocation2 + $0x34] sm:$0xf]  ;;  %v8543_v53 = vld [vmem:[#allocation2 + $0x6c] sm:$0xff]  }
 0x21b   : > { %8123 = vmatmul.mubr.bf16.gmra.mxu0 %v8539_v52  ;;  %8083 = vmatmul.mubr.bf16.gmra.mxu1 %v7434_v47  ;;  %v3840_v45 = vshll.u32 %v3741_v3, 16  ;;  %v3800_v26 = vrot.slane %v3799_v9, 4  ;;  %v3823_v31 = vor.u32 %v3822_v11, %v9442_v6  ;;  %v3833_v32 = vrot.slane %v3831_v13, 4  ;;  %v3745_v0 = vld [vmem:[#allocation2 + $0x38] sm:$0x1] }
 0x21c   : > { %8126 = vmatprep.mubr.bf16.mxu0 %v8540_v28  ;;  %8086 = vmatprep.mubr.bf16.mxu1 %v7435_v17  ;;  %v3836_v27 = vrot.slane %v3834_v15, 5  ;;  %v7440_v18 = vcombine.low %v9434_v43, %v9440_v16  ;;  %v3814_v35 = vrot.slane %v3813_v22, 4  ;;  %v3844_v47 = vshrl.u32 %v3741_v3, 16  ;;  %v3746_v62 = vld [vmem:[#allocation2 + $0x3c] sm:$0xf] }
 0x21d   : > { %8203 = vmatpush3.bf16.msra.mxu0 %v8556_v42  ;;  %v9457_v40 = vrot.slane %v3840_v45, 5  ;;  %v3805_v39 = vsel %vm8976_vm2, %v3800_v26, %v3804_v25  ;;  %v3824_v51 = vrot.slane %v3823_v31, 4  ;;  %v3850_v46 = vshll.u32 %v3742_v2, 16  ;;  %v3747_v13 = vld [vmem:[#allocation2 + $0x40] sm:$0xf] }
 0x21e   : > { %8204 = vmatprep.subr.bf16.mxu0 %v8558_v29  ;;  %v3837_v17 = vor.u32 %v3836_v27, %v3833_v32  ;;  %v3795_v36 = vsel %vm8976_vm2, %v3790_v50, %v9428_v20  ;;  %v3828_v41 = vrot.slane %v3826_v23, 5  ;;  %v3846_v42 = vrot.slane %v3844_v47, 4  ;;  %v3748_v50 = vld [vmem:[#allocation2 + $0x44] sm:$0x1] }
 0x21f   : > { %v7497_v44 = vrot.slane %v9446_v12, 9  ;;  %v9465_v54 = vcombine.low %v3795_v36, %v3805_v39  ;;  %v3819_v55 = vsel %vm8976_vm2, %v3814_v35, %v9442_v6  ;;  %v4650_v52 = vrot.slane %v4553_v33, 5  ;;  %v9494_v33 = vld [vmem:[#allocation9 + $0x1f8] sm:$0xff]   ;;  %v8545_v35 = vld [vmem:[#allocation2 + $0x78] sm:$0xff]   ;;  %v8547_v39 = vld [vmem:[#allocation2 + $0x84] sm:$0xff]  }
 0x220   : > { %v3838_v56 = vrot.slane %v3837_v17, 4  ;;  %v3829_v20 = vsel %vm8976_vm2, %v3824_v51, %v3828_v41  ;;  %v3847_v3 = vor.u32 %v3846_v42, %v9457_v40  ;;  %v3855_v28 = vshrl.u32 %v3743_v38, 16 }
 0x221   : > { %8205 = vmatpush3.bf16.msra.mxu0 %v8558_v29  ;;  %v3858_v25 = vshll.u32 %v3743_v38, 16  ;;  %v3852_v5 = vrot.slane %v3850_v46, 5  ;;  %v4652_v2 = vrot.slane %v4650_v52, 4  ;;  %v4653_v9 = vrot.slane %v4554_v37, 5  ;;  %v4555_v38 = vld [vmem:[#allocation2 + $0x18] sm:$0xe] }
 0x222   : > { %8206 = vmatprep.subr.bf16.mxu0 %v8561_v30  ;;  %v3864_v11 = vshll.u32 %v3744_v49, 16  ;;  %v3848_v6 = vrot.slane %v3847_v3, 4  ;;  %v3857_v29 = vrot.slane %v3855_v28, 4  ;;  %v3868_v12 = vshrl.u32 %v3744_v49, 16  ;;  %v3749_v3 = vld [vmem:[#allocation2 + $0x48] sm:$0xf] }
 0x223   : > { %8127 = vmatmul.mubr.bf16.gmra.mxu0 %v8542_v8  ;;  %8087 = vmatmul.mubr.bf16.gmra.mxu1 %v7436_v7  ;;  %v3860_v15 = vrot.slane %v3858_v25, 5  ;;  %v9479_v22 = vcombine.low %v3819_v55, %v3829_v20  ;;  %v3843_v23 = vsel %vm8976_vm2, %v3838_v56, %v9457_v40  ;;  %v3879_v26 = vshrl.u32 %v3746_v62, 16  ;;  %v4557_v8 = vld [vmem:[#allocation2 + $0x20] sm:$0x1]  ;;  %v4559_v55 = vld [vmem:[#allocation2 + $0x28] sm:$0xf] }
 0x224   : > { %8130 = vmatprep.mubr.bf16.mxu0 %v8543_v53  ;;  %8090 = vmatprep.mubr.bf16.mxu1 %v7437_v48  ;;  %v3866_v45 = vrot.slane %v3864_v11, 5  ;;  %v9486_v60 = vsel %vm9301_vm13, %v4652_v2, %v4653_v9  ;;  %v3870_v31 = vrot.slane %v3868_v12, 4  ;;  %v3874_v32 = vshll.u32 %v3745_v0, 16  ;;  %v4558_v53 = vld [vmem:[#allocation2 + $0x24] sm:$0xe] }
 0x225   : > { %8207 = vmatpush3.bf16.msra.mxu0 %v8561_v30  ;;  %v3861_v7 = vor.u32 %v3860_v15, %v3857_v29  ;;  %v3853_v1 = vsel %vm8976_vm2, %v3848_v6, %v3852_v5  ;;  %v9492_v4 = vsel %vm9301_vm13, %v7497_v44, %v4650_v52  ;;  %v3881_v48 = vrot.slane %v3879_v26, 4  ;;  %v4560_v20 = vld [vmem:[#allocation2 + $0x2c] sm:$0x1] }
 0x226   : > { %8208 = vmatprep.subr.bf16.mxu0 %v8562_v61  ;;  %v3882_v27 = vshll.u32 %v3746_v62, 16  ;;  %v3871_v47 = vor.u32 %v3870_v31, %v3866_v45  ;;  %v3888_v30 = vshll.u32 %v3747_v13, 16  ;;  %v3892_v37 = vshrl.u32 %v3747_v13, 16  ;;  %v3750_v2 = vld [vmem:[#allocation2 + $0x4c] sm:$0xf] }
 0x227   : > { %v3862_v40 = vrot.slane %v3861_v7, 4  ;;  %v7513_v51 = vcombine.low %v9492_v4, %v9486_v60  ;;  %v3898_v46 = vshll.u32 %v3748_v50, 16  ;;  %v4657_v36 = vrot.slane %v4556_v57, 5  ;;  %v3752_v13 = vld [vmem:[#allocation2 + $0x54] sm:$0xf] }
 0x228   : > { %v3884_v17 = vrot.slane %v3882_v27, 5  ;;  %v3872_v41 = vrot.slane %v3871_v47, 4  ;;  %v3876_v42 = vrot.slane %v3874_v32, 5  ;;  %v3890_v44 = vrot.slane %v3888_v30, 5  ;;  %v3753_v7 = vld [vmem:[#allocation2 + $0x58] sm:$0xf] }
 0x229   : > { %8209 = vmatpush3.bf16.msra.mxu0 %v8562_v61  ;;  %v3894_v49 = vrot.slane %v3892_v37, 4  ;;  %v9498_v56 = vcombine.low %v3843_v23, %v3853_v1  ;;  %v7498_v0 = vrot.slane %v4555_v38, 9  ;;  %v4659_v62 = vrot.slane %v4657_v36, 4  ;;  %v3754_v27 = vld [vmem:[#allocation2 + $0x5c] sm:$0x1] }
 0x22a   : > { %v3885_v52 = vor.u32 %v3884_v17, %v3881_v48  ;;  %8290 = vmatprep.subr.bf16.mxu0 %v9494_v33  ;;  %v3867_v61 = vsel %vm8976_vm2, %v3862_v40, %v3866_v45  ;;  %v3877_v28 = vsel %vm8976_vm2, %v3872_v41, %v3876_v42  ;;  %v4660_v5 = vrot.slane %v4557_v8, 5  ;;  %v4561_v38 = vld [vmem:[#allocation2 + $0x30] sm:$0xe]  ;;  %v8552_v17 = vld [vmem:[#allocation2 + $0x9c] sm:$0xff]   ;;  %v4563_v42 = vld [vmem:[#allocation2 + $0x38] sm:$0x1] }
 0x22b   : > { %8131 = vmatmul.mubr.bf16.gmra.mxu0 %v8545_v35  ;;  %8091 = vmatmul.mubr.bf16.gmra.mxu1 %v7438_v34  ;;  %v3895_v25 = vor.u32 %v3894_v49, %v3890_v44  ;;  %v3900_v11 = vrot.slane %v3898_v46, 5  ;;  %v9513_v19 = vsel %vm9301_vm13, %v7498_v0, %v4657_v36  ;;  %v4664_v24 = vrot.slane %v4559_v55, 5  ;;  %v3751_v34 = vld [vmem:[#allocation2 + $0x50] sm:$0x1]  ;;  %v4564_v0 = vld [vmem:[#allocation2 + $0x3c] sm:$0xe] }
 0x22c   : > { %8134 = vmatprep.mubr.bf16.mxu0 %v8547_v39  ;;  %8094 = vmatprep.mubr.bf16.mxu1 %v7439_v58  ;;  %v3886_v9 = vrot.slane %v3885_v52, 4  ;;  %v9517_v29 = vsel %vm9301_vm13, %v4659_v62, %v4660_v5  ;;  %v3903_v15 = vshrl.u32 %v3749_v3, 16  ;;  %v3906_v12 = vshll.u32 %v3749_v3, 16  ;;  %v8550_v35 = vld [vmem:[#allocation2 + $0x90] sm:$0xff]  }
 0x22d   : > { %v3896_v6 = vrot.slane %v3895_v25, 4  ;;  %v9519_v50 = vcombine.low %v3867_v61, %v3877_v28  ;;  %v7499_v10 = vrot.slane %v4558_v53, 9  ;;  %v4666_v63 = vrot.slane %v4664_v24, 4  ;;  %v4562_v39 = vld [vmem:[#allocation2 + $0x34] sm:$0xf] }
 0x22e   : > { %v4667_v58 = vrot.slane %v4560_v20, 5  ;;  %v3891_v23 = vsel %vm8976_vm2, %v3886_v9, %v3890_v44  ;;  %v3905_v45 = vrot.slane %v3903_v15, 4  ;;  %v3908_v26 = vrot.slane %v3906_v12, 5  ;;  %v4565_v44 = vld [vmem:[#allocation2 + $0x40] sm:$0xf] }
 0x22f   : > { %v3912_v57 = vshll.u32 %v3750_v2, 16  ;;  %v3901_v31 = vsel %vm8976_vm2, %v3896_v6, %v3900_v11  ;;  %v7514_v32 = vcombine.low %v9513_v19, %v9517_v29  ;;  %v3916_v48 = vshrl.u32 %v3750_v2, 16  ;;  %v3755_v28 = vld [vmem:[#allocation2 + $0x60] sm:$0xf]  ;;  %v4576_v29 = vld [vmem:[#allocation2 + $0x6c] sm:$0xe] }
 0x230   : > { %v9529_v1 = vsel %vm9301_vm13, %v4666_v63, %v4667_v58  ;;  %v3909_v40 = vor.u32 %v3908_v26, %v3905_v45  ;;  %v3922_v30 = vshll.u32 %v3751_v34, 16  ;;  %v3927_v37 = vshrl.u32 %v3752_v13, 16  ;;  %v8563_v34 = vld [vmem:[#allocation9 + $0x1b0] sm:$0xff]   ;;  %v8557_v63 = vld [vmem:[#allocation2 + $0xb4] sm:$0xff]  }
 0x231   : > { %v3914_v47 = vrot.slane %v3912_v57, 5  ;;  %v9533_v46 = vsel %vm9301_vm13, %v7499_v10, %v4664_v24  ;;  %v3918_v8 = vrot.slane %v3916_v48, 4  ;;  %v3930_v36 = vshll.u32 %v3752_v13, 16  ;;  %v4566_v24 = vld [vmem:[#allocation2 + $0x44] sm:$0x1] }
 0x232   : > { %v3936_v41 = vshll.u32 %v3753_v7, 16  ;;  %v9538_v49 = vcombine.low %v3891_v23, %v3901_v31  ;;  %v3910_v53 = vrot.slane %v3909_v40, 4  ;;  %v3929_v55 = vrot.slane %v3927_v37, 4  ;;  %v3756_v10 = vld [vmem:[#allocation2 + $0x64] sm:$0xf] }
 0x233   : > { %8135 = vmatmul.mubr.bf16.gmra.mxu0 %v8550_v35  ;;  %8095 = vmatmul.mubr.bf16.gmra.mxu1 %v7440_v18  ;;  %v3940_v52 = vshrl.u32 %v3753_v7, 16  ;;  %v7515_v62 = vcombine.low %v9533_v46, %v9529_v1  ;;  %v3919_v20 = vor.u32 %v3918_v8, %v3914_v47  ;;  %v3932_v3 = vrot.slane %v3930_v36, 5  ;;  %v3757_v26 = vld [vmem:[#allocation2 + $0x68] sm:$0x1]  ;;  %v3758_v35 = vld [vmem:[#allocation2 + $0x6c] sm:$0xf] }
 0x234   : > { %8138 = vmatprep.mubr.bf16.mxu0 %v8552_v17  ;;  %8162 = vmatprep.mubr.bf16.mxu1 %v9465_v54  ;;  %v9543_v61 = vrot.slane %v3936_v41, 5  ;;  %v3924_v25 = vrot.slane %v3922_v30, 5  ;;  %v3946_v16 = vshll.u32 %v3754_v27, 16  ;;  %v4671_v18 = vrot.slane %v4562_v39, 5  ;;  %v8555_v54 = vld [vmem:[#allocation2 + $0xa8] sm:$0xff]  }
 0x235   : > { %v3942_v43 = vrot.slane %v3940_v52, 4  ;;  %v3915_v5 = vsel %vm8976_vm2, %v3910_v53, %v3914_v47  ;;  %v3920_v2 = vrot.slane %v3919_v20, 4  ;;  %v3933_v9 = vor.u32 %v3932_v3, %v3929_v55  ;;  %v3759_v40 = vld [vmem:[#allocation2 + $0x70] sm:$0xf]  ;;  %v3760_v53 = vld [vmem:[#allocation2 + $0x74] sm:$0x1] }
 0x236   : > { %v7500_v11 = vrot.slane %v4561_v38, 9  ;;  %v4673_v6 = vrot.slane %v4671_v18, 4  ;;  %v4674_v15 = vrot.slane %v4563_v42, 5  ;;  %v4678_v12 = vrot.slane %v4565_v44, 5  ;;  %v4568_v3 = vld [vmem:[#allocation2 + $0x4c] sm:$0xf] }
 0x237   : > { %v3943_v13 = vor.u32 %v3942_v43, %v9543_v61  ;;  %v3925_v58 = vsel %vm8976_vm2, %v3920_v2, %v3924_v25  ;;  %v9550_v23 = vrot.slane %v3933_v9, 4  ;;  %v7501_v45 = vrot.slane %v4564_v0, 9 }
 0x238   : > { %v3951_v57 = vshrl.u32 %v3755_v28, 16  ;;  %v3948_v31 = vrot.slane %v3946_v16, 5  ;;  %v9554_v48 = vsel %vm9301_vm13, %v7500_v11, %v4671_v18  ;;  %v9558_v27 = vsel %vm9301_vm13, %v4673_v6, %v4674_v15  ;;  %v4567_v16 = vld [vmem:[#allocation2 + $0x48] sm:$0xe] }
 0x239   : > { %v3944_v7 = vrot.slane %v3943_v13, 4  ;;  %v9560_v47 = vcombine.low %v3915_v5, %v3925_v58  ;;  %v9564_v30 = vsel %vm9301_vm13, %v7501_v45, %v4678_v12  ;;  %v4680_v37 = vrot.slane %v4678_v12, 4  ;;  %v8565_v13 = vld [vmem:[#allocation9 + $0x1a0] sm:$0xff]  }
 0x23a   : > { %v4681_v38 = vrot.slane %v4566_v24, 5  ;;  %v3953_v39 = vrot.slane %v3951_v57, 4  ;;  %v3954_v17 = vshll.u32 %v3755_v28, 16  ;;  %v3960_v8 = vshll.u32 %v3756_v10, 16  ;;  %v4569_v24 = vld [vmem:[#allocation2 + $0x50] sm:$0x1] }
 0x23b   : > { %8139 = vmatmul.mubr.bf16.gmra.mxu0 %v8555_v54  ;;  %8163 = vmatmul.mubr.bf16.vlgmr.msra.gmra.mxu1 %v9479_v22  ;;  %v3964_v36 = vshrl.u32 %v3756_v10, 16  ;;  %v3939_v41 = vsel %vm8976_vm2, %v9550_v23, %v9543_v61  ;;  %v7516_v42 = vcombine.low %v9554_v48, %v9558_v27  ;;  %v3970_v44 = vshll.u32 %v3757_v26, 16  ;;  %v8564_v22 = vld [vmem:[#allocation9 + $0x1a8] sm:$0xff]   ;;  %v4571_v54 = vld [vmem:[#allocation2 + $0x58] sm:$0xf] }
 0x23c   : > { %8142 = vmatprep.mubr.bf16.mxu0 %v8557_v63  ;;  %8243 = vmatpush3.bf16.msra.mxu1 %v9430_v21  ;;  %v3975_v55 = vshrl.u32 %v3758_v35, 16  ;;  %v3949_v52 = vsel %vm8976_vm2, %v3944_v7, %v3948_v31  ;;  %v3956_v0 = vrot.slane %v3954_v17, 5  ;;  %v3962_v21 = vrot.slane %v3960_v8, 5  ;;  %v9581_v18 = vpop.f32.mrf.mxu1  ;;  %v4570_v63 = vld [vmem:[#allocation2 + $0x54] sm:$0xe] }
 0x23d   : > { %8166 = vmatprep.mubr.bf16.mxu1 %v9498_v56  ;;  %8244 = vmatprep.subr.bf16.mxu1 %v8563_v34  ;;  %v3966_v20 = vrot.slane %v3964_v36, 4  ;;  %v9579_v61 = vsel %vm9301_vm13, %v4680_v37, %v4681_v38  ;;  %v3978_v25 = vshll.u32 %v3758_v35, 16  ;;  %v3984_v43 = vshll.u32 %v3759_v40, 16  ;;  %v8560_v56 = vld [vmem:[#allocation2 + $0xc0] sm:$0xff]   ;;  %v3761_v58 = vld [vmem:[#allocation2 + $0x78] sm:$0xf] }
 0x23e   : > { %v3977_v28 = vrot.slane %v3975_v55, 4  ;;  %v3957_v5 = vor.u32 %v3956_v0, %v3953_v39  ;;  %v3988_v9 = vshrl.u32 %v3759_v40, 16  ;;  %v3994_v11 = vshll.u32 %v3760_v53, 16  ;;  %v9585_v23 = vpop.f32.mrf.mxu1  ;;  %v4572_v8 = vld [vmem:[#allocation2 + $0x5c] sm:$0x1] }
 0x23f   : > { %v3967_v2 = vor.u32 %v3966_v20, %v3962_v21  ;;  %v3972_v6 = vrot.slane %v3970_v44, 5  ;;  %v3980_v15 = vrot.slane %v3978_v25, 5  ;;  %v9583_v12 = vrot.slane %v3984_v43, 5  ;;  %v3762_v55 = vld [vmem:[#allocation2 + $0x7c] sm:$0xf] }
 0x240   : > { %8245 = vmatpush3.bf16.msra.mxu1 %v8563_v34  ;;  %v4685_v10 = vrot.slane %v4568_v3, 5  ;;  %v3958_v45 = vrot.slane %v3957_v5, 4  ;;  %v3990_v57 = vrot.slane %v3988_v9, 4  ;;  %v7502_v7 = vrot.slane %v4567_v16, 9  ;;  %v9595_v36 = vpop.f32.mrf.mxu1  ;;  %v3764_v20 = vld [vmem:[#allocation2 + $0x84] sm:$0xf] }
 0x241   : > { %8246 = vmatprep.subr.bf16.mxu1 %v8564_v22  ;;  %v3968_v26 = vrot.slane %v3967_v2, 4  ;;  %v9587_v31 = vcombine.low %v3939_v41, %v3949_v52  ;;  %v3981_v35 = vor.u32 %v3980_v15, %v3977_v28  ;;  %v4688_v34 = vrot.slane %v4569_v24, 5  ;;  %v3763_v52 = vld [vmem:[#allocation2 + $0x80] sm:$0x1]  ;;  %v3765_v16 = vld [vmem:[#allocation2 + $0x88] sm:$0xf] }
 0x242   : > { %v4687_v40 = vrot.slane %v4685_v10, 4  ;;  %v7517_v37 = vcombine.low %v9564_v30, %v9579_v61  ;;  %v3991_v39 = vor.u32 %v3990_v57, %v9583_v12  ;;  %v3996_v17 = vrot.slane %v3994_v11, 5  ;;  %v8567_v15 = vld [vmem:[#allocation9 + $0x190] sm:$0xff]   ;;  %v8575_v61 = vld [vmem:[#allocation9 + $0x1d8] sm:$0xff]  }
 0x243   : > { %8143 = vmatmul.mubr.bf16.gmra.mxu0 %v8560_v56  ;;  %8167 = vmatmul.mubr.bf16.gmra.mxu1 %v9519_v50  ;;  %v3973_v38 = vsel %vm8976_vm2, %v3968_v26, %v3972_v6  ;;  %v3982_v41 = vrot.slane %v3981_v35, 4  ;;  %v9603_v50 = vsel %vm9301_vm13, %v7502_v7, %v4685_v10  ;;  %v4692_v53 = vrot.slane %v4571_v54, 5  ;;  %v3766_v56 = vld [vmem:[#allocation2 + $0x8c] sm:$0x1] }
 0x244   : > { %8210 = vmatprep.mubr.bf16.mxu0 %v7513_v51  ;;  %8170 = vmatprep.mubr.bf16.mxu1 %v9538_v49  ;;  %v9607_v44 = vsel %vm9301_vm13, %v4687_v40, %v4688_v34  ;;  %v3963_v0 = vsel %vm8976_vm2, %v3958_v45, %v3962_v21  ;;  %v3992_v60 = vrot.slane %v3991_v39, 4  ;;  %v7503_v4 = vrot.slane %v4570_v63, 9  ;;  %v8566_v51 = vld [vmem:[#allocation9 + $0x198] sm:$0xff]   ;;  %v9615_v21 = vpop.f32.mrf.mxu1  ;;  %v8569_v10 = vld [vmem:[#allocation9 + $0x1f0] sm:$0xff]   ;;  %v4573_v40 = vld [vmem:[#allocation2 + $0x60] sm:$0xe] }
 0x245   : > { %8247 = vmatpush3.bf16.msra.mxu1 %v8564_v22  ;;  %v3999_v49 = vshrl.u32 %v3761_v58, 16  ;;  %v9611_v3 = vcombine.low %v3963_v0, %v3973_v38  ;;  %v7518_v28 = vcombine.low %v9603_v50, %v9607_v44  ;;  %v4694_v25 = vrot.slane %v4692_v53, 4  ;;  %v4574_v34 = vld [vmem:[#allocation2 + $0x64] sm:$0xf]  ;;  %v3774_v50 = vld [vmem:[#allocation2 + $0xac] sm:$0xf] }
 0x246   : > { %8248 = vmatprep.subr.bf16.mxu1 %v8565_v13  ;;  %v4002_v43 = vshll.u32 %v3761_v58, 16  ;;  %v4695_v5 = vrot.slane %v4572_v8, 5  ;;  %v4008_v2 = vshll.u32 %v3762_v55, 16  ;;  %v4012_v9 = vshrl.u32 %v3762_v55, 16  ;;  %v4575_v8 = vld [vmem:[#allocation2 + $0x68] sm:$0x1] }
 0x247   : > { %v4001_v22 = vrot.slane %v3999_v49, 4  ;;  %v3987_v11 = vsel %vm8976_vm2, %v3982_v41, %v9583_v12  ;;  %v3997_v24 = vsel %vm8976_vm2, %v3992_v60, %v3996_v17  ;;  %v9624_v54 = vsel %vm9301_vm13, %v7503_v4, %v4692_v53  ;;  %v4577_v4 = vld [vmem:[#allocation2 + $0x70] sm:$0xf] }
 0x248   : > { %v4004_v6 = vrot.slane %v4002_v43, 5  ;;  %v4010_v63 = vrot.slane %v4008_v2, 5  ;;  %v4014_v58 = vrot.slane %v4012_v9, 4  ;;  %v4018_v45 = vshll.u32 %v3763_v52, 16  ;;  %v3767_v49 = vld [vmem:[#allocation2 + $0x90] sm:$0xf] }
 0x249   : > { %8249 = vmatpush3.bf16.msra.mxu1 %v8565_v13  ;;  %v4023_v26 = vshrl.u32 %v3764_v20, 16  ;;  %v9628_v57 = vsel %vm9301_vm13, %v4694_v25, %v4695_v5  ;;  %v4026_v7 = vshll.u32 %v3764_v20, 16  ;;  %v4032_v35 = vshll.u32 %v3765_v16, 16  ;;  %v9634_v41 = vpop.f32.mrf.mxu1  ;;  %v8570_v20 = vld [vmem:[#allocation9 + $0x188] sm:$0xff]  }
 0x24a   : > { %8250 = vmatprep.subr.bf16.mxu1 %v8566_v51  ;;  %v4005_v12 = vor.u32 %v4004_v6, %v4001_v22  ;;  %v4015_v13 = vor.u32 %v4014_v58, %v4010_v63  ;;  %v4036_v39 = vshrl.u32 %v3765_v16, 16  ;;  %v4042_v17 = vshll.u32 %v3766_v56, 16  ;;  %v8571_v25 = vld [vmem:[#allocation9 + $0x1e8] sm:$0xff]  }
 0x24b   : > { %8211 = vmatmul.mubr.bf16.vlgmr.msra.gmra.mxu0 %v7514_v32  ;;  %8171 = vmatmul.mubr.bf16.gmra.mxu1 %v9560_v47  ;;  %v4025_v38 = vrot.slane %v4023_v26, 4  ;;  %v7481_v53 = vcombine.low %v3987_v11, %v3997_v24  ;;  %v4028_v52 = vrot.slane %v4026_v7, 5  ;;  %v9640_v19 = vrot.slane %v4032_v35, 5  ;;  %v9650_v5 = vpop.f32.mrf.mxu1  ;;  %v3768_v24 = vld [vmem:[#allocation2 + $0x94] sm:$0xf]  ;;  %v8573_v7 = vld [vmem:[#allocation9 + $0x180] sm:$0xff]  }
 0x24c   : > { %8214 = vmatprep.mubr.bf16.mxu0 %v7515_v62  ;;  %8174 = vmatprep.mubr.bf16.mxu1 %v9587_v31  ;;  %v4006_v55 = vrot.slane %v4005_v12, 4  ;;  %v4016_v32 = vrot.slane %v4015_v13, 4  ;;  %v4020_v47 = vrot.slane %v4018_v45, 5  ;;  %v4038_v0 = vrot.slane %v4036_v39, 4  ;;  %v8572_v12 = vld [vmem:[#allocation9 + $0x1e0] sm:$0xff]  }
 0x24d   : > { %8251 = vmatpush3.bf16.msra.mxu1 %v8566_v51  ;;  %v4699_v60 = vrot.slane %v4574_v34, 5  ;;  %8291 = vmatpush3.bf16.msra.mxu0 %v9494_v33  ;;  %v7519_v1 = vcombine.low %v9624_v54, %v9628_v57  ;;  %v4029_v46 = vor.u32 %v4028_v52, %v4025_v38  ;;  %v9645_v62 = vrot.slane %v4042_v17, 5  ;;  %v4578_v33 = vld [vmem:[#allocation2 + $0x74] sm:$0x1]  ;;  %v3769_v13 = vld [vmem:[#allocation2 + $0x98] sm:$0x1] }
 0x24e   : > { %v7504_v31 = vrot.slane %v4573_v40, 9  ;;  %8252 = vmatprep.subr.bf16.mxu1 %v8567_v15  ;;  %8292 = vmatprep.subr.bf16.mxu0 %v8569_v10  ;;  %v4021_v51 = vsel %vm8976_vm2, %v4016_v32, %v4020_v47  ;;  %v4039_v43 = vor.u32 %v4038_v0, %v9640_v19  ;;  %v4702_v56 = vrot.slane %v4575_v8, 5  ;;  %v3770_v38 = vld [vmem:[#allocation2 + $0x9c] sm:$0xf]  ;;  %v3771_v8 = vld [vmem:[#allocation2 + $0xa0] sm:$0xf] }
 0x24f   : > { %v4701_v16 = vrot.slane %v4699_v60, 4  ;;  %v4011_v22 = vsel %vm8976_vm2, %v4006_v55, %v4010_v63  ;;  %v4030_v2 = vrot.slane %v4029_v46, 4  ;;  %v7505_v9 = vrot.slane %v4576_v29, 9  ;;  %v9671_v55 = vpop.f32.mrf.mxu1  ;;  %v3772_v52 = vld [vmem:[#allocation2 + $0xa4] sm:$0x1] }
 0x250   : > { %v4706_v11 = vrot.slane %v4577_v4, 5  ;;  %v4040_v6 = vrot.slane %v4039_v43, 4  ;;  %v4047_v45 = vshrl.u32 %v3767_v49, 16  ;;  %v4050_v26 = vshll.u32 %v3767_v49, 16  ;;  %v9691_v4 = vld [vmem:[#allocation9 + $0x238] sm:$0xff]  }
 0x251   : > { %v9656_v58 = vsel %vm9301_vm13, %v4701_v16, %v4702_v56  ;;  %8253 = vmatpush3.bf16.msra.mxu1 %v8567_v15  ;;  %8293 = vmatpush3.bf16.msra.mxu0 %v8569_v10  ;;  %v9658_v35 = vcombine.low %v4011_v22, %v4021_v51  ;;  %v9662_v63 = vsel %vm9301_vm13, %v7504_v31, %v4699_v60  ;;  %v4709_v34 = vrot.slane %v4578_v33, 5  ;;  %v4580_v60 = vld [vmem:[#allocation2 + $0x7c] sm:$0xf]  ;;  %v4579_v51 = vld [vmem:[#allocation2 + $0x78] sm:$0xe] }
 0x252   : > { %v4708_v40 = vrot.slane %v4706_v11, 4  ;;  %8254 = vmatprep.subr.bf16.mxu1 %v8570_v20  ;;  %8294 = vmatprep.subr.bf16.mxu0 %v8571_v25  ;;  %v4035_v15 = vsel %vm8976_vm2, %v4030_v2, %v9640_v19  ;;  %v4049_v10 = vrot.slane %v4047_v45, 4  ;;  %v4052_v39 = vrot.slane %v4050_v26, 5  ;;  %v4581_v33 = vld [vmem:[#allocation2 + $0x80] sm:$0x1]  ;;  %v8576_v45 = vld [vmem:[#allocation9 + $0x1d0] sm:$0xff]  }
 0x253   : > { %8215 = vmatmul.mubr.bf16.gmra.mxu0 %v7516_v42  ;;  %8175 = vmatmul.mubr.bf16.gmra.mxu1 %v9611_v3  ;;  %v4056_v17 = vshll.u32 %v3768_v24, 16  ;;  %v4045_v48 = vsel %vm8976_vm2, %v4040_v6, %v9645_v62  ;;  %v7520_v27 = vcombine.low %v9662_v63, %v9656_v58  ;;  %v9683_v42 = vsel %vm9301_vm13, %v7505_v9, %v4706_v11  ;;  %v4583_v22 = vld [vmem:[#allocation2 + $0x88] sm:$0xf] }
 0x254   : > { %8218 = vmatprep.mubr.bf16.mxu0 %v7517_v37  ;;  %8178 = vmatprep.mubr.bf16.mxu1 %v7481_v53  ;;  %v4060_v3 = vshrl.u32 %v3768_v24, 16  ;;  %v4053_v19 = vor.u32 %v4052_v39, %v4049_v10  ;;  %v4066_v32 = vshll.u32 %v3769_v13, 16  ;;  %v4071_v30 = vshrl.u32 %v3770_v38, 16  ;;  %v3773_v6 = vld [vmem:[#allocation2 + $0xa8] sm:$0xf] }
 0x255   : > { %v9685_v29 = vrot.slane %v4056_v17, 5  ;;  %8255 = vmatpush3.bf16.msra.mxu1 %v8570_v20  ;;  %8295 = vmatpush3.bf16.msra.mxu0 %v8571_v25  ;;  %v9689_v37 = vsel %vm9301_vm13, %v4708_v40, %v4709_v34  ;;  %v4074_v47 = vshll.u32 %v3770_v38, 16  ;;  %v4080_v0 = vshll.u32 %v3771_v8, 16  ;;  %v9693_v20 = vpop.f32.mrf.mxu1  ;;  %v4582_v38 = vld [vmem:[#allocation2 + $0x84] sm:$0xe] }
 0x256   : > { %v4062_v53 = vrot.slane %v4060_v3, 4  ;;  %8296 = vmatprep.subr.bf16.mxu0 %v8572_v12  ;;  %8256 = vmatprep.subr.bf16.mxu1 %v8573_v7  ;;  %v4054_v46 = vrot.slane %v4053_v19, 4  ;;  %v4073_v62 = vrot.slane %v4071_v30, 4  ;;  %v4084_v31 = vshrl.u32 %v3771_v8, 16 }
 0x257   : > { %v4090_v49 = vshll.u32 %v3772_v52, 16  ;;  %v7483_v25 = vcombine.low %v4035_v15, %v4045_v48  ;;  %v4076_v16 = vrot.slane %v4074_v47, 5  ;;  %v4082_v56 = vrot.slane %v4080_v0, 5  ;;  %v4584_v15 = vld [vmem:[#allocation2 + $0x8c] sm:$0x1]  ;;  %v9706_v17 = vpop.f32.mrf.mxu1 }
 0x258   : > { %v4063_v43 = vor.u32 %v4062_v53, %v9685_v29  ;;  %v7521_v2 = vcombine.low %v9683_v42, %v9689_v37  ;;  %v4068_v9 = vrot.slane %v4066_v32, 5  ;;  %v4086_v11 = vrot.slane %v4084_v31, 4  ;;  %v8580_v53 = vld [vmem:[#allocation9 + $0x1c8] sm:$0xff]  }
 0x259   : > { %v4713_v24 = vrot.slane %v4580_v60, 5  ;;  %8297 = vmatpush3.bf16.msra.mxu0 %v8572_v12  ;;  %8257 = vmatpush3.bf16.msra.mxu1 %v8573_v7  ;;  %v4059_v26 = vsel %vm8976_vm2, %v4054_v46, %v9685_v29  ;;  %v4077_v34 = vor.u32 %v4076_v16, %v4073_v62  ;;  %v7506_v13 = vrot.slane %v4579_v51, 9  ;;  %v3776_v29 = vld [vmem:[#allocation2 + $0xb4] sm:$0xf]  ;;  %v3777_v62 = vld [vmem:[#allocation2 + $0xb8] sm:$0xf]  ;;  %v9721_v31 = vpop.f32.mrf.mxu1 }
 0x25a   : > { %v4064_v40 = vrot.slane %v4063_v43, 4  ;;  %8298 = vmatprep.subr.bf16.mxu0 %v8575_v61  ;;  %8338 = vmatprep.subr.bf16.mxu1 %v9691_v4  ;;  %v4087_v12 = vor.u32 %v4086_v11, %v4082_v56  ;;  %v4092_v7 = vrot.slane %v4090_v49, 5  ;;  %v4716_v10 = vrot.slane %v4581_v33, 5 }
 0x25b   : > { %8219 = vmatmul.mubr.bf16.gmra.mxu0 %v7518_v28  ;;  %8179 = vmatmul.mubr.bf16.gmra.mxu1 %v9658_v35  ;;  %v4720_v39 = vrot.slane %v4583_v22, 5  ;;  %v4078_v48 = vrot.slane %v4077_v34, 4  ;;  %v4715_v3 = vrot.slane %v4713_v24, 4  ;;  %v4095_v44 = vshrl.u32 %v3773_v6, 16 }
 0x25c   : > { %8222 = vmatprep.mubr.bf16.mxu0 %v7519_v1  ;;  %8182 = vmatprep.mubr.bf16.mxu1 %v7483_v25  ;;  %v4069_v8 = vsel %vm8976_vm2, %v4064_v40, %v4068_v9  ;;  %v4088_v28 = vrot.slane %v4087_v12, 4  ;;  %v9715_v35 = vsel %vm9301_vm13, %v7506_v13, %v4713_v24  ;;  %v7507_v52 = vrot.slane %v4582_v38, 9  ;;  %v3775_v1 = vld [vmem:[#allocation2 + $0xb0] sm:$0x1]  ;;  %v3778_v25 = vld [vmem:[#allocation2 + $0xbc] sm:$0x1] }
 0x25d   : > { %v4723_v19 = vrot.slane %v4584_v15, 5  ;;  %8299 = vmatpush3.bf16.msra.mxu0 %v8575_v61  ;;  %v7484_v32 = vcombine.low %v4059_v26, %v4069_v8  ;;  %v4083_v54 = vsel %vm8976_vm2, %v4078_v48, %v4082_v56  ;;  %v4722_v57 = vrot.slane %v4720_v39, 4  ;;  %v9731_v9 = vld [vmem:[#allocation2 + $0x94] sm:$0xf]  ;;  %v8581_v40 = vld [vmem:[#allocation9 + $0x1c0] sm:$0xff]  }
 0x25e   : > { %v4097_v30 = vrot.slane %v4095_v44, 4  ;;  %8300 = vmatprep.subr.bf16.mxu0 %v8576_v45  ;;  %v4093_v47 = vsel %vm8976_vm2, %v4088_v28, %v4092_v7  ;;  %v4098_v0 = vshll.u32 %v3773_v6, 16  ;;  %v4104_v60 = vshll.u32 %v3774_v50, 16  ;;  %v4585_v12 = vld [vmem:[#allocation2 + $0x90] sm:$0xe]  ;;  %v9740_v7 = vpop.f32.mrf.mxu1 }
 0x25f   : > { %v4108_v46 = vshrl.u32 %v3774_v50, 16  ;;  %v7485_v49 = vcombine.low %v4083_v54, %v4093_v47  ;;  %v9725_v61 = vsel %vm9301_vm13, %v4715_v3, %v4716_v10  ;;  %v9729_v51 = vsel %vm9301_vm13, %v7507_v52, %v4720_v39  ;;  %v4589_v44 = vld [vmem:[#allocation2 + $0xa0] sm:$0xf]  ;;  %v4590_v54 = vld [vmem:[#allocation2 + $0xa4] sm:$0x1] }
 0x260   : > { %v4119_v43 = vshrl.u32 %v3776_v29, 16  ;;  %v4100_v16 = vrot.slane %v4098_v0, 5  ;;  %v4106_v56 = vrot.slane %v4104_v60, 5  ;;  %v4114_v22 = vshll.u32 %v3775_v1, 16  ;;  %v3779_v52 = vld [vmem:[#allocation2 + $0xc0] sm:$0xf] }
 0x261   : > { %v4110_v33 = vrot.slane %v4108_v46, 4  ;;  %8301 = vmatpush3.bf16.msra.mxu0 %v8576_v45  ;;  %v9735_v11 = vsel %vm9301_vm13, %v4722_v57, %v4723_v19  ;;  %v4122_v6 = vshll.u32 %v3776_v29, 16  ;;  %v4128_v26 = vshll.u32 %v3777_v62, 16  ;;  %v4587_v45 = vld [vmem:[#allocation2 + $0x98] sm:$0x1]  ;;  %v9752_v57 = vpop.f32.mrf.mxu1 }
 0x262   : > { %v4121_v24 = vrot.slane %v4119_v43, 4  ;;  %8302 = vmatprep.subr.bf16.mxu0 %v8580_v53  ;;  %v4101_v34 = vor.u32 %v4100_v16, %v4097_v30  ;;  %v4132_v38 = vshrl.u32 %v3777_v62, 16  ;;  %v4138_v15 = vshll.u32 %v3778_v25, 16  ;;  %v3780_v0 = vld [vmem:[#allocation2 + $0xc4] sm:$0xf] }
 0x263   : > { %8223 = vmatmul.mubr.bf16.gmra.mxu0 %v7520_v27  ;;  %8183 = vmatmul.mubr.bf16.gmra.mxu1 %v7484_v32  ;;  %v4111_v13 = vor.u32 %v4110_v33, %v4106_v56  ;;  %v7522_v10 = vcombine.low %v9715_v35, %v9725_v61  ;;  %v4124_v39 = vrot.slane %v4122_v6, 5  ;;  %v4130_v58 = vrot.slane %v4128_v26, 5  ;;  %v4588_v27 = vld [vmem:[#allocation2 + $0x9c] sm:$0xe]  ;;  %v4591_v33 = vld [vmem:[#allocation2 + $0xa8] sm:$0xe]  ;;  %v9762_v6 = vpop.f32.mrf.mxu1 }
 0x264   : > { %8226 = vmatprep.mubr.bf16.mxu0 %v7521_v2  ;;  %8186 = vmatprep.mubr.bf16.mxu1 %v7485_v49  ;;  %v4727_v63 = vrot.slane %v9731_v9, 5  ;;  %v4102_v8 = vrot.slane %v4101_v34, 4  ;;  %v4116_v3 = vrot.slane %v4114_v22, 5  ;;  %v4134_v50 = vrot.slane %v4132_v38, 4  ;;  %v3781_v49 = vld [vmem:[#allocation2 + $0xc8] sm:$0x1] }
 0x265   : > { %v4112_v48 = vrot.slane %v4111_v13, 4  ;;  %8303 = vmatpush3.bf16.msra.mxu0 %v8580_v53  ;;  %v7523_v28 = vcombine.low %v9729_v51, %v9735_v11  ;;  %v4125_v42 = vor.u32 %v4124_v39, %v4121_v24  ;;  %v7508_v37 = vrot.slane %v4585_v12, 9  ;;  %v4592_v24 = vld [vmem:[#allocation2 + $0xac] sm:$0xf]  ;;  %v4593_v38 = vld [vmem:[#allocation2 + $0xb0] sm:$0x1]  ;;  %v8020_v12 = vpop.f32.mrf.mxu0 }
 0x266   : > { %v4729_v2 = vrot.slane %v4727_v63, 4  ;;  %8304 = vmatprep.subr.bf16.mxu0 %v8581_v40  ;;  %v4135_v19 = vor.u32 %v4134_v50, %v4130_v58  ;;  %v4140_v29 = vrot.slane %v4138_v15, 5  ;;  %v4730_v32 = vrot.slane %v4587_v45, 5  ;;  %v4595_v15 = vld [vmem:[#allocation2 + $0xb8] sm:$0xf] }
 0x267   : > { %v4117_v35 = vsel %vm8976_vm2, %v4112_v48, %v4116_v3  ;;  %v4107_v1 = vsel %vm8976_vm2, %v4102_v8, %v4106_v56  ;;  %v4126_v30 = vrot.slane %v4125_v42, 4  ;;  %v7509_v53 = vrot.slane %v4588_v27, 9  ;;  %v4594_v27 = vld [vmem:[#allocation2 + $0xb4] sm:$0xe]  ;;  %v4596_v8 = vld [vmem:[#allocation2 + $0xbc] sm:$0x1] }
 0x268   : > { %v4734_v47 = vrot.slane %v4589_v44, 5  ;;  %v7486_v60 = vcombine.low %v4107_v1, %v4117_v35  ;;  %v4136_v46 = vrot.slane %v4135_v19, 4  ;;  %v4731_v62 = vsel %vm9301_vm13, %v4729_v2, %v4730_v32  ;;  %v4598_v42 = vld [vmem:[#allocation2 + $0xc4] sm:$0xf] }
 0x269   : > { %v4143_v61 = vshrl.u32 %v3779_v52, 16  ;;  %8305 = vmatpush3.bf16.msra.mxu0 %v8581_v40  ;;  %v4131_v51 = vsel %vm8976_vm2, %v4126_v30, %v4130_v58  ;;  %v4737_v43 = vrot.slane %v4590_v54, 5  ;;  %v4146_v16 = vshll.u32 %v3779_v52, 16  ;;  %v9772_v30 = vpop.f32.mrf.mxu0 }
 0x26a   : > { %v4736_v25 = vrot.slane %v4734_v47, 4  ;;  %v4141_v56 = vsel %vm8976_vm2, %v4136_v46, %v4140_v29  ;;  %v4152_v9 = vshll.u32 %v3780_v0, 16  ;;  %v4156_v11 = vshrl.u32 %v3780_v0, 16  ;;  %v5597_v29 = vld [vmem:[#allocation2 + $0x18] sm:$0xf] }
 0x26b   : > { %8227 = vmatmul.mubr.bf16.gmra.mxu0 %v7522_v10  ;;  %8187 = vmatmul.mubr.bf16.gmra.mxu1 %v7486_v60  ;;  %v4145_v22 = vrot.slane %v4143_v61, 4  ;;  %v7487_v26 = vcombine.low %v4131_v51, %v4141_v56  ;;  %v4148_v34 = vrot.slane %v4146_v16, 5  ;;  %v4162_v13 = vshll.u32 %v3781_v49, 16  ;;  %v9774_v60 = vld [vmem:[#allocation2 + $0xc8] sm:$0x1] }
 0x26c   : > { %8230 = vmatprep.mubr.bf16.mxu0 %v7523_v28  ;;  %v4738_v40 = vsel %vm9301_vm13, %v4736_v25, %v4737_v43  ;;  %v4728_v45 = vsel %vm9301_vm13, %v7508_v37, %v4727_v63  ;;  %v4735_v10 = vsel %vm9301_vm13, %v7509_v53, %v4734_v47  ;;  %v4154_v39 = vrot.slane %v4152_v9, 5  ;;  %v4597_v28 = vld [vmem:[#allocation2 + $0xc0] sm:$0xe]  ;;  %v9770_v63 = vpop.f32.mrf.mxu1  ;;  %v5598_v51 = vld [vmem:[#allocation2 + $0x1c] sm:$0xf] }
 0x26d   : > { %v4158_v58 = vrot.slane %v4156_v11, 4  ;;  %8190 = vmatprep.mubr.bf16.mxu1 %v7487_v26  ;;  %v7524_v48 = vcombine.low %v4728_v45, %v4731_v62  ;;  %v7525_v3 = vcombine.low %v4735_v10, %v4738_v40  ;;  %v4149_v50 = vor.u32 %v4148_v34, %v4145_v22  ;;  %v5600_v22 = vld [vmem:[#allocation2 + $0x24] sm:$0xf]  ;;  %v8574_v26 = vld [vmem:[#allocation2 + $0x18] sm:$0xff]  }
 0x26e   : > { %v4741_v44 = vrot.slane %v4592_v24, 5  ;;  %v4164_v52 = vrot.slane %v4162_v13, 5  ;;  %v7510_v35 = vrot.slane %v4591_v33, 9  ;;  %v4748_v19 = vrot.slane %v4595_v15, 5  ;;  %v9788_v9 = vpop.f32.mrf.mxu1  ;;  %v5599_v13 = vld [vmem:[#allocation2 + $0x20] sm:$0x1] }
 0x26f   : > { %v4159_v2 = vor.u32 %v4158_v58, %v4154_v39  ;;  %v4150_v37 = vrot.slane %v4149_v50, 4  ;;  %v4744_v54 = vrot.slane %v4593_v38, 5  ;;  %v7511_v1 = vrot.slane %v4594_v27, 9  ;;  %v9795_v38 = vpop.f32.mrf.mxu0  ;;  %v5601_v58 = vld [vmem:[#allocation2 + $0x28] sm:$0xf] }
 0x270   : > { %v4743_v32 = vrot.slane %v4741_v44, 4  ;;  %v4750_v47 = vrot.slane %v4748_v19, 4  ;;  %v4751_v0 = vrot.slane %v4596_v8, 5  ;;  %v4755_v46 = vrot.slane %v4598_v42, 5 }
 0x271   : > { %v4160_v53 = vrot.slane %v4159_v2, 4  ;;  %v4742_v62 = vsel %vm9301_vm13, %v7510_v35, %v4741_v44  ;;  %v7512_v61 = vrot.slane %v4597_v28, 9  ;;  %v5646_v25 = vshrl.u32 %v5597_v29, 16  ;;  %v9800_v35 = vpop.f32.mrf.mxu1 }
 0x272   : > { %v4745_v49 = vsel %vm9301_vm13, %v4743_v32, %v4744_v54  ;;  %v4155_v43 = vsel %vm8976_vm2, %v4150_v37, %v4154_v39  ;;  %v4749_v33 = vsel %vm9301_vm13, %v7511_v1, %v4748_v19  ;;  %v4752_v56 = vsel %vm9301_vm13, %v4750_v47, %v4751_v0  ;;  %v9802_v54 = vpop.f32.mrf.mxu0  ;;  %v5604_v47 = vld [vmem:[#allocation2 + $0x34] sm:$0xf] }
 0x273   : > { %8231 = vmatmul.mubr.bf16.gmra.mxu0 %v7524_v48  ;;  %v4165_v16 = vsel %vm8976_vm2, %v4160_v53, %v4164_v52  ;;  %v7526_v24 = vcombine.low %v4742_v62, %v4745_v49  ;;  %v9792_v40 = vsel %vm9301_vm13, %v7512_v61, %v4755_v46  ;;  %v4758_v34 = vrot.slane %v9774_v60, 5  ;;  %v5602_v48 = vld [vmem:[#allocation2 + $0x2c] sm:$0x1]  ;;  %v5603_v52 = vld [vmem:[#allocation2 + $0x30] sm:$0xf]  ;;  %v8578_v61 = vld [vmem:[#allocation2 + $0x24] sm:$0xff]  }
 0x274   : > { %8234 = vmatprep.mubr.bf16.mxu0 %v7525_v3  ;;  %v7488_v11 = vcombine.low %v4155_v43, %v4165_v16  ;;  %v5648_v15 = vrot.slane %v5646_v25, 4  ;;  %v5649_v45 = vshll.u32 %v5597_v29, 16  ;;  %v5655_v10 = vshll.u32 %v5598_v51, 16  ;;  %v9804_v16 = vpop.f32.mrf.mxu1 }
 0x275   : > { %v5659_v39 = vshrl.u32 %v5598_v51, 16  ;;  %v7527_v27 = vcombine.low %v4749_v33, %v4752_v56  ;;  %v9798_v8 = vadd.f32 %v8020_v12, %v9581_v18  ;;  %v5670_v3 = vshrl.u32 %v5600_v22, 16  ;;  %v8582_v56 = vld [vmem:[#allocation9 + $0x230] sm:$0xff]  }
 0x276   : > { %8191 = vmatmul.mubr.bf16.gmra.mxu1 %v7488_v11  ;;  %v5673_v50 = vshll.u32 %v5600_v22, 16  ;;  %v5651_v44 = vrot.slane %v5649_v45, 5  ;;  %v5657_v28 = vrot.slane %v5655_v10, 5  ;;  %v5665_v2 = vshll.u32 %v5599_v13, 16  ;;  %v5605_v22 = vld [vmem:[#allocation2 + $0x38] sm:$0x1] }
 0x277   : > { %8258 = vmatprep.mubr.bf16.mxu1 %v8574_v26  ;;  %v5661_v42 = vrot.slane %v5659_v39, 4  ;;  %v4757_v19 = vrot.slane %v4755_v46, 4  ;;  %v5672_v29 = vrot.slane %v5670_v3, 4  ;;  %v5679_v32 = vshll.u32 %v5601_v58, 16  ;;  %v8579_v45 = vld [vmem:[#allocation2 + $0x30] sm:$0xff]  }
 0x278   : > { %v5675_v37 = vrot.slane %v5673_v50, 5  ;;  %v5652_v1 = vor.u32 %v5651_v44, %v5648_v15  ;;  %v5683_v12 = vshrl.u32 %v5601_v58, 16  ;;  %v5689_v53 = vshll.u32 %v5602_v48, 16  ;;  %v8024_v15 = vpop.f32.mrf.mxu0  ;;  %v5606_v50 = vld [vmem:[#allocation2 + $0x3c] sm:$0xf] }
 0x279   : > { %v5662_v18 = vor.u32 %v5661_v42, %v5657_v28  ;;  %v5681_v60 = vrot.slane %v5679_v32, 5  ;;  %v5694_v62 = vshrl.u32 %v5603_v52, 16  ;;  %v5697_v49 = vshll.u32 %v5603_v52, 16 }
 0x27a   : > { %v5676_v0 = vor.u32 %v5675_v37, %v5672_v29  ;;  %v5653_v51 = vrot.slane %v5652_v1, 4  ;;  %v5667_v43 = vrot.slane %v5665_v2, 5  ;;  %v5685_v46 = vrot.slane %v5683_v12, 4  ;;  %v9819_v29 = vpop.f32.mrf.mxu1 }
 0x27b   : > { %8235 = vmatmul.mubr.bf16.gmra.mxu0 %v7526_v24  ;;  %v5663_v25 = vrot.slane %v5662_v18, 4  ;;  %v4759_v33 = vsel %vm9301_vm13, %v4757_v19, %v4758_v34  ;;  %v5696_v11 = vrot.slane %v5694_v62, 4  ;;  %v5699_v26 = vrot.slane %v5697_v49, 5  ;;  %v5607_v19 = vld [vmem:[#allocation2 + $0x40] sm:$0xf]  ;;  %v2512_v18 = vpop.f32.mrf.mxu0 }
 0x27c   : > { %8238 = vmatprep.mubr.bf16.mxu0 %v7527_v27  ;;  %v5703_v13 = vshll.u32 %v5604_v47, 16  ;;  %v5686_v10 = vor.u32 %v5685_v46, %v5681_v60  ;;  %v5691_v39 = vrot.slane %v5689_v53, 5  ;;  %v5707_v58 = vshrl.u32 %v5604_v47, 16  ;;  %v5608_v53 = vld [vmem:[#allocation2 + $0x44] sm:$0x1]  ;;  %v8588_v46 = vld [vmem:[#allocation9 + $0x220] sm:$0xff]  }
 0x27d   : > { %v5668_v24 = vsel %vm8976_vm2, %v5663_v25, %v5667_v43  ;;  %v5658_v27 = vsel %vm8976_vm2, %v5653_v51, %v5657_v28  ;;  %v5677_v48 = vrot.slane %v5676_v0, 4  ;;  %v5700_v3 = vor.u32 %v5699_v26, %v5696_v11  ;;  %v5610_v49 = vld [vmem:[#allocation2 + $0x4c] sm:$0xf]  ;;  %v5611_v26 = vld [vmem:[#allocation2 + $0x50] sm:$0x1] }
 0x27e   : > { %8259 = vmatmul.mubr.bf16.vlgmr.msra.gmra.mxu1 %v8578_v61  ;;  %v9812_v34 = vrot.slane %v5703_v13, 5  ;;  %v5687_v44 = vrot.slane %v5686_v10, 4  ;;  %v5709_v42 = vrot.slane %v5707_v58, 4  ;;  %v5713_v2 = vshll.u32 %v5605_v22, 16 }
 0x27f   : > { %8339 = vmatpush3.bf16.msra.mxu1 %v9691_v4  ;;  %8262 = vmatprep.mubr.bf16.mxu1 %v8579_v45  ;;  %v9817_v52 = vadd.f32 %v9772_v30, %v9585_v23  ;;  %v7528_v28 = vcombine.low %v9792_v40, %v4759_v33  ;;  %v7561_v37 = vcombine.low %v5658_v27, %v5668_v24  ;;  %v8585_v4 = vld [vmem:[#allocation9 + $0x228] sm:$0xff]   ;;  %v5701_v30 = vrot.slane %v5700_v3, 4  ;;  %v5609_v40 = vld [vmem:[#allocation2 + $0x48] sm:$0xf]  ;;  %v9834_v33 = vpop.f32.mrf.mxu1 }
 0x280   : > { %8340 = vmatprep.subr.bf16.mxu1 %v8582_v56  ;;  %v9824_v32 = vadd.f32 %v9795_v38, %v9595_v36  ;;  %v9827_v1 = vadd.f32 %v8024_v15, %v9634_v41  ;;  %v5692_v23 = vsel %vm8976_vm2, %v5687_v44, %v5691_v39  ;;  %v5710_v12 = vor.u32 %v5709_v42, %v9812_v34  ;;  %v8583_v41 = vld [vmem:[#allocation2 + $0x3c] sm:$0xff]   ;;  %v8025_v15 = vpop.f32.mrf.mxu0  ;;  %v8584_v45 = vld [vmem:[#allocation2 + $0x48] sm:$0xff]  }
 0x281   : > { %v5718_v47 = vshrl.u32 %v5606_v50, 16  ;;  %v5682_v0 = vsel %vm8976_vm2, %v5677_v48, %v5681_v60  ;;  %v5715_v62 = vrot.slane %v5713_v2, 5  ;;  %v5721_v36 = vshll.u32 %v5606_v50, 16 }
 0x282   : > { %v5727_v38 = vshll.u32 %v5607_v19, 16  ;;  %v7562_v61 = vcombine.low %v5682_v0, %v5692_v23  ;;  %v5711_v51 = vrot.slane %v5710_v12, 4  ;;  %v5731_v43 = vshrl.u32 %v5607_v19, 16  ;;  %v5612_v19 = vld [vmem:[#allocation2 + $0x54] sm:$0xf]  ;;  %v9851_v12 = vpop.f32.mrf.mxu0 }
 0x283   : > { %8239 = vmatmul.mubr.bf16.gmra.mxu0 %v7528_v28  ;;  %8341 = vmatpush3.bf16.msra.mxu1 %v8582_v56  ;;  %v5720_v25 = vrot.slane %v5718_v47, 4  ;;  %v5723_v22 = vrot.slane %v5721_v36, 5  ;;  %v5742_v60 = vshrl.u32 %v5609_v40, 16  ;;  %v5745_v13 = vshll.u32 %v5609_v40, 16  ;;  %v9843_v28 = vpop.f32.mrf.mxu1  ;;  %v8586_v36 = vld [vmem:[#allocation2 + $0x54] sm:$0xff]  }
 0x284   : > { %8306 = vmatprep.mubr.bf16.mxu0 %v7561_v37  ;;  %8342 = vmatprep.subr.bf16.mxu1 %v8585_v4  ;;  %v5729_v11 = vrot.slane %v5727_v38, 5  ;;  %v5706_v56 = vsel %vm8976_vm2, %v5701_v30, %v9812_v34  ;;  %v5733_v24 = vrot.slane %v5731_v43, 4  ;;  %v5737_v10 = vshll.u32 %v5608_v53, 16  ;;  %v8591_v53 = vld [vmem:[#allocation9 + $0x218] sm:$0xff]  }
 0x285   : > { %v5751_v39 = vshll.u32 %v5610_v49, 16  ;;  %v5716_v58 = vsel %vm8976_vm2, %v5711_v51, %v5715_v62  ;;  %v5724_v27 = vor.u32 %v5723_v22, %v5720_v25  ;;  %v5744_v48 = vrot.slane %v5742_v60, 4  ;;  %v5614_v51 = vld [vmem:[#allocation2 + $0x5c] sm:$0x1]  ;;  %v5615_v22 = vld [vmem:[#allocation2 + $0x60] sm:$0xf] }
 0x286   : > { %8263 = vmatmul.mubr.bf16.gmra.mxu1 %v8583_v41  ;;  %v5747_v3 = vrot.slane %v5745_v13, 5  ;;  %v5734_v50 = vor.u32 %v5733_v24, %v5729_v11  ;;  %v5755_v42 = vshrl.u32 %v5610_v49, 16  ;;  %v5761_v2 = vshll.u32 %v5611_v26, 16  ;;  %v9858_v26 = vpop.f32.mrf.mxu1  ;;  %v8587_v24 = vld [vmem:[#allocation2 + $0x60] sm:$0xff]  }
 0x287   : > { %8266 = vmatprep.mubr.bf16.mxu1 %v8584_v45  ;;  %8343 = vmatpush3.bf16.msra.mxu1 %v8585_v4  ;;  %v9841_v44 = vrot.slane %v5751_v39, 5  ;;  %v5725_v34 = vrot.slane %v5724_v27, 4  ;;  %v9846_v23 = vadd.f32 %v2512_v18, %v9650_v5  ;;  %v9849_v30 = vadd.f32 %v8025_v15, %v9671_v55  ;;  %v5613_v4 = vld [vmem:[#allocation2 + $0x58] sm:$0xf] }
 0x288   : > { %v5748_v37 = vor.u32 %v5747_v3, %v5744_v48  ;;  %8344 = vmatprep.subr.bf16.mxu1 %v8588_v46  ;;  %v7563_v47 = vcombine.low %v5706_v56, %v5716_v58  ;;  %v5735_v40 = vrot.slane %v5734_v50, 4  ;;  %v5739_v0 = vrot.slane %v5737_v10, 5  ;;  %v5616_v56 = vld [vmem:[#allocation2 + $0x64] sm:$0xf] }
 0x289   : > { %v5757_v62 = vrot.slane %v5755_v42, 4  ;;  %v5730_v38 = vsel %vm8976_vm2, %v5725_v34, %v5729_v11  ;;  %v5763_v49 = vrot.slane %v5761_v2, 5  ;;  %v5766_v41 = vshrl.u32 %v5612_v19, 16  ;;  %v5617_v34 = vld [vmem:[#allocation2 + $0x68] sm:$0x1] }
 0x28a   : > { %v5769_v5 = vshll.u32 %v5612_v19, 16  ;;  %v5740_v55 = vsel %vm8976_vm2, %v5735_v40, %v5739_v0  ;;  %v5775_v25 = vshll.u32 %v5613_v4, 16  ;;  %v5779_v43 = vshrl.u32 %v5613_v4, 16 }
 0x28b   : > { %8307 = vmatmul.mubr.bf16.vlgmr.msra.gmra.mxu0 %v7562_v61  ;;  %v5758_v18 = vor.u32 %v5757_v62, %v9841_v44  ;;  %8345 = vmatpush3.bf16.msra.mxu1 %v8588_v46  ;;  %v7564_v60 = vcombine.low %v5730_v38, %v5740_v55  ;;  %v5749_v13 = vrot.slane %v5748_v37, 4  ;;  %v8028_v11 = vpop.f32.mrf.mxu0  ;;  %v5768_v15 = vrot.slane %v5766_v41, 4  ;;  %v8594_v61 = vld [vmem:[#allocation9 + $0x210] sm:$0xff]   ;;  %v8597_v38 = vld [vmem:[#allocation9 + $0x208] sm:$0xff]  }
 0x28c   : > { %8310 = vmatprep.mubr.bf16.mxu0 %v7563_v47  ;;  %v5771_v45 = vrot.slane %v5769_v5, 5  ;;  %8346 = vmatprep.subr.bf16.mxu1 %v8591_v53  ;;  %v9861_v39 = vadd.f32 %v8028_v11, %v9706_v17  ;;  %v5777_v46 = vrot.slane %v5775_v25, 5  ;;  %v5781_v58 = vrot.slane %v5779_v43, 4  ;;  %v9865_v47 = vpop.f32.mrf.mxu1 }
 0x28d   : > { %v5759_v10 = vrot.slane %v5758_v18, 4  ;;  %v5785_v48 = vshll.u32 %v5614_v51, 16  ;;  %v5790_v3 = vshrl.u32 %v5615_v22, 16  ;;  %v5793_v50 = vshll.u32 %v5615_v22, 16  ;;  %v2528_v42 = vpop.f32.mrf.mxu0  ;;  %v5618_v18 = vld [vmem:[#allocation2 + $0x6c] sm:$0xf] }
 0x28e   : > { %8267 = vmatmul.mubr.bf16.gmra.mxu1 %v8586_v36  ;;  %v5772_v27 = vor.u32 %v5771_v45, %v5768_v15  ;;  %v5782_v19 = vor.u32 %v5781_v58, %v5777_v46  ;;  %v5799_v37 = vshll.u32 %v5616_v56, 16  ;;  %v5803_v4 = vshrl.u32 %v5616_v56, 16  ;;  %v5621_v15 = vld [vmem:[#allocation2 + $0x78] sm:$0xf]  ;;  %v9878_v45 = vpop.f32.mrf.mxu1  ;;  %v8589_v56 = vld [vmem:[#allocation2 + $0x6c] sm:$0xff]  }
 0x28f   : > { %8270 = vmatprep.mubr.bf16.mxu1 %v8587_v24  ;;  %v5764_v2 = vsel %vm8976_vm2, %v5759_v10, %v5763_v49  ;;  %8347 = vmatpush3.bf16.msra.mxu1 %v8591_v53  ;;  %v5754_v17 = vsel %vm8976_vm2, %v5749_v13, %v9841_v44  ;;  %v5787_v0 = vrot.slane %v5785_v48, 5  ;;  %v5792_v62 = vrot.slane %v5790_v3, 4  ;;  %v8029_v36 = vpop.f32.mrf.mxu0  ;;  %v5619_v44 = vld [vmem:[#allocation2 + $0x70] sm:$0xf]  ;;  %v8590_v24 = vld [vmem:[#allocation2 + $0x78] sm:$0xff]  }
 0x290   : > { %v5773_v40 = vrot.slane %v5772_v27, 4  ;;  %8348 = vmatprep.subr.bf16.mxu1 %v8594_v61  ;;  %v5783_v41 = vrot.slane %v5782_v19, 4  ;;  %v5795_v5 = vrot.slane %v5793_v50, 5  ;;  %v5801_v49 = vrot.slane %v5799_v37, 5  ;;  %v8600_v27 = vld [vmem:[#allocation9 + $0x200] sm:$0xff]  }
 0x291   : > { %v5805_v55 = vrot.slane %v5803_v4, 4  ;;  %v7565_v51 = vcombine.low %v5754_v17, %v5764_v2  ;;  %v5809_v25 = vshll.u32 %v5617_v34, 16  ;;  %v9871_v53 = vadd.f32 %v2528_v42, %v9721_v31  ;;  %v5620_v3 = vld [vmem:[#allocation2 + $0x74] sm:$0x1]  ;;  %v5622_v37 = vld [vmem:[#allocation2 + $0x7c] sm:$0xf]  ;;  %v9886_v17 = vpop.f32.mrf.mxu0 }
 0x292   : > { %v9874_v43 = vadd.f32 %v8029_v36, %v9740_v7  ;;  %v5788_v22 = vsel %vm8976_vm2, %v5783_v41, %v5787_v0  ;;  %v5796_v13 = vor.u32 %v5795_v5, %v5792_v62  ;;  %v5778_v31 = vsel %vm8976_vm2, %v5773_v40, %v5777_v46  ;;  %v5623_v62 = vld [vmem:[#allocation2 + $0x80] sm:$0x1]  ;;  %v5624_v36 = vld [vmem:[#allocation2 + $0x84] sm:$0xf]  ;;  %v9888_v41 = vpop.f32.mrf.mxu1 }
 0x293   : > { %8311 = vmatmul.mubr.bf16.gmra.mxu0 %v7564_v60  ;;  %v5806_v11 = vor.u32 %v5805_v55, %v5801_v49  ;;  %v5811_v10 = vrot.slane %v5809_v25, 5  ;;  %v5814_v58 = vshrl.u32 %v5618_v18, 16  ;;  %v5817_v7 = vshll.u32 %v5618_v18, 16  ;;  %8349 = vmatpush3.bf16.msra.mxu1 %v8594_v61 }
 0x294   : > { %8314 = vmatprep.mubr.bf16.mxu0 %v7565_v51  ;;  %v5797_v60 = vrot.slane %v5796_v13, 4  ;;  %v5823_v50 = vshll.u32 %v5619_v44, 16  ;;  %v5827_v42 = vshrl.u32 %v5619_v44, 16  ;;  %8350 = vmatprep.subr.bf16.mxu1 %v8597_v38  ;;  %v7566_v2 = vcombine.low %v5778_v31, %v5788_v22 }
 0x295   : > { %v5807_v48 = vrot.slane %v5806_v11, 4  ;;  %v5816_v19 = vrot.slane %v5814_v58, 4  ;;  %v5819_v34 = vrot.slane %v5817_v7, 5  ;;  %v5838_v4 = vshrl.u32 %v5621_v15, 16 }
 0x296   : > { %8271 = vmatmul.mubr.bf16.gmra.mxu1 %v8589_v56  ;;  %v5802_v46 = vsel %vm8976_vm2, %v5797_v60, %v5801_v49  ;;  %v5825_v40 = vrot.slane %v5823_v50, 5  ;;  %v5829_v0 = vrot.slane %v5827_v42, 4  ;;  %v5833_v18 = vshll.u32 %v5620_v3, 16  ;;  %v9890_v50 = vpop.f32.mrf.mxu1 }
 0x297   : > { %8274 = vmatprep.mubr.bf16.mxu1 %v8590_v24  ;;  %v5812_v61 = vsel %vm8976_vm2, %v5807_v48, %v5811_v10  ;;  %v5820_v55 = vor.u32 %v5819_v34, %v5816_v19  ;;  %v5840_v51 = vrot.slane %v5838_v4, 4  ;;  %8351 = vmatpush3.bf16.msra.mxu1 %v8597_v38  ;;  %v5841_v44 = vshll.u32 %v5621_v15, 16  ;;  %v5625_v48 = vld [vmem:[#allocation2 + $0x88] sm:$0xf]  ;;  %v5626_v19 = vld [vmem:[#allocation2 + $0x8c] sm:$0x1] }
 0x298   : > { %v7567_v5 = vcombine.low %v5802_v46, %v5812_v61  ;;  %v5830_v25 = vor.u32 %v5829_v0, %v5825_v40  ;;  %v5847_v22 = vshll.u32 %v5622_v37, 16  ;;  %v5851_v49 = vshrl.u32 %v5622_v37, 16  ;;  %8352 = vmatprep.subr.bf16.mxu1 %v8600_v27  ;;  %v8592_v38 = vld [vmem:[#allocation2 + $0x84] sm:$0xff]  }
 0x299   : > { %v5821_v13 = vrot.slane %v5820_v55, 4  ;;  %v5857_v11 = vshll.u32 %v5623_v62, 16  ;;  %v5862_v56 = vshrl.u32 %v5624_v36, 16  ;;  %v5865_v24 = vshll.u32 %v5624_v36, 16  ;;  %v5627_v62 = vld [vmem:[#allocation2 + $0x90] sm:$0xf] }
 0x29a   : > { %v5831_v10 = vrot.slane %v5830_v25, 4  ;;  %v5843_v58 = vrot.slane %v5841_v44, 5  ;;  %v5849_v7 = vrot.slane %v5847_v22, 5  ;;  %v5853_v60 = vrot.slane %v5851_v49, 4  ;;  %v9902_v44 = vpop.f32.mrf.mxu1 }
 0x29b   : > { %8315 = vmatmul.mubr.bf16.gmra.mxu0 %v7566_v2  ;;  %v8032_v31 = vpop.f32.mrf.mxu0  ;;  %v5826_v3 = vsel %vm8976_vm2, %v5821_v13, %v5825_v40  ;;  %v5835_v42 = vrot.slane %v5833_v18, 5  ;;  %v5864_v34 = vrot.slane %v5862_v56, 4  ;;  %8353 = vmatpush3.bf16.msra.mxu1 %v8600_v27  ;;  %v8593_v2 = vld [vmem:[#allocation2 + $0x90] sm:$0xff]   ;;  %v5859_v46 = vrot.slane %v5857_v11, 5 }
 0x29c   : > { %8318 = vmatprep.mubr.bf16.mxu0 %v7567_v5  ;;  %v9893_v15 = vadd.f32 %v8032_v31, %v9762_v6  ;;  %v5844_v37 = vor.u32 %v5843_v58, %v5840_v51  ;;  %v5854_v4 = vor.u32 %v5853_v60, %v5849_v7  ;;  %v5867_v0 = vrot.slane %v5865_v24, 5  ;;  %v5628_v11 = vld [vmem:[#allocation2 + $0x94] sm:$0xf]  ;;  %v5629_v58 = vld [vmem:[#allocation2 + $0x98] sm:$0x1] }
 0x29d   : > { %v2544_v61 = vpop.f32.mrf.mxu0  ;;  %v5836_v36 = vsel %vm8976_vm2, %v5831_v10, %v5835_v42  ;;  %v5871_v5 = vshll.u32 %v5625_v48, 16  ;;  %v5875_v40 = vshrl.u32 %v5625_v48, 16  ;;  %v5881_v51 = vshll.u32 %v5626_v19, 16  ;;  %v5630_v60 = vld [vmem:[#allocation2 + $0x9c] sm:$0xf] }
 0x29e   : > { %8275 = vmatmul.mubr.bf16.gmra.mxu1 %v8592_v38  ;;  %v9900_v6 = vadd.f32 %v2544_v61, %v9770_v63  ;;  %v5845_v55 = vrot.slane %v5844_v37, 4  ;;  %v5855_v18 = vrot.slane %v5854_v4, 4  ;;  %v5868_v25 = vor.u32 %v5867_v0, %v5864_v34  ;;  %v5631_v34 = vld [vmem:[#allocation2 + $0xa0] sm:$0xf]  ;;  %v9915_v4 = vpop.f32.mrf.mxu1  ;;  %v8596_v61 = vld [vmem:[#allocation2 + $0xa8] sm:$0xff]  }
 0x29f   : > { %8278 = vmatprep.mubr.bf16.mxu1 %v8593_v2  ;;  %v8033_v27 = vpop.f32.mrf.mxu0  ;;  %v5873_v49 = vrot.slane %v5871_v5, 5  ;;  %v5877_v13 = vrot.slane %v5875_v40, 4  ;;  %v5886_v56 = vshrl.u32 %v5627_v62, 16  ;;  %v7568_v24 = vcombine.low %v5826_v3, %v5836_v36 }
 0x2a0   : > { %v9905_v22 = vadd.f32 %v8033_v27, %v9788_v9  ;;  %v5850_v63 = vsel %vm8976_vm2, %v5845_v55, %v5849_v7  ;;  %v5860_v31 = vsel %vm8976_vm2, %v5855_v18, %v5859_v46  ;;  %v5869_v10 = vrot.slane %v5868_v25, 4  ;;  %v8595_v46 = vld [vmem:[#allocation2 + $0x9c] sm:$0xff]   ;;  %v5632_v25 = vld [vmem:[#allocation2 + $0xa4] sm:$0x1] }
 0x2a1   : > { %v7569_v48 = vcombine.low %v5850_v63, %v5860_v31  ;;  %v9911_v38 = vpop.f32.mrf.mxu0  ;;  %v5878_v42 = vor.u32 %v5877_v13, %v5873_v49  ;;  %v5883_v9 = vrot.slane %v5881_v51, 5  ;;  %v5888_v19 = vrot.slane %v5886_v56, 4 }
 0x2a2   : > { %v5874_v3 = vsel %vm8976_vm2, %v5869_v10, %v5873_v49  ;;  %v5889_v2 = vshll.u32 %v5627_v62, 16  ;;  %v5895_v37 = vshll.u32 %v5628_v11, 16  ;;  %v5899_v7 = vshrl.u32 %v5628_v11, 16 }
 0x2a3   : > { %8319 = vmatmul.mubr.bf16.gmra.mxu0 %v7568_v24  ;;  %v5879_v0 = vrot.slane %v5878_v42, 4  ;;  %v5905_v36 = vshll.u32 %v5629_v58, 16  ;;  %v5910_v5 = vshrl.u32 %v5630_v60, 16  ;;  %v5913_v40 = vshll.u32 %v5630_v60, 16  ;;  %v5633_v24 = vld [vmem:[#allocation2 + $0xa8] sm:$0xf]  ;;  %v9922_v60 = vpop.f32.mrf.mxu1 }
 0x2a4   : > { %8322 = vmatprep.mubr.bf16.mxu0 %v7569_v48  ;;  %v5891_v55 = vrot.slane %v5889_v2, 5  ;;  %v5897_v18 = vrot.slane %v5895_v37, 5  ;;  %v5901_v27 = vrot.slane %v5899_v7, 4  ;;  %v5919_v51 = vshll.u32 %v5631_v34, 16 }
 0x2a5   : > { %v5884_v62 = vsel %vm8976_vm2, %v5879_v0, %v5883_v9  ;;  %v5907_v49 = vrot.slane %v5905_v36, 5  ;;  %v5912_v11 = vrot.slane %v5910_v5, 4  ;;  %v5915_v56 = vrot.slane %v5913_v40, 5  ;;  %v5634_v36 = vld [vmem:[#allocation2 + $0xac] sm:$0xf] }
 0x2a6   : > { %8279 = vmatmul.mubr.bf16.gmra.mxu1 %v8595_v46  ;;  %v8036_v13 = vpop.f32.mrf.mxu0  ;;  %v7570_v31 = vcombine.low %v5874_v3, %v5884_v62  ;;  %v5892_v10 = vor.u32 %v5891_v55, %v5888_v19  ;;  %v5902_v58 = vor.u32 %v5901_v27, %v5897_v18  ;;  %v5921_v2 = vrot.slane %v5919_v51, 5  ;;  %v5635_v40 = vld [vmem:[#allocation2 + $0xb0] sm:$0x1]  ;;  %v9938_v51 = vpop.f32.mrf.mxu1  ;;  %v8598_v62 = vld [vmem:[#allocation2 + $0xb4] sm:$0xff]  }
 0x2a7   : > { %v9920_v63 = vadd.f32 %v8036_v13, %v9804_v16  ;;  %8282 = vmatprep.mubr.bf16.mxu1 %v8596_v61  ;;  %v5916_v42 = vor.u32 %v5915_v56, %v5912_v11  ;;  %v5923_v37 = vshrl.u32 %v5631_v34, 16  ;;  %v5929_v7 = vshll.u32 %v5632_v25, 16 }
 0x2a8   : > { %v2560_v48 = vpop.f32.mrf.mxu0  ;;  %v5893_v46 = vrot.slane %v5892_v10, 4  ;;  %v5903_v9 = vrot.slane %v5902_v58, 4  ;;  %v5934_v5 = vshrl.u32 %v5633_v24, 16  ;;  %v9929_v16 = vadd.f32 %v9802_v54, %v9615_v21  ;;  %v5636_v21 = vld [vmem:[#allocation2 + $0xb4] sm:$0xf] }
 0x2a9   : > { %v9925_v0 = vadd.f32 %v2560_v48, %v9819_v29  ;;  %v5917_v3 = vrot.slane %v5916_v42, 4  ;;  %v5925_v61 = vrot.slane %v5923_v37, 4  ;;  %v5937_v55 = vshll.u32 %v5633_v24, 16  ;;  %v5637_v37 = vld [vmem:[#allocation2 + $0xb8] sm:$0xf] }
 0x2aa   : > { %v8037_v19 = vpop.f32.mrf.mxu0  ;;  %v5898_v34 = vsel %vm8976_vm2, %v5893_v46, %v5897_v18  ;;  %v5908_v27 = vsel %vm8976_vm2, %v5903_v9, %v5907_v49  ;;  %v5936_v25 = vrot.slane %v5934_v5, 4  ;;  %v5931_v56 = vrot.slane %v5929_v7, 5 }
 0x2ab   : > { %8323 = vmatmul.mubr.bf16.gmra.mxu0 %v7570_v31  ;;  %v9936_v29 = vadd.f32 %v8037_v19, %v9834_v33  ;;  %v7571_v54 = vcombine.low %v5898_v34, %v5908_v27  ;;  %v5926_v11 = vor.u32 %v5925_v61, %v5921_v2  ;;  %v5939_v24 = vrot.slane %v5937_v55, 5  ;;  %v8599_v31 = vld [vmem:[#allocation2 + $0xc0] sm:$0xff]   ;;  %v5638_v55 = vld [vmem:[#allocation2 + $0xbc] sm:$0x1] }
 0x2ac   : > { %v9940_v13 = vpop.f32.mrf.mxu0  ;;  %v5922_v18 = vsel %vm8976_vm2, %v5917_v3, %v5921_v2  ;;  %v5943_v10 = vshll.u32 %v5634_v36, 16  ;;  %v5947_v49 = vshrl.u32 %v5634_v36, 16  ;;  %v5953_v58 = vshll.u32 %v5635_v40, 16  ;;  %v9947_v2 = vpop.f32.mrf.mxu1 }
 0x2ad   : > { %8326 = vmatprep.mubr.bf16.mxu0 %v7571_v54  ;;  %v5927_v48 = vrot.slane %v5926_v11, 4  ;;  %v5940_v42 = vor.u32 %v5939_v24, %v5936_v25  ;;  %v5958_v46 = vshrl.u32 %v5636_v21, 16  ;;  %v5961_v9 = vshll.u32 %v5636_v21, 16  ;;  %v6415_v25 = vld [vmem:[#allocation2 + $0x18] sm:$0xe] }
 0x2ae   : > { %8283 = vmatmul.mubr.bf16.gmra.mxu1 %v8598_v62  ;;  %v8040_v33 = vpop.f32.mrf.mxu0  ;;  %v5945_v7 = vrot.slane %v5943_v10, 5  ;;  %v5949_v19 = vrot.slane %v5947_v49, 4  ;;  %v5955_v61 = vrot.slane %v5953_v58, 5  ;;  %v8601_v62 = vld [vmem:[#allocation2 + $0xcc] sm:$0xff]   ;;  %v5967_v11 = vshll.u32 %v5637_v37, 16 }
 0x2af   : > { %v9945_v5 = vadd.f32 %v8040_v33, %v9858_v26  ;;  %8286 = vmatprep.mubr.bf16.mxu1 %v8599_v31  ;;  %v5932_v36 = vsel %vm8976_vm2, %v5927_v48, %v5931_v56  ;;  %v5941_v3 = vrot.slane %v5940_v42, 4  ;;  %v5960_v34 = vrot.slane %v5958_v46, 4  ;;  %v6416_v24 = vld [vmem:[#allocation2 + $0x1c] sm:$0xf]  ;;  %v6417_v33 = vld [vmem:[#allocation2 + $0x20] sm:$0x1] }
 0x2b0   : > { %v2576_v40 = vpop.f32.mrf.mxu0  ;;  %v5963_v27 = vrot.slane %v5961_v9, 5  ;;  %v7572_v54 = vcombine.low %v5922_v18, %v5932_v36  ;;  %v5950_v21 = vor.u32 %v5949_v19, %v5945_v7  ;;  %v5971_v58 = vshrl.u32 %v5637_v37, 16  ;;  %v5639_v48 = vld [vmem:[#allocation2 + $0xc0] sm:$0xf]  ;;  %v9959_v9 = vpop.f32.mrf.mxu1 }
 0x2b1   : > { %v9952_v26 = vadd.f32 %v2576_v40, %v9865_v47  ;;  %v5946_v31 = vsel %vm8976_vm2, %v5941_v3, %v5945_v7  ;;  %v5977_v56 = vshll.u32 %v5638_v55, 16  ;;  %v5969_v46 = vrot.slane %v5967_v11, 5  ;;  %v5640_v3 = vld [vmem:[#allocation2 + $0xc4] sm:$0xf] }
 0x2b2   : > { %v8041_v10 = vpop.f32.mrf.mxu0  ;;  %v5964_v49 = vor.u32 %v5963_v27, %v5960_v34  ;;  %v5951_v42 = vrot.slane %v5950_v21, 4  ;;  %v7585_v47 = vrot.slane %v6415_v25, 9  ;;  %v5973_v40 = vrot.slane %v5971_v58, 4  ;;  %v5641_v27 = vld [vmem:[#allocation2 + $0xc8] sm:$0x1] }
 0x2b3   : > { %10821 = vst [vmem:[#allocation14_spill] sm:$0xff] %v9952_v26  ;;  %8327 = vmatmul.mubr.bf16.gmra.mxu0 %v7572_v54  ;;  %v9957_v18 = vadd.f32 %v8041_v10, %v9878_v45  ;;  %v5979_v26 = vrot.slane %v5977_v56, 5  ;;  %v6513_v7 = vrot.slane %v6416_v24, 5  ;;  %v6516_v34 = vrot.slane %v6417_v33, 5  ;;  %v6418_v24 = vld [vmem:[#allocation2 + $0x24] sm:$0xe] }
 0x2b4   : > { %v2579_v19 = vpop.f32.mrf.mxu0  ;;  %v5965_v36 = vrot.slane %v5964_v49, 4  ;;  %v5956_v37 = vsel %vm8976_vm2, %v5951_v42, %v5955_v61  ;;  %v5982_v45 = vshrl.u32 %v5639_v48, 16  ;;  %v5974_v21 = vor.u32 %v5973_v40, %v5969_v46 }
 0x2b5   : > { %v9964_v55 = vadd.f32 %v2579_v19, %v9888_v41  ;;  %v7573_v54 = vcombine.low %v5946_v31, %v5956_v37  ;;  %v6514_v11 = vsel %vm9301_vm13, %v7585_v47, %v6513_v7  ;;  %v6515_v49 = vrot.slane %v6513_v7, 4  ;;  %v9970_v41 = vpop.f32.mrf.mxu1  ;;  %v6419_v19 = vld [vmem:[#allocation2 + $0x28] sm:$0xf]  ;;  %v6420_v7 = vld [vmem:[#allocation2 + $0x2c] sm:$0x1] }
 0x2b6   : > { %8287 = vmatmul.mubr.bf16.gmra.mxu1 %v8601_v62  ;;  %v5970_v25 = vsel %vm8976_vm2, %v5965_v36, %v5969_v46  ;;  %v5984_v58 = vrot.slane %v5982_v45, 4  ;;  %v5985_v61 = vshll.u32 %v5639_v48, 16  ;;  %v5991_v56 = vshll.u32 %v5640_v3, 16 }
 0x2b7   : > { %10822 = vst [vmem:[#allocation15_spill] sm:$0xff] %v9964_v55  ;;  %v8044_v10 = vpop.f32.mrf.mxu0  ;;  %8330 = vmatprep.mubr.bf16.mxu0 %v7573_v54  ;;  %v5975_v62 = vrot.slane %v5974_v21, 4  ;;  %v5995_v31 = vshrl.u32 %v5640_v3, 16  ;;  %v6001_v42 = vshll.u32 %v5641_v27, 16  ;;  %v6517_v46 = vsel %vm9301_vm13, %v6515_v49, %v6516_v34  ;;  %v5643_v49 = vld [vmem:[#allocation2 + $0xd0] sm:$0xf] }
 0x2b8   : > { %v9973_v33 = vadd.f32 %v8044_v10, %v9890_v50  ;;  %v5987_v47 = vrot.slane %v5985_v61, 5  ;;  %v5993_v36 = vrot.slane %v5991_v56, 5  ;;  %v7586_v37 = vrot.slane %v6418_v24, 9  ;;  %v5642_v50 = vld [vmem:[#allocation2 + $0xcc] sm:$0xf] }
 0x2b9   : > { %v2592_v40 = vpop.f32.mrf.mxu0  ;;  %v5980_v48 = vsel %vm8976_vm2, %v5975_v62, %v5979_v26  ;;  %v7601_v45 = vcombine.low %v6514_v11, %v6517_v46  ;;  %v5997_v54 = vrot.slane %v5995_v31, 4  ;;  %v6003_v55 = vrot.slane %v6001_v42, 5  ;;  %v5644_v46 = vld [vmem:[#allocation2 + $0xd4] sm:$0x1] }
 0x2ba   : > { %10823 = vst [vmem:[#allocation16_spill] sm:$0xff] %v9973_v33  ;;  %v7574_v10 = vcombine.low %v5970_v25, %v5980_v48  ;;  %v5988_v21 = vor.u32 %v5987_v47, %v5984_v58  ;;  %v9980_v3 = vadd.f32 %v2592_v40, %v9902_v44  ;;  %v6520_v34 = vrot.slane %v6419_v19, 5  ;;  %v6421_v48 = vld [vmem:[#allocation2 + $0x30] sm:$0xe] }
 0x2bb   : > { %v8045_v27 = vpop.f32.mrf.mxu0  ;;  %v8068_v33 = vpop.f32.mrf.mxu1  ;;  %8354 = vmatprep.mubr.bf16.mxu1 %v7601_v45  ;;  %v5998_v61 = vor.u32 %v5997_v54, %v5993_v36  ;;  %v6523_v11 = vrot.slane %v6420_v7, 5  ;;  %v6006_v62 = vshrl.u32 %v5642_v50, 16  ;;  %v6015_v47 = vshll.u32 %v5643_v49, 16 }
 0x2bc   : > { %v9983_v24 = vadd.f32 %v8045_v27, %v9915_v4  ;;  %v9986_v26 = vadd.f32 %v8068_v33, %v9798_v8  ;;  %8331 = vmatmul.mubr.bf16.gmra.mxu0 %v7574_v10  ;;  %v5989_v56 = vrot.slane %v5988_v21, 4  ;;  %v6521_v44 = vsel %vm9301_vm13, %v7586_v37, %v6520_v34  ;;  %v6422_v37 = vld [vmem:[#allocation2 + $0x34] sm:$0xf] }
 0x2bd   : > { %v2595_v25 = vpop.f32.mrf.mxu0  ;;  %v6522_v58 = vrot.slane %v6520_v34, 4  ;;  %v3093_v31 = vpop.f32.mrf.mxu1  ;;  %v5999_v42 = vrot.slane %v5998_v61, 4  ;;  %v6009_v4 = vshll.u32 %v5642_v50, 16  ;;  %v6008_v40 = vrot.slane %v6006_v62, 4  ;;  %v6423_v61 = vld [vmem:[#allocation2 + $0x38] sm:$0x1] }
 0x2be   : > { %v9991_v19 = vadd.f32 %v2595_v25, %v9922_v60  ;;  %v5994_v8 = vsel %vm8976_vm2, %v5989_v56, %v5993_v36  ;;  %v6019_v7 = vshrl.u32 %v5643_v49, 16  ;;  %v6017_v21 = vrot.slane %v6015_v47, 5 }
 0x2bf   : > { %v6524_v33 = vsel %vm9301_vm13, %v6522_v58, %v6523_v11  ;;  %v8069_v45 = vpop.f32.mrf.mxu1  ;;  %v6004_v54 = vsel %vm8976_vm2, %v5999_v42, %v6003_v55  ;;  %v6011_v60 = vrot.slane %v6009_v4, 5  ;;  %v10001_v50 = vadd.f32 %v9851_v12, %v9693_v20  ;;  %v6425_v55 = vld [vmem:[#allocation2 + $0x40] sm:$0xf]  ;;  %v6424_v4 = vld [vmem:[#allocation2 + $0x3c] sm:$0xe] }
 0x2c0   : > { %v7602_v10 = vcombine.low %v6521_v44, %v6524_v33  ;;  %v7575_v27 = vcombine.low %v5994_v8, %v6004_v54  ;;  %v6021_v36 = vrot.slane %v6019_v7, 4  ;;  %v6025_v34 = vshll.u32 %v5644_v46, 16 }
 0x2c1   : > { %v3096_v11 = vpop.f32.mrf.mxu1  ;;  %v6012_v49 = vor.u32 %v6011_v60, %v6008_v40  ;;  %v7587_v56 = vrot.slane %v6421_v48, 9  ;;  %v6527_v25 = vrot.slane %v6422_v37, 5  ;;  %v10004_v58 = vadd.f32 %v3093_v31, %v9817_v52  ;;  %v6426_v31 = vld [vmem:[#allocation2 + $0x44] sm:$0x1] }
 0x2c2   : > { %8355 = vmatmul.mubr.bf16.vlgmr.msra.gmra.mxu1 %v7602_v10  ;;  %8334 = vmatprep.mubr.bf16.mxu0 %v7575_v27  ;;  %v6022_v62 = vor.u32 %v6021_v36, %v6017_v21  ;;  %v6027_v42 = vrot.slane %v6025_v34, 5  ;;  %v10007_v20 = vadd.f32 %v8069_v45, %v9824_v32  ;;  %v10010_v12 = vadd.f32 %v3096_v11, %v9929_v16  ;;  %v6428_v16 = vld [vmem:[#allocation2 + $0x4c] sm:$0xf]  ;;  %v6427_v27 = vld [vmem:[#allocation2 + $0x48] sm:$0xe] }
 0x2c3   : > { %v8048_v44 = vpop.f32.mrf.mxu0  ;;  %v8072_v46 = vpop.f32.mrf.mxu1  ;;  %v6013_v8 = vrot.slane %v6012_v49, 4  ;;  %v6529_v33 = vrot.slane %v6527_v25, 4  ;;  %v6530_v52 = vrot.slane %v6423_v61, 5  ;;  %v6528_v7 = vsel %vm9301_vm13, %v7587_v56, %v6527_v25  ;;  %v6429_v49 = vld [vmem:[#allocation2 + $0x50] sm:$0x1] }
 0x2c4   : > { %v10013_v47 = vadd.f32 %v8048_v44, %v9938_v51  ;;  %v6023_v40 = vrot.slane %v6022_v62, 4  ;;  %v10018_v32 = vadd.f32 %v8072_v46, %v9827_v1  ;;  %v6534_v37 = vrot.slane %v6425_v55, 5  ;;  %v6431_v44 = vld [vmem:[#allocation2 + $0x58] sm:$0xf] }
 0x2c5   : > { %v2608_v48 = vpop.f32.mrf.mxu0  ;;  %v3109_v45 = vpop.f32.mrf.mxu1  ;;  %v6018_v54 = vsel %vm8976_vm2, %v6013_v8, %v6017_v21  ;;  %v6531_v51 = vsel %vm9301_vm13, %v6529_v33, %v6530_v52  ;;  %v7588_v60 = vrot.slane %v6424_v4, 9  ;;  %v6537_v11 = vrot.slane %v6426_v31, 5 }
 0x2c6   : > { %v10025_v10 = vadd.f32 %v2608_v48, %v9947_v2  ;;  %v6028_v36 = vsel %vm8976_vm2, %v6023_v40, %v6027_v42  ;;  %v7603_v34 = vcombine.low %v6528_v7, %v6531_v51  ;;  %v6536_v61 = vrot.slane %v6534_v37, 4  ;;  %v6432_v40 = vld [vmem:[#allocation2 + $0x5c] sm:$0x1]  ;;  %v6434_v7 = vld [vmem:[#allocation2 + $0x64] sm:$0xf] }
 0x2c7   : > { %v8049_v1 = vpop.f32.mrf.mxu0  ;;  %v8073_v56 = vpop.f32.mrf.mxu1  ;;  %v7576_v25 = vcombine.low %v6018_v54, %v6028_v36  ;;  %v6535_v55 = vsel %vm9301_vm13, %v7588_v60, %v6534_v37  ;;  %v6541_v2 = vrot.slane %v6428_v16, 5  ;;  %v7589_v42 = vrot.slane %v6427_v27, 9  ;;  %v6433_v54 = vld [vmem:[#allocation2 + $0x60] sm:$0xe]  ;;  %v6435_v27 = vld [vmem:[#allocation2 + $0x68] sm:$0x1] }
 0x2c8   : > { %v10030_v21 = vadd.f32 %v8049_v1, %v9959_v9  ;;  %8358 = vmatprep.mubr.bf16.mxu1 %v7603_v34  ;;  %v6538_v59 = vsel %vm9301_vm13, %v6536_v61, %v6537_v11  ;;  %v10037_v46 = vadd.f32 %v3109_v45, %v9846_v23  ;;  %v10040_v4 = vadd.f32 %v8073_v56, %v9849_v30  ;;  %v6430_v23 = vld [vmem:[#allocation2 + $0x54] sm:$0xe] }
 0x2c9   : > { %v2611_v62 = vpop.f32.mrf.mxu0  ;;  %v3112_v8 = vpop.f32.mrf.mxu1  ;;  %8335 = vmatmul.mubr.bf16.gmra.mxu0 %v7576_v25  ;;  %v7604_v33 = vcombine.low %v6535_v55, %v6538_v59  ;;  %v6543_v52 = vrot.slane %v6541_v2, 4  ;;  %v6544_v31 = vrot.slane %v6429_v49, 5  ;;  %v6548_v45 = vrot.slane %v6431_v44, 5 }
 0x2ca   : > { %v10043_v9 = vadd.f32 %v2611_v62, %v9970_v41  ;;  %v10046_v37 = vadd.f32 %v3112_v8, %v10001_v50  ;;  %v6542_v41 = vsel %vm9301_vm13, %v7589_v42, %v6541_v2  ;;  %v10058_v50 = vld [vmem:[#allocation2 + $0x70] sm:$0xf]  ;;  %v6551_v61 = vrot.slane %v6432_v40, 5  ;;  %v6440_v8 = vld [vmem:[#allocation2 + $0x7c] sm:$0xf] }
 0x2cb   : > { %v8116_v48 = vpop.f32.mrf.mxu0  ;;  %v8076_v16 = vpop.f32.mrf.mxu1  ;;  %8359 = vmatmul.mubr.bf16.gmra.mxu1 %v7604_v33  ;;  %v6545_v51 = vsel %vm9301_vm13, %v6543_v52, %v6544_v31  ;;  %v6550_v1 = vrot.slane %v6548_v45, 4  ;;  %v6555_v11 = vrot.slane %v6434_v7, 5  ;;  %v7590_v56 = vrot.slane %v6430_v23, 9 }
 0x2cc   : > { %v10049_v30 = vadd.f32 %v8116_v48, %v9986_v26  ;;  %v10056_v60 = vadd.f32 %v8076_v16, %v9861_v39  ;;  %v7605_v36 = vcombine.low %v6542_v41, %v6545_v51  ;;  %v7591_v25 = vrot.slane %v6433_v54, 9 }
 0x2cd   : > { %v3543_v34 = vpop.f32.mrf.mxu0  ;;  %v3125_v49 = vpop.f32.mrf.mxu1  ;;  %v6552_v2 = vsel %vm9301_vm13, %v6550_v1, %v6551_v61  ;;  %v6557_v44 = vrot.slane %v6555_v11, 4  ;;  %v6558_v62 = vrot.slane %v6435_v27, 5  ;;  %v6562_v42 = vrot.slane %v10058_v50, 5 }
 0x2ce   : > { %v10061_v26 = vadd.f32 %v3543_v34, %v10004_v58  ;;  %v10064_v55 = vadd.f32 %v3125_v49, %v9871_v53  ;;  %8362 = vmatprep.mubr.bf16.mxu1 %v7605_v36  ;;  %v2632_v58 = vadd.f32 %v9886_v17, %v9752_v57  ;;  %v6549_v31 = vsel %vm9301_vm13, %v7590_v56, %v6548_v45  ;;  %v6441_v45 = vld [vmem:[#allocation2 + $0x80] sm:$0x1]  ;;  %v6436_v36 = vld [vmem:[#allocation2 + $0x6c] sm:$0xe]  ;;  %v10094_v34 = vld [vmem:[#allocation2 + $0x88] sm:$0xf] }
 0x2cf   : > { %v8117_v39 = vpop.f32.mrf.mxu0  ;;  %v8077_v59 = vpop.f32.mrf.mxu1  ;;  %v6556_v40 = vsel %vm9301_vm13, %v7591_v25, %v6555_v11  ;;  %v6559_v7 = vsel %vm9301_vm13, %v6557_v44, %v6558_v62  ;;  %v7606_v57 = vcombine.low %v6549_v31, %v6552_v2  ;;  %v6564_v51 = vrot.slane %v6562_v42, 4  ;;  %v6446_v56 = vld [vmem:[#allocation2 + $0x94] sm:$0xf] }
 0x2d0   : > { %v10072_v33 = vadd.f32 %v8117_v39, %v10007_v20  ;;  %v10075_v53 = vadd.f32 %v8077_v59, %v9874_v43  ;;  %v6438_v20 = vld [vmem:[#allocation2 + $0x74] sm:$0x1]  ;;  %v6569_v43 = vrot.slane %v6440_v8, 5  ;;  %v7607_v54 = vcombine.low %v6556_v40, %v6559_v7 }
 0x2d1   : > { %v3546_v52 = vpop.f32.mrf.mxu0  ;;  %v3128_v48 = vpop.f32.mrf.mxu1  ;;  %v6565_v61 = vrot.slane %v6438_v20, 5  ;;  %v2636_v25 = vadd.f32 %v9911_v38, %v9800_v35  ;;  %v7592_v44 = vrot.slane %v6436_v36, 9  ;;  %v6444_v20 = vld [vmem:[#allocation2 + $0x8c] sm:$0x1]  ;;  %v6445_v36 = vld [vmem:[#allocation2 + $0x90] sm:$0xe] }
 0x2d2   : > { %v10084_v16 = vadd.f32 %v3546_v52, %v10010_v12  ;;  %v10086_v17 = vadd.f32 %v3128_v48, %v2632_v58  ;;  %v6439_v12 = vld [vmem:[#allocation2 + $0x78] sm:$0xe]  ;;  %v6571_v11 = vrot.slane %v6569_v43, 4  ;;  %v6576_v58 = vrot.slane %v10094_v34, 5  ;;  %v6449_v34 = vld [vmem:[#allocation2 + $0xa0] sm:$0xf] }
 0x2d3   : > { %v8120_v23 = vpop.f32.mrf.mxu0  ;;  %v8080_v41 = vpop.f32.mrf.mxu1  ;;  %8363 = vmatmul.mubr.bf16.gmra.mxu1 %v7606_v57  ;;  %v6566_v62 = vsel %vm9301_vm13, %v6564_v51, %v6565_v61  ;;  %v7593_v59 = vrot.slane %v6439_v12, 9  ;;  %v6563_v31 = vsel %vm9301_vm13, %v7592_v44, %v6562_v42  ;;  %v7595_v44 = vrot.slane %v6445_v36, 9  ;;  %v6455_v36 = vld [vmem:[#allocation2 + $0xb8] sm:$0xf] }
 0x2d4   : > { %v10089_v27 = vadd.f32 %v8120_v23, %v10018_v32  ;;  %v10092_v50 = vadd.f32 %v8080_v41, %v9893_v15  ;;  %8366 = vmatprep.mubr.bf16.mxu1 %v7607_v54  ;;  %v6572_v32 = vrot.slane %v6441_v45, 5  ;;  %v7608_v48 = vcombine.low %v6563_v31, %v6566_v62  ;;  %v6442_v41 = vld [vmem:[#allocation2 + $0x84] sm:$0xe]  ;;  %v6447_v45 = vld [vmem:[#allocation2 + $0x98] sm:$0x1] }
 0x2d5   : > { %v3559_v1 = vpop.f32.mrf.mxu0  ;;  %v3141_v49 = vpop.f32.mrf.mxu1  ;;  %v6578_v51 = vrot.slane %v6576_v58, 4 }
 0x2d6   : > { %v10099_v39 = vadd.f32 %v3559_v1, %v10037_v46  ;;  %v10102_v15 = vadd.f32 %v3141_v49, %v9900_v6  ;;  %v6573_v35 = vsel %vm9301_vm13, %v6571_v11, %v6572_v32  ;;  %v6583_v6 = vrot.slane %v6446_v56, 5  ;;  %v6452_v11 = vld [vmem:[#allocation2 + $0xac] sm:$0xf] }
 0x2d7   : > { %v8121_v2 = vpop.f32.mrf.mxu0  ;;  %v8081_v8 = vpop.f32.mrf.mxu1  ;;  %v6579_v1 = vrot.slane %v6444_v20, 5  ;;  %v2640_v49 = vadd.f32 %v9940_v13, %v9843_v28  ;;  %v7594_v32 = vrot.slane %v6442_v41, 9  ;;  %v6453_v41 = vld [vmem:[#allocation2 + $0xb0] sm:$0x1] }
 0x2d8   : > { %v10108_v52 = vadd.f32 %v8121_v2, %v10040_v4  ;;  %v10113_v38 = vadd.f32 %v8081_v8, %v9905_v22  ;;  %v6570_v4 = vsel %vm9301_vm13, %v7593_v59, %v6569_v43  ;;  %v6585_v12 = vrot.slane %v6583_v6, 4 }
 0x2d9   : > { %v3562_v46 = vpop.f32.mrf.mxu0  ;;  %v3144_v40 = vpop.f32.mrf.mxu1  ;;  %v7609_v54 = vcombine.low %v6570_v4, %v6573_v35  ;;  %v6580_v2 = vsel %vm9301_vm13, %v6578_v51, %v6579_v1  ;;  %v6590_v59 = vrot.slane %v6449_v34, 5  ;;  %v6577_v35 = vsel %vm9301_vm13, %v7594_v32, %v6576_v58  ;;  %v6450_v4 = vld [vmem:[#allocation2 + $0xa4] sm:$0x1]  ;;  %v6451_v51 = vld [vmem:[#allocation2 + $0xa8] sm:$0xe] }
 0x2da   : > { %v10118_v7 = vadd.f32 %v3562_v46, %v10046_v37  ;;  %v10122_v57 = vadd.f32 %v3144_v40, %v2636_v25  ;;  %v6586_v25 = vrot.slane %v6447_v45, 5  ;;  %v7610_v40 = vcombine.low %v6577_v35, %v6580_v2 }
 0x2db   : > { %v8124_v23 = vpop.f32.mrf.mxu0  ;;  %v8084_v22 = vpop.f32.mrf.mxu1  ;;  %8367 = vmatmul.mubr.bf16.gmra.mxu1 %v7608_v48  ;;  %v6604_v2 = vrot.slane %v6455_v36, 5  ;;  %v6454_v36 = vld [vmem:[#allocation2 + $0xb4] sm:$0xe] }
 0x2dc   : > { %v10125_v42 = vadd.f32 %v8124_v23, %v10056_v60  ;;  %v10128_v37 = vadd.f32 %v8084_v22, %v9920_v63  ;;  %8370 = vmatprep.mubr.bf16.mxu1 %v7609_v54  ;;  %v6587_v28 = vsel %vm9301_vm13, %v6585_v12, %v6586_v25  ;;  %v6448_v54 = vld [vmem:[#allocation2 + $0x9c] sm:$0xe]  ;;  %v6592_v22 = vrot.slane %v6590_v59, 4 }
 0x2dd   : > { %v3575_v43 = vpop.f32.mrf.mxu0  ;;  %v3157_v61 = vpop.f32.mrf.mxu1  ;;  %v6593_v12 = vrot.slane %v6450_v4, 5  ;;  %v7596_v25 = vrot.slane %v6448_v54, 9  ;;  %v10825_v4 = vld [vmem:[#allocation15_spill] sm:$0xff] }
 0x2de   : > { %v10133_v56 = vadd.f32 %v3575_v43, %v10064_v55  ;;  %v10136_v60 = vadd.f32 %v3157_v61, %v9925_v0  ;;  %v6597_v55 = vrot.slane %v6452_v11, 5  ;;  %v6458_v43 = vld [vmem:[#allocation2 + $0xc4] sm:$0xf]  ;;  %v6600_v61 = vrot.slane %v6453_v41, 5  ;;  %v10824_v11 = vld [vmem:[#allocation14_spill] sm:$0xff] }
 0x2df   : > { %v8125_v63 = vpop.f32.mrf.mxu0  ;;  %v8085_v62 = vpop.f32.mrf.mxu1  ;;  %v6591_v35 = vsel %vm9301_vm13, %v7596_v25, %v6590_v59  ;;  %v6606_v41 = vrot.slane %v6604_v2, 4 }
 0x2e0   : > { %v10141_v8 = vadd.f32 %v8125_v63, %v10075_v53  ;;  %v10146_v13 = vadd.f32 %v8085_v62, %v9936_v29  ;;  %v6584_v53 = vsel %vm9301_vm13, %v7595_v44, %v6583_v6  ;;  %v6599_v45 = vrot.slane %v6597_v55, 4 }
 0x2e1   : > { %v3578_v0 = vpop.f32.mrf.mxu0  ;;  %v3160_v46 = vpop.f32.mrf.mxu1  ;;  %v7611_v23 = vcombine.low %v6584_v53, %v6587_v28  ;;  %v7597_v63 = vrot.slane %v6451_v51, 9  ;;  %v6611_v28 = vrot.slane %v6458_v43, 5  ;;  %v6459_v51 = vld [vmem:[#allocation2 + $0xc8] sm:$0x1] }
 0x2e2   : > { %v10151_v31 = vadd.f32 %v3578_v0, %v10086_v17  ;;  %v10155_v48 = vadd.f32 %v3160_v46, %v2640_v49  ;;  %v6601_v62 = vsel %vm9301_vm13, %v6599_v45, %v6600_v61  ;;  %v10826_v45 = vld [vmem:[#allocation16_spill] sm:$0xff] }
 0x2e3   : > { %v8128_v20 = vpop.f32.mrf.mxu0  ;;  %v8088_v29 = vpop.f32.mrf.mxu1  ;;  %8371 = vmatmul.mubr.bf16.gmra.mxu1 %v7610_v40 }
 0x2e4   : > { %v10158_v58 = vadd.f32 %v8128_v20, %v10092_v50  ;;  %v10161_v17 = vadd.f32 %v8088_v29, %v9945_v5  ;;  %8374 = vmatprep.mubr.bf16.mxu1 %v7611_v23  ;;  %v6594_v5 = vsel %vm9301_vm13, %v6592_v22, %v6593_v12  ;;  %v6456_v23 = vld [vmem:[#allocation2 + $0xbc] sm:$0x1]  ;;  %v6461_v29 = vld [vmem:[#allocation2 + $0xd0] sm:$0xf] }
 0x2e5   : > { %v3591_v6 = vpop.f32.mrf.mxu0  ;;  %v3173_v34 = vpop.f32.mrf.mxu1  ;;  %v7612_v53 = vcombine.low %v6591_v35, %v6594_v5  ;;  %v6618_v61 = vrot.slane %v6461_v29, 5  ;;  %v6460_v5 = vld [vmem:[#allocation2 + $0xcc] sm:$0xe] }
 0x2e6   : > { %v10164_v1 = vadd.f32 %v3591_v6, %v10102_v15  ;;  %v10167_v49 = vadd.f32 %v3173_v34, %v10824_v11  ;;  %v6613_v6 = vrot.slane %v6611_v28, 4  ;;  %v6457_v34 = vld [vmem:[#allocation2 + $0xc0] sm:$0xe] }
 0x2e7   : > { %v8129_v50 = vpop.f32.mrf.mxu0  ;;  %v8089_v32 = vpop.f32.mrf.mxu1  ;;  %v6620_v29 = vrot.slane %v6618_v61, 4 }
 0x2e8   : > { %v10172_v44 = vadd.f32 %v8129_v50, %v10113_v38  ;;  %v10177_v15 = vadd.f32 %v8089_v32, %v9957_v18  ;;  %v6598_v38 = vsel %vm9301_vm13, %v7597_v63, %v6597_v55  ;;  %v6607_v55 = vrot.slane %v6456_v23, 5  ;;  %v6462_v63 = vld [vmem:[#allocation2 + $0xd4] sm:$0x1] }
 0x2e9   : > { %v3594_v0 = vpop.f32.mrf.mxu0  ;;  %v3176_v46 = vpop.f32.mrf.mxu1  ;;  %v7613_v18 = vcombine.low %v6598_v38, %v6601_v62  ;;  %v6614_v50 = vrot.slane %v6459_v51, 5  ;;  %v7598_v32 = vrot.slane %v6454_v36, 9  ;;  %v7600_v23 = vrot.slane %v6460_v5, 9 }
 0x2ea   : > { %v10182_v40 = vadd.f32 %v3594_v0, %v10122_v57  ;;  %v3241_v20 = vadd.f32 %v3176_v46, %v10825_v4  ;;  %v6608_v62 = vsel %vm9301_vm13, %v6606_v41, %v6607_v55  ;;  %v7599_v46 = vrot.slane %v6457_v34, 9 }
 0x2eb   : > { %v8132_v54 = vpop.f32.mrf.mxu0  ;;  %v8092_v22 = vpop.f32.mrf.mxu1  ;;  %8375 = vmatmul.mubr.bf16.gmra.mxu1 %v7612_v53  ;;  %v6615_v53 = vsel %vm9301_vm13, %v6613_v6, %v6614_v50 }
 0x2ec   : > { %v10188_v59 = vadd.f32 %v8132_v54, %v10128_v37  ;;  %v3246_v57 = vadd.f32 %v8092_v22, %v10826_v45  ;;  %8378 = vmatprep.mubr.bf16.mxu1 %v7613_v18  ;;  %v6621_v54 = vrot.slane %v6462_v63, 5 }
 0x2ed   : > { %v3607_v12 = vpop.f32.mrf.mxu0  ;;  %v3189_v43 = vpop.f32.mrf.mxu1 }
 0x2ee   : > { %v10192_v11 = vadd.f32 %v3607_v12, %v10136_v60  ;;  %v3244_v25 = vadd.f32 %v3189_v43, %v9980_v3  ;;  %v6605_v3 = vsel %vm9301_vm13, %v7598_v32, %v6604_v2  ;;  %v6622_v12 = vsel %vm9301_vm13, %v6620_v29, %v6621_v54 }
 0x2ef   : > { %v8133_v37 = vpop.f32.mrf.mxu0  ;;  %v8093_v0 = vpop.f32.mrf.mxu1  ;;  %v7614_v22 = vcombine.low %v6605_v3, %v6608_v62 }
 0x2f0   : > { %v10198_v35 = vadd.f32 %v8133_v37, %v10146_v13  ;;  %v3247_v60 = vadd.f32 %v8093_v0, %v9983_v24  ;;  %v6612_v13 = vsel %vm9301_vm13, %v7599_v46, %v6611_v28 }
 0x2f1   : > { %v3610_v38 = vpop.f32.mrf.mxu0  ;;  %v3192_v4 = vpop.f32.mrf.mxu1  ;;  %v7615_v45 = vcombine.low %v6612_v13, %v6615_v53 }
 0x2f2   : > { %v10206_v18 = vadd.f32 %v3610_v38, %v10155_v48  ;;  %v3245_v41 = vadd.f32 %v3192_v4, %v9991_v19  ;;  %v6619_v48 = vsel %vm9301_vm13, %v7600_v23, %v6618_v61 }
 0x2f3   : > { %v8136_v51 = vpop.f32.mrf.mxu0  ;;  %v8096_v24 = vpop.f32.mrf.mxu1  ;;  %8379 = vmatmul.mubr.bf16.gmra.mxu1 %v7614_v22 }
 0x2f4   : > { %v10212_v36 = vadd.f32 %v8136_v51, %v10161_v17  ;;  %v3250_v2 = vadd.f32 %v8096_v24, %v10013_v47  ;;  %8382 = vmatprep.mubr.bf16.mxu1 %v7615_v45  ;;  %v7616_v47 = vcombine.low %v6619_v48, %v6622_v12 }
 0x2f5   : > { %v3623_v6 = vpop.f32.mrf.mxu0  ;;  %v3205_v28 = vpop.f32.mrf.mxu1 }
 0x2f6   : > { %v10220_v19 = vadd.f32 %v3623_v6, %v10167_v49  ;;  %v3248_v55 = vadd.f32 %v3205_v28, %v10025_v10 }
 0x2f7   : > { %v8137_v34 = vpop.f32.mrf.mxu0  ;;  %v8097_v43 = vpop.f32.mrf.mxu1 }
 0x2f8   : > { %v10224_v17 = vadd.f32 %v8137_v34, %v10177_v15  ;;  %v3251_v50 = vadd.f32 %v8097_v43, %v10030_v21 }
 0x2f9   : > { %v3626_v5 = vpop.f32.mrf.mxu0  ;;  %v3208_v63 = vpop.f32.mrf.mxu1 }
 0x2fa   : > { %v10227_v61 = vadd.f32 %v3626_v5, %v3241_v20  ;;  %v3249_v14 = vadd.f32 %v3208_v63, %v10043_v9 }
 0x2fb   : > { %v8140_v37 = vpop.f32.mrf.mxu0  ;;  %v8164_v32 = vpop.f32.mrf.mxu1  ;;  %8383 = vmatmul.mubr.bf16.gmra.mxu1 %v7616_v47 }
 0x2fc   : > { %v10230_v49 = vadd.f32 %v8140_v37, %v3246_v57  ;;  %v10233_v10 = vadd.f32 %v8164_v32, %v10049_v30 }
 0x2fd   : > { %v3639_v62 = vpop.f32.mrf.mxu0  ;;  %v4361_v15 = vpop.f32.mrf.mxu1 }
 0x2fe   : > { %v10235_v0 = vadd.f32 %v3639_v62, %v3244_v25  ;;  %v10238_v21 = vadd.f32 %v4361_v15, %v10061_v26 }
 0x2ff   : > { %v8141_v46 = vpop.f32.mrf.mxu0  ;;  %v8165_v20 = vpop.f32.mrf.mxu1 }
 0x300   : > { %v10240_v53 = vadd.f32 %v8141_v46, %v3247_v60  ;;  %v10243_v9 = vadd.f32 %v8165_v20, %v10072_v33 }
 0x301   : > { %v3642_v38 = vpop.f32.mrf.mxu0  ;;  %v4364_v57 = vpop.f32.mrf.mxu1 }
 0x302   : > { %v10245_v3 = vadd.f32 %v3642_v38, %v3245_v41  ;;  %v10248_v30 = vadd.f32 %v4364_v57, %v10084_v16 }
 0x303   : > { %v8144_v4 = vpop.f32.mrf.mxu0  ;;  %v8168_v25 = vpop.f32.mrf.mxu1 }
 0x304   : > { %v10250_v23 = vadd.f32 %v8144_v4, %v3250_v2  ;;  %v10253_v26 = vadd.f32 %v8168_v25, %v10089_v27 }
 0x305   : > { %v3655_v29 = vpop.f32.mrf.mxu0  ;;  %v4377_v60 = vpop.f32.mrf.mxu1 }
 0x306   : > { %v10255_v54 = vadd.f32 %v3655_v29, %v3248_v55  ;;  %v10258_v33 = vadd.f32 %v4377_v60, %v10099_v39 }
 0x307   : > { %v8145_v22 = vpop.f32.mrf.mxu0  ;;  %v8169_v13 = vpop.f32.mrf.mxu1 }
 0x308   : > { %v10260_v41 = vadd.f32 %v8145_v22, %v3251_v50  ;;  %v10263_v16 = vadd.f32 %v8169_v13, %v10108_v52 }
 0x309   : > { %v3658_v51 = vpop.f32.mrf.mxu0  ;;  %v4380_v45 = vpop.f32.mrf.mxu1 }
 0x30a   : > { %v10265_v24 = vadd.f32 %v3658_v51, %v3249_v14  ;;  %v10268_v27 = vadd.f32 %v4380_v45, %v10118_v7 }
 0x30b   : > { %v10270_v2 = vpop.f32.mrf.mxu0  ;;  %v8172_v6 = vpop.f32.mrf.mxu1 }
 0x30c   : > { %v10273_v39 = vadd.f32 %v8172_v6, %v10125_v42 }
 0x30d   : > { %v10275_v48 = vpop.f32.mrf.mxu0  ;;  %v4393_v12 = vpop.f32.mrf.mxu1 }
 0x30e   : > { %v10278_v28 = vadd.f32 %v4393_v12, %v10133_v56 }
 0x30f   : > { %v10280_v52 = vpop.f32.mrf.mxu0  ;;  %v8173_v55 = vpop.f32.mrf.mxu1 }
 0x310   : > { %v10283_v34 = vadd.f32 %v8173_v55, %v10141_v8 }
 0x311   : > { %v10285_v7 = vpop.f32.mrf.mxu0  ;;  %v4396_v43 = vpop.f32.mrf.mxu1 }
 0x312   : > { %v10288_v47 = vadd.f32 %v4396_v43, %v10151_v31 }
 0x313   : > { %v10290_v42 = vpop.f32.mrf.mxu0  ;;  %v8176_v50 = vpop.f32.mrf.mxu1 }
 0x314   : > { %v10293_v5 = vadd.f32 %v8176_v50, %v10158_v58 }
 0x315   : > { %v10295_v56 = vpop.f32.mrf.mxu0  ;;  %v4409_v63 = vpop.f32.mrf.mxu1 }
 0x316   : > { %v10298_v14 = vadd.f32 %v4409_v63, %v10164_v1 }
 0x317   : > { %v10300_v8 = vpop.f32.mrf.mxu0  ;;  %v8177_v37 = vpop.f32.mrf.mxu1 }
 0x318   : > { %v10303_v32 = vadd.f32 %v8177_v37, %v10172_v44 }
 0x319   : > { %v10305_v31 = vpop.f32.mrf.mxu0  ;;  %v4412_v62 = vpop.f32.mrf.mxu1 }
 0x31a   : > { %10827 = vst [vmem:[#allocation14_spill] sm:$0xff] %v10303_v32  ;;  %v10308_v15 = vadd.f32 %v4412_v62, %v10182_v40 }
 0x31b   : > { %v10310_v58 = vpop.f32.mrf.mxu0  ;;  %v8180_v46 = vpop.f32.mrf.mxu1 }
 0x31c   : > { %10828 = vst [vmem:[#allocation15_spill] sm:$0xff] %v10308_v15  ;;  %v10313_v20 = vadd.f32 %v8180_v46, %v10188_v59 }
 0x31d   : > { %v10315_v1 = vpop.f32.mrf.mxu0  ;;  %v4425_v38 = vpop.f32.mrf.mxu1 }
 0x31e   : > { %10829 = vst [vmem:[#allocation16_spill] sm:$0xff] %v10313_v20  ;;  %v10318_v57 = vadd.f32 %v4425_v38, %v10192_v11 }
 0x31f   : > { %v10320_v44 = vpop.f32.mrf.mxu0  ;;  %v8181_v4 = vpop.f32.mrf.mxu1 }
 0x320   : > { %10830 = vst [vmem:[#allocation17_spill] sm:$0xff] %v10318_v57  ;;  %v10323_v25 = vadd.f32 %v8181_v4, %v10198_v35 }
 0x321   : > { %v10325_v40 = vpop.f32.mrf.mxu0  ;;  %v4428_v29 = vpop.f32.mrf.mxu1 }
 0x322   : > { %10831 = vst [vmem:[#allocation18_spill] sm:$0xff] %v10323_v25  ;;  %v10328_v60 = vadd.f32 %v4428_v29, %v10206_v18 }
 0x323   : > { %v10330_v59 = vpop.f32.mrf.mxu0  ;;  %v8184_v22 = vpop.f32.mrf.mxu1 }
 0x324   : > { %10832 = vst [vmem:[#allocation19_spill] sm:$0xff] %v10328_v60  ;;  %v10333_v13 = vadd.f32 %v8184_v22, %v10212_v36 }
 0x325   : > { %v10335_v11 = vpop.f32.mrf.mxu0  ;;  %v4441_v51 = vpop.f32.mrf.mxu1 }
 0x326   : > { %10833 = vst [vmem:[#allocation20_spill] sm:$0xff] %v10333_v13  ;;  %v10338_v45 = vadd.f32 %v4441_v51, %v10220_v19 }
 0x327   : > { %v10340_v35 = vpop.f32.mrf.mxu0  ;;  %v8185_v6 = vpop.f32.mrf.mxu1 }
 0x328   : > { %10834 = vst [vmem:[#allocation21_spill] sm:$0xff] %v10338_v45  ;;  %10835 = vst [vmem:[#allocation22_spill] sm:$0xff] %v10340_v35  ;;  %v10343_v12 = vadd.f32 %v8185_v6, %v10224_v17 }
 0x329   : > { %v10345_v18 = vpop.f32.mrf.mxu0  ;;  %v4444_v55 = vpop.f32.mrf.mxu1 }
 0x32a   : > { %10836 = vst [vmem:[#allocation23_spill] sm:$0xff] %v10343_v12  ;;  %10837 = vst [vmem:[#allocation24_spill] sm:$0xff] %v10345_v18  ;;  %v10348_v43 = vadd.f32 %v4444_v55, %v10227_v61 }
 0x32b   : > { %v10350_v36 = vpop.f32.mrf.mxu0  ;;  %v8188_v50 = vpop.f32.mrf.mxu1 }
 0x32c   : > { %10838 = vst [vmem:[#allocation25_spill] sm:$0xff] %v10348_v43  ;;  %10839 = vst [vmem:[#allocation26_spill] sm:$0xff] %v10350_v36  ;;  %v10353_v63 = vadd.f32 %v8188_v50, %v10230_v49 }
 0x32d   : > { %v10355_v19 = vpop.f32.mrf.mxu0  ;;  %v4457_v37 = vpop.f32.mrf.mxu1 }
 0x32e   : > { %10840 = vst [vmem:[#allocation27_spill] sm:$0xff] %v10353_v63  ;;  %10841 = vst [vmem:[#allocation28_spill] sm:$0xff] %v10355_v19  ;;  %v10358_v62 = vadd.f32 %v4457_v37, %v10235_v0 }
 0x32f   : > { %v10360_v17 = vpop.f32.mrf.mxu0  ;;  %v8189_v46 = vpop.f32.mrf.mxu1 }
 0x330   : > { %10842 = vst [vmem:[#allocation29_spill] sm:$0xff] %v10358_v62  ;;  %10843 = vst [vmem:[#allocation30_spill] sm:$0xff] %v10360_v17  ;;  %v10363_v38 = vadd.f32 %v8189_v46, %v10240_v53 }
 0x331   : > { %v10365_v61 = vpop.f32.mrf.mxu0  ;;  %v4460_v4 = vpop.f32.mrf.mxu1 }
 0x332   : > { %10844 = vst [vmem:[#allocation31_spill] sm:$0xff] %v10363_v38  ;;  %10845 = vst [vmem:[#allocation32_spill] sm:$0xff] %v10365_v61  ;;  %v10368_v29 = vadd.f32 %v4460_v4, %v10245_v3 }
 0x333   : > { %v10370_v49 = vpop.f32.mrf.mxu0 }
 0x334   : > { %10846 = vst [vmem:[#allocation33_spill] sm:$0xff] %v10368_v29  ;;  %10847 = vst [vmem:[#allocation34_spill] sm:$0xff] %v10370_v49 }
 0x335   : > { %v10372_v22 = vpop.f32.mrf.mxu0 }
 0x336   : > { %10848 = vst [vmem:[#allocation35_spill] sm:$0xff] %v10372_v22  ;;  %v8192_v51 = vpop.f32.mrf.mxu1 }
 0x337   : > { %v10374_v6 = vpop.f32.mrf.mxu0  ;;  %v10377_v0 = vadd.f32 %v8192_v51, %v10250_v23 }
 0x338   : > { %10849 = vst [vmem:[#allocation36_spill] sm:$0xff] %v10374_v6  ;;  %v4473_v55 = vpop.f32.mrf.mxu1 }
 0x339   : > { %10850 = vst [vmem:[#allocation37_spill] sm:$0xff] %v10377_v0  ;;  %v10379_v50 = vpop.f32.mrf.mxu0  ;;  %v10382_v53 = vadd.f32 %v4473_v55, %v10255_v54 }
 0x33a   : > { %10851 = vst [vmem:[#allocation38_spill] sm:$0xff] %v10379_v50  ;;  %v8193_v37 = vpop.f32.mrf.mxu1 }
 0x33b   : > { %10852 = vst [vmem:[#allocation39_spill] sm:$0xff] %v10382_v53  ;;  %v10384_v46 = vpop.f32.mrf.mxu0  ;;  %v10387_v3 = vadd.f32 %v8193_v37, %v10260_v41 }
 0x33c   : > { %10853 = vst [vmem:[#allocation40_spill] sm:$0xff] %v10384_v46  ;;  %v4476_v4 = vpop.f32.mrf.mxu1 }
 0x33d   : > { %10854 = vst [vmem:[#allocation41_spill] sm:$0xff] %v10387_v3  ;;  %v10389_v29 = vpop.f32.mrf.mxu0  ;;  %v10392_v38 = vadd.f32 %v4476_v4, %v10265_v24 }
 0x33e   : > { %10855 = vst [vmem:[#allocation42_spill] sm:$0xff] %v10389_v29  ;;  %v8260_v23 = vpop.f32.mrf.mxu1 }
 0x33f   : > { %10856 = vst [vmem:[#allocation43_spill] sm:$0xff] %v10392_v38  ;;  %v10394_v51 = vpop.f32.mrf.mxu0 }
 0x340   : > { %10857 = vst [vmem:[#allocation44_spill] sm:$0xff] %v10394_v51  ;;  %v5406_v0 = vpop.f32.mrf.mxu1 }
 0x341   : > { %v10396_v62 = vpop.f32.mrf.mxu0 }
 0x342   : > { %10858 = vst [vmem:[#allocation45_spill] sm:$0xff] %v10396_v62  ;;  %v8261_v54 = vpop.f32.mrf.mxu1 }
 0x343   : > { %v10398_v55 = vpop.f32.mrf.mxu0 }
 0x344   : > { %10859 = vst [vmem:[#allocation46_spill] sm:$0xff] %v10398_v55  ;;  %v10400_v53 = vpop.f32.mrf.mxu1 }
 0x345   : > { %v10402_v46 = vpop.f32.mrf.mxu0 }
 0x346   : > { %10860 = vst [vmem:[#allocation47_spill] sm:$0xff] %v10402_v46  ;;  %v10404_v41 = vpop.f32.mrf.mxu1 }
 0x347   : > { %v10406_v37 = vpop.f32.mrf.mxu0 }
 0x348   : > { %10861 = vst [vmem:[#allocation48_spill] sm:$0xff] %v10406_v37  ;;  %v10408_v3 = vpop.f32.mrf.mxu1 }
 0x349   : > { %v10410_v24 = vpop.f32.mrf.mxu0 }
 0x34a   : > { %10862 = vst [vmem:[#allocation49_spill] sm:$0xff] %v10410_v24  ;;  %v10412_v4 = vpop.f32.mrf.mxu1 }
 0x34b   : > { %v8308_v38 = vpop.f32.mrf.mxu0 }
 0x34c   : > { %v10414_v51 = vpop.f32.mrf.mxu1 }
 0x34d   : > { %v6224_v62 = vpop.f32.mrf.mxu0 }
 0x34e   : > { %v10416_v29 = vpop.f32.mrf.mxu1 }
 0x34f   : > { %v8309_v55 = vpop.f32.mrf.mxu0 }
 0x350   : > { %v10418_v63 = vpop.f32.mrf.mxu1 }
 0x351   : > { %v6227_v46 = vpop.f32.mrf.mxu0 }
 0x352   : > { %v10420_v50 = vpop.f32.mrf.mxu1 }
 0x353   : > { %v10422_v43 = vpop.f32.mrf.mxu0 }
 0x354   : > { %v10424_v37 = vpop.f32.mrf.mxu1 }
 0x355   : > { %v10426_v6 = vpop.f32.mrf.mxu0 }
 0x356   : > { %v10428_v24 = vpop.f32.mrf.mxu1 }
 0x357   : > { %v10432_v22 = vpop.f32.mrf.mxu0 }
 0x358   : > { %v10430_v12 = vpop.f32.mrf.mxu1 }
 0x359   : > { %10863 = vst [vmem:[#allocation50_spill] sm:$0xff] %v10430_v12  ;;  %v10438_v13 = vpop.f32.mrf.mxu0 }
 0x35a   : > { %v10434_v45 = vpop.f32.mrf.mxu1 }
 0x35b   : > { %10864 = vst [vmem:[#allocation51_spill] sm:$0xff] %v10434_v45  ;;  %v10444_v17 = vpop.f32.mrf.mxu0 }
 0x35c   : > { %v10436_v49 = vpop.f32.mrf.mxu1 }
 0x35d   : > { %10865 = vst [vmem:[#allocation52_spill] sm:$0xff] %v10436_v49  ;;  %v10450_v57 = vpop.f32.mrf.mxu0 }
 0x35e   : > { %v10440_v61 = vpop.f32.mrf.mxu1 }
 0x35f   : > { %10866 = vst [vmem:[#allocation53_spill] sm:$0xff] %v10440_v61  ;;  %v10456_v45 = vpop.f32.mrf.mxu0 }
 0x360   : > { %v10442_v60 = vpop.f32.mrf.mxu1 }
 0x361   : > { %10867 = vst [vmem:[#allocation54_spill] sm:$0xff] %v10442_v60  ;;  %v10462_v61 = vpop.f32.mrf.mxu0 }
 0x362   : > { %v10446_v25 = vpop.f32.mrf.mxu1 }
 0x363   : > { %10868 = vst [vmem:[#allocation55_spill] sm:$0xff] %v10446_v25  ;;  %v10468_v25 = vpop.f32.mrf.mxu0 }
 0x364   : > { %v10448_v19 = vpop.f32.mrf.mxu1  ;;  %10876 = vst [vmem:[#allocation63_spill] sm:$0xff] %v10468_v25 }
 0x365   : > { %10869 = vst [vmem:[#allocation56_spill] sm:$0xff] %v10448_v19 }
 0x366   : > { %v10452_v36 = vpop.f32.mrf.mxu1 }
 0x367   : > { %10870 = vst [vmem:[#allocation57_spill] sm:$0xff] %v10452_v36  ;;  %v10474_v36 = vpop.f32.mrf.mxu0 }
 0x368   : > { %v10454_v20 = vpop.f32.mrf.mxu1  ;;  %10879 = vst [vmem:[#allocation66_spill] sm:$0xff] %v10474_v36 }
 0x369   : > { %10871 = vst [vmem:[#allocation58_spill] sm:$0xff] %v10454_v20 }
 0x36a   : > { %v10458_v49 = vpop.f32.mrf.mxu1 }
 0x36b   : > { %10872 = vst [vmem:[#allocation59_spill] sm:$0xff] %v10458_v49  ;;  %v10480_v49 = vpop.f32.mrf.mxu0 }
 0x36c   : > { %v10460_v18 = vpop.f32.mrf.mxu1  ;;  %10882 = vst [vmem:[#allocation69_spill] sm:$0xff] %v10480_v49 }
 0x36d   : > { %10873 = vst [vmem:[#allocation60_spill] sm:$0xff] %v10460_v18 }
 0x36e   : > { %v10464_v60 = vpop.f32.mrf.mxu1 }
 0x36f   : > { %10874 = vst [vmem:[#allocation61_spill] sm:$0xff] %v10464_v60  ;;  %v5084_v60 = vadd.f32 %v10270_v2, %v10233_v10  ;;  %v10499_v10 = vld [vmem:[%s10787_s5] ss:$0 sm:$0xff]  ;;  %v5083_v2 = vadd.f32 %v10285_v7, %v10248_v30  ;;  %v5088_v30 = vadd.f32 %v10290_v42, %v10253_v26 }
 0x370   : > { %v10466_v15 = vpop.f32.mrf.mxu1 }
 0x371   : > { %10875 = vst [vmem:[#allocation62_spill] sm:$0xff] %v10466_v15  ;;  %v10486_v15 = vpop.f32.mrf.mxu0 }
 0x372   : > { %v10470_v19 = vpop.f32.mrf.mxu1 }
 0x373   : > { %10877 = vst [vmem:[#allocation64_spill] sm:$0xff] %v10470_v19  ;;  %v5535_v19 = vadd.f32 %v8260_v23, %v5084_v60  ;;  %v10494_v32 = vpop.f32.mrf.mxu0  ;;  %v5089_v23 = vadd.f32 %v10300_v8, %v10263_v16 }
 0x374   : > { %v10472_v12 = vpop.f32.mrf.mxu1 }
 0x375   : > { %10878 = vst [vmem:[#allocation65_spill] sm:$0xff] %v10472_v12  ;;  %v5082_v12 = vadd.f32 %v10275_v48, %v10238_v21 }
 0x376   : > { %v10476_v20 = vpop.f32.mrf.mxu1 }
 0x377   : > { %10880 = vst [vmem:[#allocation67_spill] sm:$0xff] %v10476_v20  ;;  %v5085_v20 = vadd.f32 %v10280_v52, %v10243_v9  ;;  %v5533_v36 = vadd.f32 %v5406_v0, %v5082_v12  ;;  %v10506_v9 = vld [vmem:[%s10788_s6] ss:$0 sm:$0xff]  ;;  %v5534_v52 = vadd.f32 %v10400_v53, %v5083_v2  ;;  %v10509_v12 = vpop.f32.mrf.mxu0  ;;  %v5087_v2 = vadd.f32 %v10305_v31, %v10268_v27 }
 0x378   : > { %v10478_v35 = vpop.f32.mrf.mxu1 }
 0x379   : > { %10881 = vst [vmem:[#allocation68_spill] sm:$0xff] %v10478_v35  ;;  %v6353_v35 = vadd.f32 %v8308_v38, %v5535_v19  ;;  %v10519_v53 = vpop.f32.mrf.mxu0 }
 0x37a   : > { %v10482_v18 = vpop.f32.mrf.mxu1 }
 0x37b   : > { %10883 = vst [vmem:[#allocation70_spill] sm:$0xff] %v10482_v18  ;;  %v6351_v18 = vadd.f32 %v6224_v62, %v5533_v36  ;;  %v10534_v16 = vpop.f32.mrf.mxu0 }
 0x37c   : > { %v10488_v25 = vpop.f32.mrf.mxu1 }
 0x37d   : > { %10884 = vst [vmem:[#allocation71_spill] sm:$0xff] %v10488_v25  ;;  %v5536_v25 = vadd.f32 %v8261_v54, %v5085_v20  ;;  %v6352_v20 = vadd.f32 %v6227_v46, %v5534_v52 }
 0x37f   : > { %v6354_v60 = vadd.f32 %v8309_v55, %v5536_v25  ;;  %v5539_v25 = vadd.f32 %v10404_v41, %v5088_v30  ;;  %v5090_v30 = vadd.f32 %v10315_v1, %v10278_v28 }
 0x381   : > { %v6357_v55 = vadd.f32 %v10422_v43, %v5539_v25 }
 0x382   : > { %v8356_v49 = vpop.f32.mrf.mxu1 }
 0x383   : > { %v6947_v21 = vadd.f32 %v8356_v49, %v6353_v35  ;;  %v5086_v49 = vadd.f32 %v10295_v56, %v10258_v33 }
 0x384   : > { %v6818_v48 = vpop.f32.mrf.mxu1 }
 0x385   : > { %v7050_v19 = vmul.f32 %v10499_v10, %v6947_v21  ;;  %v6945_v38 = vadd.f32 %v6818_v48, %v6351_v18  ;;  %v5537_v54 = vadd.f32 %v10408_v3, %v5086_v49  ;;  %v5540_v21 = vadd.f32 %v10412_v4, %v5089_v23 }
 0x386   : > { %v8357_v7 = vpop.f32.mrf.mxu1  ;;  %v5096_v23 = vadd.f32 %v10330_v59, %v10293_v5 }
 0x387   : > { %v7089_v35 = vadd.f32 %v10506_v9, %v7050_v19  ;;  %v7048_v36 = vmul.f32 %v10499_v10, %v6945_v38  ;;  %v6948_v62 = vadd.f32 %v8357_v7, %v6354_v60  ;;  %v6355_v52 = vadd.f32 %v10426_v6, %v5537_v54 }
 0x388   : > { %v6821_v0 = vpop.f32.mrf.mxu1  ;;  %v5092_v60 = vadd.f32 %v10310_v58, %v10273_v39  ;;  %v5538_v19 = vadd.f32 %v10414_v51, %v5087_v2  ;;  %v6358_v27 = vadd.f32 %v10432_v22, %v5540_v21  ;;  %v5093_v51 = vadd.f32 %v10320_v44, %v10283_v34 }
 0x389   : > { %v7121_v18 = vmax.f32 %v7089_v35, 0.0  ;;  %v7087_v26 = vadd.f32 %v10506_v9, %v7048_v36  ;;  %v7051_v42 = vmul.f32 %v10499_v10, %v6948_v62  ;;  %v6946_v46 = vadd.f32 %v6821_v0, %v6352_v20  ;;  %v10548_v36 = vpop.f32.mrf.mxu0 }
 0x38a   : > { %v5543_v7 = vadd.f32 %v10416_v29, %v5092_v60  ;;  %v6356_v35 = vadd.f32 %v10438_v13, %v5538_v19  ;;  %v5541_v62 = vadd.f32 %v10418_v63, %v5090_v30  ;;  %v5091_v0 = vadd.f32 %v10325_v40, %v10288_v47  ;;  %v10891_v30 = vld [vmem:[#allocation51_spill] sm:$0xff] }
 0x38b   : > { %7153 = vst [vmem:[%s8956_s20 + $0x10] sm:$0xff] %v7121_v18  ;;  %v7119_v33 = vmax.f32 %v7087_v26, 0.0  ;;  %v7090_v56 = vadd.f32 %v10506_v9, %v7051_v42  ;;  %v7049_v41 = vmul.f32 %v10499_v10, %v6946_v46  ;;  %v8360_v48 = vpop.f32.mrf.mxu1  ;;  %v5544_v18 = vadd.f32 %v10420_v50, %v5093_v51  ;;  %v10563_v44 = vpop.f32.mrf.mxu0 }
 0x38c   : > { %v6951_v3 = vadd.f32 %v8360_v48, %v6357_v55  ;;  %v6361_v28 = vadd.f32 %v10444_v17, %v5543_v7  ;;  %v6359_v26 = vadd.f32 %v10450_v57, %v5541_v62  ;;  %v5542_v47 = vadd.f32 %v10424_v37, %v5091_v0  ;;  %v10896_v0 = vld [vmem:[#allocation69_spill] sm:$0xff] }
 0x38d   : > { %7151 = vst [vmem:[%s8956_s20] sm:$0xff] %v7119_v33  ;;  %v7122_v8 = vmax.f32 %v7090_v56, 0.0  ;;  %v7088_v43 = vadd.f32 %v10506_v9, %v7049_v41  ;;  %v6834_v38 = vpop.f32.mrf.mxu1  ;;  %v6362_v40 = vadd.f32 %v10456_v45, %v5544_v18  ;;  %v5094_v56 = vadd.f32 %v10335_v11, %v10298_v14  ;;  %v10579_v37 = vpop.f32.mrf.mxu0  ;;  %v10888_v11 = vld [vmem:[#allocation63_spill] sm:$0xff] }
 0x38e   : > { %v7054_v6 = vmul.f32 %v10499_v10, %v6951_v3  ;;  %v6949_v4 = vadd.f32 %v6834_v38, %v6355_v52  ;;  %v5547_v41 = vadd.f32 %v10428_v24, %v5096_v23  ;;  %v6360_v5 = vadd.f32 %v10462_v61, %v5542_v47  ;;  %v10885_v52 = vld [vmem:[#allocation14_spill] sm:$0xff]  ;;  %v10898_v23 = vld [vmem:[#allocation28_spill] sm:$0xff] }
 0x38f   : > { %7154 = vst [vmem:[%s8956_s20 + $0x18] sm:$0xff] %v7122_v8  ;;  %v7120_v31 = vmax.f32 %v7088_v43, 0.0  ;;  %v8361_v20 = vpop.f32.mrf.mxu1  ;;  %v10886_v8 = vld [vmem:[#allocation22_spill] sm:$0xff] }
 0x390   : > { %v7093_v39 = vadd.f32 %v10506_v9, %v7054_v6  ;;  %v7052_v58 = vmul.f32 %v10499_v10, %v6949_v4  ;;  %v6952_v22 = vadd.f32 %v8361_v20, %v6358_v27  ;;  %v5097_v43 = vadd.f32 %v10886_v8, %v10885_v52  ;;  %v10887_v3 = vld [vmem:[#allocation50_spill] sm:$0xff]  ;;  %v10890_v6 = vld [vmem:[#allocation24_spill] sm:$0xff] }
 0x391   : > { %7152 = vst [vmem:[%s8956_s20 + $0x8] sm:$0xff] %v7120_v31  ;;  %v6837_v1 = vpop.f32.mrf.mxu1  ;;  %v5545_v14 = vadd.f32 %v10887_v3, %v5094_v56  ;;  %v6365_v24 = vadd.f32 %v10888_v11, %v5547_v41  ;;  %v10889_v31 = vld [vmem:[#allocation15_spill] sm:$0xff]  ;;  %v10892_v20 = vld [vmem:[#allocation66_spill] sm:$0xff] }
 0x392   : > { %v7125_v29 = vmax.f32 %v7093_v39, 0.0  ;;  %v7091_v13 = vadd.f32 %v10506_v9, %v7052_v58  ;;  %v7055_v49 = vmul.f32 %v10499_v10, %v6952_v22  ;;  %v6950_v25 = vadd.f32 %v6837_v1, %v6356_v35  ;;  %v10595_v58 = vpop.f32.mrf.mxu0  ;;  %v10893_v1 = vld [vmem:[#allocation16_spill] sm:$0xff]  ;;  %v10903_v11 = vld [vmem:[#allocation19_spill] sm:$0xff] }
 0x393   : > { %v8364_v34 = vpop.f32.mrf.mxu1  ;;  %v5095_v4 = vadd.f32 %v10890_v6, %v10889_v31  ;;  %v5548_v7 = vadd.f32 %v10891_v30, %v5097_v43  ;;  %v6363_v35 = vadd.f32 %v10892_v20, %v5545_v14  ;;  %v10907_v20 = vld [vmem:[#allocation34_spill] sm:$0xff] }
 0x394   : > { %7157 = vst [vmem:[%s8956_s20 + $0x30] sm:$0xff] %v7125_v29  ;;  %v7123_v63 = vmax.f32 %v7091_v13, 0.0  ;;  %v7094_v17 = vadd.f32 %v10506_v9, %v7055_v49  ;;  %v7053_v42 = vmul.f32 %v10499_v10, %v6950_v25  ;;  %v6955_v46 = vadd.f32 %v8364_v34, %v6361_v28  ;;  %v10894_v29 = vld [vmem:[#allocation26_spill] sm:$0xff]  ;;  %v10895_v49 = vld [vmem:[#allocation52_spill] sm:$0xff] }
 0x395   : > { %v6850_v50 = vpop.f32.mrf.mxu1  ;;  %v5100_v13 = vadd.f32 %v10894_v29, %v10893_v1  ;;  %v5546_v25 = vadd.f32 %v10895_v49, %v5095_v4  ;;  %v6366_v18 = vadd.f32 %v10896_v0, %v5548_v7  ;;  %v10906_v7 = vld [vmem:[#allocation20_spill] sm:$0xff]  ;;  %v10910_v49 = vld [vmem:[#allocation35_spill] sm:$0xff]  ;;  %v10911_v0 = vld [vmem:[#allocation57_spill] sm:$0xff] }
 0x396   : > { %7155 = vst [vmem:[%s8956_s20 + $0x20] sm:$0xff] %v7123_v63  ;;  %v7126_v57 = vmax.f32 %v7094_v17, 0.0  ;;  %v7092_v54 = vadd.f32 %v10506_v9, %v7053_v42  ;;  %v7058_v55 = vmul.f32 %v10499_v10, %v6955_v46  ;;  %v6953_v33 = vadd.f32 %v6850_v50, %v6359_v26  ;;  %v10897_v46 = vld [vmem:[#allocation17_spill] sm:$0xff] }
 0x397   : > { %v8365_v59 = vpop.f32.mrf.mxu1  ;;  %v5098_v47 = vadd.f32 %v10898_v23, %v10897_v46  ;;  %v10912_v23 = vld [vmem:[#allocation23_spill] sm:$0xff] }
 0x398   : > { %7158 = vst [vmem:[%s8956_s20 + $0x38] sm:$0xff] %v7126_v57  ;;  %v7124_v45 = vmax.f32 %v7092_v54, 0.0  ;;  %v7097_v2 = vadd.f32 %v10506_v9, %v7058_v55  ;;  %v7056_v21 = vmul.f32 %v10499_v10, %v6953_v33  ;;  %v6956_v48 = vadd.f32 %v8365_v59, %v6362_v40  ;;  %v10899_v40 = vld [vmem:[#allocation53_spill] sm:$0xff]  ;;  %v10611_v55 = vpop.f32.mrf.mxu0  ;;  %v10900_v59 = vld [vmem:[#allocation18_spill] sm:$0xff] }
 0x399   : > { %v6853_v60 = vpop.f32.mrf.mxu1  ;;  %v5551_v50 = vadd.f32 %v10899_v40, %v5100_v13  ;;  %v6364_v57 = vadd.f32 %v10486_v15, %v5546_v25  ;;  %v10909_v13 = vld [vmem:[#allocation21_spill] sm:$0xff] }
 0x39a   : > { %7156 = vst [vmem:[%s8956_s20 + $0x28] sm:$0xff] %v7124_v45  ;;  %v7129_v61 = vmax.f32 %v7097_v2, 0.0  ;;  %v7095_v19 = vadd.f32 %v10506_v9, %v7056_v21  ;;  %v7059_v38 = vmul.f32 %v10499_v10, %v6956_v48  ;;  %v6954_v27 = vadd.f32 %v6853_v60, %v6360_v5  ;;  %v10901_v45 = vld [vmem:[#allocation30_spill] sm:$0xff]  ;;  %v10627_v31 = vpop.f32.mrf.mxu0 }
 0x39b   : > { %v8368_v39 = vpop.f32.mrf.mxu1  ;;  %v5101_v2 = vadd.f32 %v10901_v45, %v10900_v59  ;;  %v10902_v21 = vld [vmem:[#allocation54_spill] sm:$0xff]  ;;  %v6369_v52 = vadd.f32 %v10494_v32, %v5551_v50  ;;  %v5102_v25 = vadd.f32 %v10910_v49, %v10909_v13  ;;  %v10915_v59 = vld [vmem:[#allocation25_spill] sm:$0xff]  ;;  %v10925_v13 = vld [vmem:[#allocation44_spill] sm:$0xff] }
 0x39c   : > { %7161 = vst [vmem:[%s8956_s20 + $0x50] sm:$0xff] %v7129_v61  ;;  %v7127_v22 = vmax.f32 %v7095_v19, 0.0  ;;  %v7098_v51 = vadd.f32 %v10506_v9, %v7059_v38  ;;  %v7057_v62 = vmul.f32 %v10499_v10, %v6954_v27  ;;  %v6959_v28 = vadd.f32 %v8368_v39, %v6365_v24  ;;  %v10904_v24 = vld [vmem:[#allocation32_spill] sm:$0xff]  ;;  %v10905_v61 = vld [vmem:[#allocation55_spill] sm:$0xff]  ;;  %v10914_v50 = vld [vmem:[#allocation58_spill] sm:$0xff] }
 0x39d   : > { %v6866_v26 = vpop.f32.mrf.mxu1  ;;  %v5549_v48 = vadd.f32 %v10902_v21, %v5098_v47  ;;  %v5099_v60 = vadd.f32 %v10904_v24, %v10903_v11  ;;  %v5552_v19 = vadd.f32 %v10905_v61, %v5101_v2  ;;  %v10908_v39 = vld [vmem:[#allocation56_spill] sm:$0xff]  ;;  %v10916_v45 = vld [vmem:[#allocation38_spill] sm:$0xff]  ;;  %v10917_v21 = vld [vmem:[#allocation59_spill] sm:$0xff] }
 0x39e   : > { %7159 = vst [vmem:[%s8956_s20 + $0x40] sm:$0xff] %v7127_v22  ;;  %v7130_v34 = vmax.f32 %v7098_v51, 0.0  ;;  %v7096_v63 = vadd.f32 %v10506_v9, %v7057_v62  ;;  %v7062_v17 = vmul.f32 %v10499_v10, %v6959_v28  ;;  %v6957_v42 = vadd.f32 %v6866_v26, %v6363_v35  ;;  %v10913_v47 = vld [vmem:[#allocation36_spill] sm:$0xff]  ;;  %v10918_v11 = vld [vmem:[#allocation27_spill] sm:$0xff] }
 0x39f   : > { %v8369_v54 = vpop.f32.mrf.mxu1  ;;  %v6367_v38 = vadd.f32 %v10509_v12, %v5549_v48  ;;  %v5104_v35 = vadd.f32 %v10907_v20, %v10906_v7  ;;  %v5550_v22 = vadd.f32 %v10908_v39, %v5099_v60  ;;  %v6370_v51 = vadd.f32 %v10519_v53, %v5552_v19  ;;  %v10919_v24 = vld [vmem:[#allocation40_spill] sm:$0xff]  ;;  %v10922_v7 = vld [vmem:[#allocation42_spill] sm:$0xff] }
 0x3a0   : > { %7162 = vst [vmem:[%s8956_s20 + $0x58] sm:$0xff] %v7130_v34  ;;  %v7128_v33 = vmax.f32 %v7096_v63, 0.0  ;;  %v7101_v56 = vadd.f32 %v10506_v9, %v7062_v17  ;;  %v7060_v41 = vmul.f32 %v10499_v10, %v6957_v42  ;;  %v6960_v5 = vadd.f32 %v8369_v54, %v6366_v18  ;;  %v10643_v63 = vpop.f32.mrf.mxu0  ;;  %v10920_v61 = vld [vmem:[#allocation60_spill] sm:$0xff] }
 0x3a1   : > { %v6869_v8 = vpop.f32.mrf.mxu1  ;;  %v5555_v18 = vadd.f32 %v10911_v0, %v5104_v35  ;;  %v6368_v26 = vadd.f32 %v10534_v16, %v5550_v22  ;;  %v5105_v40 = vadd.f32 %v10913_v47, %v10912_v23  ;;  %v5103_v2 = vadd.f32 %v10916_v45, %v10915_v59  ;;  %v10923_v35 = vld [vmem:[#allocation61_spill] sm:$0xff]  ;;  %v10929_v47 = vld [vmem:[#allocation64_spill] sm:$0xff] }
 0x3a2   : > { %7160 = vst [vmem:[%s8956_s20 + $0x48] sm:$0xff] %v7128_v33  ;;  %v7133_v15 = vmax.f32 %v7101_v56, 0.0  ;;  %v7099_v43 = vadd.f32 %v10506_v9, %v7060_v41  ;;  %v7063_v3 = vmul.f32 %v10499_v10, %v6960_v5  ;;  %v6958_v14 = vadd.f32 %v6869_v8, %v6364_v57  ;;  %v10932_v45 = vld [vmem:[#allocation65_spill] sm:$0xff] }
 0x3a3   : > { %v8372_v27 = vpop.f32.mrf.mxu1  ;;  %v5553_v57 = vadd.f32 %v10914_v50, %v5102_v25  ;;  %v6373_v54 = vadd.f32 %v10548_v36, %v5555_v18  ;;  %v5556_v48 = vadd.f32 %v10917_v21, %v5105_v40  ;;  %v5108_v60 = vadd.f32 %v10919_v24, %v10918_v11  ;;  %v10926_v25 = vld [vmem:[#allocation62_spill] sm:$0xff]  ;;  %v10935_v11 = vld [vmem:[#allocation67_spill] sm:$0xff] }
 0x3a4   : > { %7165 = vst [vmem:[%s8956_s20 + $0x70] sm:$0xff] %v7133_v15  ;;  %v7131_v32 = vmax.f32 %v7099_v43, 0.0  ;;  %v7102_v6 = vadd.f32 %v10506_v9, %v7063_v3  ;;  %v7061_v4 = vmul.f32 %v10499_v10, %v6958_v14  ;;  %v6963_v30 = vadd.f32 %v8372_v27, %v6369_v52  ;;  %v6323_v15 = vpop.f32.mrf.mxu0 }
 0x3a5   : > { %v6882_v62 = vpop.f32.mrf.mxu1  ;;  %v6371_v52 = vadd.f32 %v10563_v44, %v5553_v57  ;;  %v5554_v19 = vadd.f32 %v10920_v61, %v5103_v2  ;;  %v5559_v39 = vadd.f32 %v10923_v35, %v5108_v60 }
 0x3a6   : > { %7163 = vst [vmem:[%s8956_s20 + $0x60] sm:$0xff] %v7131_v32  ;;  %v7134_v12 = vmax.f32 %v7102_v6, 0.0  ;;  %v7100_v28 = vadd.f32 %v10506_v9, %v7061_v4  ;;  %v7066_v1 = vmul.f32 %v10499_v10, %v6963_v30  ;;  %v6961_v29 = vadd.f32 %v6882_v62, %v6367_v38  ;;  %v10921_v30 = vld [vmem:[#allocation29_spill] sm:$0xff]  ;;  %v8336_v62 = vpop.f32.mrf.mxu0 }
 0x3a7   : > { %v8373_v34 = vpop.f32.mrf.mxu1  ;;  %v6374_v38 = vadd.f32 %v10579_v37, %v5556_v48  ;;  %v5106_v20 = vadd.f32 %v10922_v7, %v10921_v30  ;;  %v6372_v22 = vadd.f32 %v10595_v58, %v5554_v19  ;;  %v6377_v18 = vadd.f32 %v10611_v55, %v5559_v39  ;;  %v10938_v30 = vld [vmem:[#allocation68_spill] sm:$0xff] }
 0x3a8   : > { %7166 = vst [vmem:[%s8956_s20 + $0x78] sm:$0xff] %v7134_v12  ;;  %v7132_v53 = vmax.f32 %v7100_v28, 0.0  ;;  %v7105_v17 = vadd.f32 %v10506_v9, %v7066_v1  ;;  %v7064_v42 = vmul.f32 %v10499_v10, %v6961_v29  ;;  %v6964_v46 = vadd.f32 %v8373_v34, %v6370_v51  ;;  %v10924_v29 = vld [vmem:[#allocation31_spill] sm:$0xff] }
 0x3a9   : > { %v6885_v33 = vpop.f32.mrf.mxu1  ;;  %v5109_v49 = vadd.f32 %v10925_v13, %v10924_v29  ;;  %v5557_v0 = vadd.f32 %v10926_v25, %v5106_v20 }
 0x3aa   : > { %7164 = vst [vmem:[%s8956_s20 + $0x68] sm:$0xff] %v7132_v53  ;;  %v7137_v16 = vmax.f32 %v7105_v17, 0.0  ;;  %v7103_v56 = vadd.f32 %v10506_v9, %v7064_v42  ;;  %v7067_v41 = vmul.f32 %v10499_v10, %v6964_v46  ;;  %v6962_v5 = vadd.f32 %v6885_v33, %v6368_v26  ;;  %v10927_v42 = vld [vmem:[#allocation33_spill] sm:$0xff] }
 0x3ab   : > { %v8376_v8 = vpop.f32.mrf.mxu1  ;;  %v10928_v46 = vld [vmem:[#allocation45_spill] sm:$0xff]  ;;  %v5560_v40 = vadd.f32 %v10929_v47, %v5109_v49  ;;  %v6375_v50 = vadd.f32 %v10627_v31, %v5557_v0 }
 0x3ac   : > { %7169 = vst [vmem:[%s8956_s20 + $0x90] sm:$0xff] %v7137_v16  ;;  %v7135_v36 = vmax.f32 %v7103_v56, 0.0  ;;  %v7106_v43 = vadd.f32 %v10506_v9, %v7067_v41  ;;  %v7065_v3 = vmul.f32 %v10499_v10, %v6962_v5  ;;  %v6967_v14 = vadd.f32 %v8376_v8, %v6373_v54  ;;  %v6336_v54 = vpop.f32.mrf.mxu0  ;;  %v10930_v41 = vld [vmem:[#allocation37_spill] sm:$0xff]  ;;  %v10931_v5 = vld [vmem:[#allocation46_spill] sm:$0xff] }
 0x3ad   : > { %v6898_v27 = vpop.f32.mrf.mxu1  ;;  %v5107_v23 = vadd.f32 %v10928_v46, %v10927_v42  ;;  %v5112_v59 = vadd.f32 %v10931_v5, %v10930_v41  ;;  %v6378_v21 = vadd.f32 %v10643_v63, %v5560_v40 }
 0x3ae   : > { %7167 = vst [vmem:[%s8956_s20 + $0x80] sm:$0xff] %v7135_v36  ;;  %v7138_v44 = vmax.f32 %v7106_v43, 0.0  ;;  %v7104_v32 = vadd.f32 %v10506_v9, %v7065_v3  ;;  %v7070_v6 = vmul.f32 %v10499_v10, %v6967_v14  ;;  %v6965_v4 = vadd.f32 %v6898_v27, %v6371_v52  ;;  %v10933_v43 = vld [vmem:[#allocation39_spill] sm:$0xff]  ;;  %v8337_v19 = vpop.f32.mrf.mxu0 }
 0x3af   : > { %v8377_v51 = vpop.f32.mrf.mxu1  ;;  %v5558_v2 = vadd.f32 %v10932_v45, %v5107_v23  ;;  %v10934_v3 = vld [vmem:[#allocation47_spill] sm:$0xff]  ;;  %v5563_v24 = vadd.f32 %v10935_v11, %v5112_v59 }
 0x3b0   : > { %7170 = vst [vmem:[%s8956_s20 + $0x98] sm:$0xff] %v7138_v44  ;;  %v7136_v37 = vmax.f32 %v7104_v32, 0.0  ;;  %v7109_v12 = vadd.f32 %v10506_v9, %v7070_v6  ;;  %v7068_v28 = vmul.f32 %v10499_v10, %v6965_v4  ;;  %v6968_v1 = vadd.f32 %v8377_v51, %v6374_v38  ;;  %v10936_v32 = vld [vmem:[#allocation41_spill] sm:$0xff]  ;;  %v10937_v6 = vld [vmem:[#allocation48_spill] sm:$0xff]  ;;  %v6339_v25 = vpop.f32.mrf.mxu0 }
 0x3b1   : > { %v6901_v26 = vpop.f32.mrf.mxu1  ;;  %v5110_v14 = vadd.f32 %v10934_v3, %v10933_v43  ;;  %v6376_v60 = vadd.f32 %v6323_v15, %v5558_v2  ;;  %v5113_v4 = vadd.f32 %v10937_v6, %v10936_v32  ;;  %v6381_v20 = vadd.f32 %v8336_v62, %v5563_v24 }
 0x3b2   : > { %7168 = vst [vmem:[%s8956_s20 + $0x88] sm:$0xff] %v7136_v37  ;;  %v7141_v58 = vmax.f32 %v7109_v12, 0.0  ;;  %v7107_v34 = vadd.f32 %v10506_v9, %v7068_v28  ;;  %v7071_v53 = vmul.f32 %v10499_v10, %v6968_v1  ;;  %v6966_v17 = vadd.f32 %v6901_v26, %v6372_v22  ;;  %v10939_v37 = vld [vmem:[#allocation43_spill] sm:$0xff]  ;;  %v10940_v12 = vld [vmem:[#allocation49_spill] sm:$0xff]  ;;  %v10941_v1 = vld [vmem:[#allocation70_spill] sm:$0xff] }
 0x3b3   : > { %v8380_v57 = vpop.f32.mrf.mxu1  ;;  %v5561_v7 = vadd.f32 %v10938_v30, %v5110_v14  ;;  %v5111_v28 = vadd.f32 %v10940_v12, %v10939_v37  ;;  %v5564_v29 = vadd.f32 %v10941_v1, %v5113_v4 }
 0x3b4   : > { %7173 = vst [vmem:[%s8956_s20 + $0xb0] sm:$0xff] %v7141_v58  ;;  %v7139_v55 = vmax.f32 %v7107_v34, 0.0  ;;  %v7110_v33 = vadd.f32 %v10506_v9, %v7071_v53  ;;  %v7069_v16 = vmul.f32 %v10499_v10, %v6966_v17  ;;  %v6971_v56 = vadd.f32 %v8380_v57, %v6377_v18  ;;  %v10942_v58 = vld [vmem:[#allocation71_spill] sm:$0xff] }
 0x3b5   : > { %v6914_v48 = vpop.f32.mrf.mxu1  ;;  %v6379_v13 = vadd.f32 %v6336_v54, %v5561_v7  ;;  %v5562_v34 = vadd.f32 %v10942_v58, %v5111_v28  ;;  %v6382_v53 = vadd.f32 %v8337_v19, %v5564_v29 }
 0x3b6   : > { %7171 = vst [vmem:[%s8956_s20 + $0xa0] sm:$0xff] %v7139_v55  ;;  %v7142_v31 = vmax.f32 %v7110_v33, 0.0  ;;  %v7108_v52 = vadd.f32 %v10506_v9, %v7069_v16  ;;  %v7074_v8 = vmul.f32 %v10499_v10, %v6971_v56  ;;  %v6969_v36 = vadd.f32 %v6914_v48, %v6375_v50 }
 0x3b7   : > { %v8381_v61 = vpop.f32.mrf.mxu1  ;;  %v6380_v40 = vadd.f32 %v6339_v25, %v5562_v34 }
 0x3b8   : > { %7174 = vst [vmem:[%s8956_s20 + $0xb8] sm:$0xff] %v7142_v31  ;;  %v7140_v38 = vmax.f32 %v7108_v52, 0.0  ;;  %v7113_v63 = vadd.f32 %v10506_v9, %v7074_v8  ;;  %v7072_v27 = vmul.f32 %v10499_v10, %v6969_v36  ;;  %v6972_v44 = vadd.f32 %v8381_v61, %v6378_v21 }
 0x3b9   : > { %v6917_v35 = vpop.f32.mrf.mxu1 }
 0x3ba   : > { %7172 = vst [vmem:[%s8956_s20 + $0xa8] sm:$0xff] %v7140_v38  ;;  %v7145_v39 = vmax.f32 %v7113_v63, 0.0  ;;  %v7111_v15 = vadd.f32 %v10506_v9, %v7072_v27  ;;  %v7075_v22 = vmul.f32 %v10499_v10, %v6972_v44  ;;  %v6970_v51 = vadd.f32 %v6917_v35, %v6376_v60 }
 0x3bb   : > { %v8384_v49 = vpop.f32.mrf.mxu1 }
 0x3bc   : > { %7177 = vst [vmem:[%s8956_s20 + $0xd0] sm:$0xff] %v7145_v39  ;;  %v7143_v62 = vmax.f32 %v7111_v15, 0.0  ;;  %v7114_v0 = vadd.f32 %v10506_v9, %v7075_v22  ;;  %v7073_v18 = vmul.f32 %v10499_v10, %v6970_v51  ;;  %v6975_v26 = vadd.f32 %v8384_v49, %v6381_v20 }
 0x3bd   : > { %v6930_v17 = vpop.f32.mrf.mxu1 }
 0x3be   : > { %7175 = vst [vmem:[%s8956_s20 + $0xc0] sm:$0xff] %v7143_v62  ;;  %v7146_v42 = vmax.f32 %v7114_v0, 0.0  ;;  %v7112_v46 = vadd.f32 %v10506_v9, %v7073_v18  ;;  %v7078_v23 = vmul.f32 %v10499_v10, %v6975_v26  ;;  %v6973_v47 = vadd.f32 %v6930_v17, %v6379_v13 }
 0x3bf   : > { %v8385_v50 = vpop.f32.mrf.mxu1 }
 0x3c0   : > { %7178 = vst [vmem:[%s8956_s20 + $0xd8] sm:$0xff] %v7146_v42  ;;  %v7144_v57 = vmax.f32 %v7112_v46, 0.0  ;;  %v7117_v54 = vadd.f32 %v10506_v9, %v7078_v23  ;;  %v7076_v55 = vmul.f32 %v10499_v10, %v6973_v47  ;;  %v6976_v33 = vadd.f32 %v8385_v50, %v6382_v53 }
 0x3c1   : > { %v6933_v16 = vpop.f32.mrf.mxu1 }
 0x3c2   : > { %7176 = vst [vmem:[%s8956_s20 + $0xc8] sm:$0xff] %v7144_v57  ;;  %v7149_v56 = vmax.f32 %v7117_v54, 0.0  ;;  %v7115_v41 = vadd.f32 %v10506_v9, %v7076_v55  ;;  %v7079_v5 = vmul.f32 %v10499_v10, %v6976_v33  ;;  %v6974_v59 = vadd.f32 %v6933_v16, %v6380_v40 }
 0x3c4   : > { %7181 = vst [vmem:[%s8956_s20 + $0xf0] sm:$0xff] %v7149_v56  ;;  %v7147_v45 = vmax.f32 %v7115_v41, 0.0  ;;  %v7118_v2 = vadd.f32 %v10506_v9, %v7079_v5  ;;  %v7077_v21 = vmul.f32 %v10499_v10, %v6974_v59 }
 0x3c6   : > { %7179 = vst [vmem:[%s8956_s20 + $0xe0] sm:$0xff] %v7147_v45  ;;  %v7150_v48 = vmax.f32 %v7118_v2, 0.0  ;;  %v7116_v31 = vadd.f32 %v10506_v9, %v7077_v21 }
 0x3c8   : > { %7182 = vst [vmem:[%s8956_s20 + $0xf8] sm:$0xff] %v7150_v48  ;;  %v7148_v52 = vmax.f32 %v7116_v31, 0.0 }
 0x3ca   : > { %7180 = vst [vmem:[%s8956_s20 + $0xe8] sm:$0xff] %v7148_v52 }
 0x3cb   : > { %8698 = shalt.err (!%p8695_p12)
}
 0x3cc   : > { %s8699_s20 = scalar_lea.hbm %s10735_s29, 4096  ;;  %s8703_s15 = scalar_lea.hbm %s10789_s7, 8192 }
 0x3cd   : > { %p8700_p10 = scmp.ne.s32.totalorder %s10735_s29, %s8699_s20  ;;  %p8704_p6 = scmp.lt.s32.totalorder %s10735_s29, %s10789_s7 }
 0x3ce   : > { %p8705_p9 = scmp.lt.s32.totalorder %s8703_s15, %s8699_s20 }
 0x3cf   : > { %p8701_p1 = pnand %p8700_p10, %p10943_p7 }
 0x3d0   : > { %p8706_p11 = por %p8705_p9, %p8704_p6 }
 0x3d1   : > { %p8702_p4 = pneg %p8701_p1 }
 0x3d3   : > { %p8707_p2 = pnand %p8706_p11, %p8702_p4 }
 0x3d5   : > { %8710 = shalt.err (!%p8707_p2)
}
 0x3d6   : > { %s8762_s22 = smov 128   ;;  %s8763_s10 = smov 8  }
 0x3d7   : > { %8396 = dma.vmem_to_hbm [thread:$0]  (%p10943_p7), %s10737_s30, 4096, %s10735_s29, %s7184_s21, %s8762_s22, %s8762_s22, %s8763_s10  }
 0x3d8 PF: > { %s7212_s28 = sand.u32 1, %s8741_s24   ;;  %p10944_p13 = scmp.ne.s32.totalorder %s10798_s8, 0 }
 0x3d9   : > { %p10945_p0 = scmp.ge.s32.totalorder %s8753_s27, 2  ;;  %s7213_s13 = scalar_lea.sflag [#allocation6], %s7212_s28 }
 0x3db   : > { %p8410_p3 = pnand %p10945_p0, %p10944_p13 }
 0x3dd   : > { %p8411_p8 = pneg %p8410_p3 }
 0x3df   : > { %8736 = dma.done.wait (%p8411_p8), %s7213_s13, 4096  }
 0x3e0   : > { %8738 = vsyncadd (%p8411_p8), %s7213_s13, 4294963200  ;;  %p21_p5 = scmp.ge.s32.totalorder %s8883_s23, 4   ;;  %s10946_s24 = smov %s8745_s25 }
 0x3e1   : > { %s10947_s25 = smov %s8749_s26  ;;  %s10948_s26 = smov %s8899_s12 }
 0x3e2   : > { %s10949_s27 = smov %s8883_s23  ;;  %23 = sbr.rel (!%p21_p5) target bundleno = 8 (0x8), region = 115 }
 0x3e7   :  { %7218 = vsyncpa [#allocation5], 1 }
 0x3e8   :  { %7220 = vsyncpa [#allocation5 + $0x1], 1 }
 0x3e9   :  { %7221 = vsyncpa [#allocation8], 1 }
 0x3ea   :  { %7222 = vsyncpa [#allocation6], 1 }
 0x3eb   :  { %7224 = vsyncpa [#allocation6 + $0x1], 1 }

</bundles_post_ra>
